<compile_context>
chip_gen: v6e
topology: v6e:2x2x1
jax: 0.10.0
libtpu: 0.0.40
codegen_flags: <defaults>
</compile_context>

<pallas_src>
import functools

import jax
import jax.numpy as jnp
from jax import lax
from jax.experimental import pallas as pl
from jax.experimental.pallas import tpu as pltpu

LANE = 128      # vreg lane width
SUBLANE = 8     # vreg sublanes (f32)


def _round_up(x, m):
    return (x + m - 1) // m * m


def _cg_kernel(a_ref, b_ref, x_ref, *, maxiter, tol, inner_steps):
    """Solve A x = b for one batch tile in batch-minor layout.

    a_ref: (N, N, BT)  with a_ref[j, i, b] = A[b, i, j] (contraction axis leading)
    b_ref: (N, BT)     with b_ref[i, b]    = b[b, i]
    x_ref: (N, BT)
    """
    N, BT = b_ref.shape
    b = b_ref[...]                                         # (N, BT) f32

    bnrm2_sq = jnp.sum(b * b, axis=0, keepdims=True)       # ||b||^2     (1, BT)
    atol2 = (tol * tol) * bnrm2_sq                         # (tol*||b||)^2
    zero_mask = bnrm2_sq == 0.0                            # b == 0 (incl. lane padding)

    def bmv(p):
        # q[i, b] = sum_j A[b, i, j] * p[j, b]: lane-dense VPU FMAs, A streamed
        # from VMEM one (N, BT) slab at a time -- no (N, N, BT) temporary.
        # TODO(synk): for very large N, drive this with lax.fori_loop + a VMEM
        # scratch for p (sublane-broadcast reads) to bound unrolled code size.
        q = jnp.zeros((N, BT), jnp.float32)
        for j in range(N):
            q = q + a_ref[j] * p[j:j + 1, :]
        return q

    def one_step(x, r, p, rho_prev, rsq):
        # Converged (or zero-b) lanes are frozen: alpha = beta = 0 and all
        # denominators are guarded, so no 0/0 NaN can be produced.
        conv = jnp.logical_or(rsq < atol2, zero_mask)       # (1, BT)
        rho_cur = rsq                                       # vecdot(r, z), z = r
        beta = jnp.where(conv, 0.0,
                         rho_cur / jnp.where(rho_prev > 0.0, rho_prev, 1.0))
        p = p * beta + r
        q = bmv(p)
        denom = jnp.sum(p * q, axis=0, keepdims=True)
        alpha = jnp.where(conv, 0.0,
                          rho_cur / jnp.where(denom != 0.0, denom, 1.0))
        x = x + alpha * p
        r = r - alpha * q
        rsq = jnp.sum(r * r, axis=0, keepdims=True)
        return x, r, p, rho_cur, rsq

    def cond(carry):
        it, x, r, p, rho_prev, rsq = carry
        done = jnp.all(jnp.logical_or(rsq < atol2, zero_mask))
        return jnp.logical_and(it < maxiter, jnp.logical_not(done))

    def body(carry):
        it, x, r, p, rho_prev, rsq = carry
        # Amortize the vector->scalar convergence sync over `inner_steps`
        # unrolled CG steps (frozen lanes make the extra steps harmless).
        for _ in range(inner_steps):
            x, r, p, rho_prev, rsq = one_step(x, r, p, rho_prev, rsq)
        return (it + inner_steps, x, r, p, rho_prev, rsq)

    x0 = jnp.zeros((N, BT), jnp.float32)       # x = None -> x = 0 -> r = b
    r0 = b
    p0 = jnp.zeros((N, BT), jnp.float32)       # p0 = 0, rho_prev = 1  =>
    rho0 = jnp.ones((1, BT), jnp.float32)      # iter-0: p*beta + r == r (torch p = z)
    carry0 = (jnp.zeros((), jnp.int32), x0, r0, p0, rho0, bnrm2_sq)

    _, x_fin, _, _, _, _ = lax.while_loop(cond, body, carry0)

    # torch: if (bnrm2 == 0).all(): return b.  With x0 = 0 and masked updates
    # the all-zero case already yields x == 0 == b, so no special case needed.
    x_ref[...] = x_fin


def cg_solve(A, b, maxiter=None, tol=1e-5, inner_steps=4):
    """Batched CG solve, mirroring CG.forward(A, b) with x=None, M=None."""
    A = jnp.asarray(A, dtype=jnp.float32)
    b = jnp.asarray(b, dtype=jnp.float32)
    if A.ndim == b.ndim:                       # (..., N, N) vs (..., N, 1) -> squeeze
        b = jnp.squeeze(b, axis=-1)
    else:
        assert A.ndim == b.ndim + 1, "ndims of A and b must differ by 1"
    squeeze_out = False
    if A.ndim == 2:                            # non-batched input
        A, b, squeeze_out = A[None], b[None], True
    B, N = b.shape
    assert A.shape == (B, N, N)
    if maxiter is None:
        maxiter = N * 10
    inner_steps = max(1, min(int(inner_steps), int(maxiter)))

    # ---- batch-minor layout: batch on the lane axis -------------------------
    # A_t[j, i, b] = A[b, i, j]  (contraction axis leading), b_t[i, b] = b[b, i]
    A_t = jnp.transpose(A, (2, 1, 0))
    b_t = jnp.transpose(b, (1, 0))

    if B < LANE:
        BT, B_pad = B, B                       # single full-width tile; VMEM pads lanes
    else:
        B_pad = _round_up(B, LANE)             # lane-aligned batch
        BT = LANE                              # more, smaller tiles: feeds both v7x TCs
        if B_pad > B:                          # and smooths per-tile early-exit tails
            A_t = jnp.pad(A_t, ((0, 0), (0, 0), (0, B_pad - B)))
            b_t = jnp.pad(b_t, ((0, 0), (0, B_pad - B)))
    num_tiles = B_pad // BT

    # ---- VMEM budget with (8,128)-padded shapes ------------------------------
    n_sub = _round_up(N, SUBLANE)
    bt_lane = _round_up(BT, LANE)
    a_tile = N * n_sub * bt_lane * 4           # one A block as stored in VMEM
    vec_tile = n_sub * bt_lane * 4             # one (N, BT) vector block
    # double-buffered A + b inputs, double-buffered x output, ~8 live work
    # vectors (x/r/p/q/slabs), plus compiler headroom.
    vmem_need = 2 * a_tile + 4 * vec_tile + 8 * vec_tile + (4 << 20)
    try:
        vmem_cap = int(pltpu.get_tpu_info().vmem_capacity_bytes)
    except Exception:
        vmem_cap = 64 << 20                    # conservative (v7x per-TC) default
    vmem_limit = int(min(max(vmem_need, 16 << 20), vmem_cap - (2 << 20)))
    # TODO(synk): for N large enough that the double-buffered A tile exceeds
    # VMEM, also tile the contraction axis (grid reduction / emit_pipeline).

    kernel = functools.partial(_cg_kernel, maxiter=int(maxiter), tol=float(tol),
                               inner_steps=inner_steps)
    x_t = pl.pallas_call(
        kernel,
        out_shape=jax.ShapeDtypeStruct((N, B_pad), jnp.float32),
        grid=(num_tiles,),
        in_specs=[
            pl.BlockSpec((N, N, BT), lambda i: (0, 0, i)),
            pl.BlockSpec((N, BT), lambda i: (0, i)),
        ],
        out_specs=pl.BlockSpec((N, BT), lambda i: (0, i)),
        compiler_params=pltpu.CompilerParams(
            dimension_semantics=("parallel",),
            vmem_limit_bytes=vmem_limit),
    )(A_t, b_t)

    x = jnp.transpose(x_t[:, :B], (1, 0))
    if squeeze_out:
        x = jnp.squeeze(x, axis=0)
    return x


if __name__ == "__main__":
    key = jax.random.PRNGKey(0)

    def make_problem(k, B, N):
        k1, k2 = jax.random.split(k)
        Q = jax.random.normal(k1, (B, N, N), dtype=jnp.float32)
        A = jnp.matmul(Q, jnp.swapaxes(Q, -1, -2)) \
            + N * jnp.eye(N, dtype=jnp.float32)[None]          # SPD, well conditioned
        b = jax.random.normal(k2, (B, N, 1), dtype=jnp.float32)
        return A, b

    def check(A, b, x):
        bflat = b[..., 0]
        res = jnp.linalg.norm(jnp.einsum('bij,bj->bi', A, x) - bflat, axis=-1)
        lim = 1e-2 * jnp.linalg.norm(bflat, axis=-1) + 1e-3
        assert bool(jnp.all(res < lim)), (res, lim)

    k1, k2 = jax.random.split(key)

    # Small-batch path: BT = B = 16 (single tile, lanes padded inside VMEM).
    A1, b1 = make_problem(k1, 16, 32)
    x1 = jax.block_until_ready(cg_solve(A1, b1))
    check(A1, b1, x1)

    # Lane-aligned multi-tile path: B=130 -> padded to 256, grid=(2,), BT=128.
    A2, b2 = make_problem(k2, 130, 32)
    x2 = jax.block_until_ready(cg_solve(A2, b2))
    check(A2, b2, x2)

    print("KERNEL_OK")
</pallas_src>

<mosaic_0001>
module attributes {stable_mosaic.version = 11 : i64} {
  func.func @_cg_kernel(%arg0: i32, %arg1: memref<32x32x16xf32, #tpu.memory_space<vmem>>, %arg2: memref<32x16xf32, #tpu.memory_space<vmem>>, %arg3: memref<32x16xf32, #tpu.memory_space<vmem>>) attributes {dimension_semantics = [#tpu.dimension_semantics<parallel>], iteration_bounds = array<i64: 1>, scalar_prefetch = 0 : i64, scratch_operands = 0 : i64, tpu.core_type = #tpu.core_type<tc>, window_params = [{transform_indices = @transform_0, window_bounds = array<i64: 32, 32, 16>}, {transform_indices = @transform_1, window_bounds = array<i64: 32, 16>}, {transform_indices = @transform_2, window_bounds = array<i64: 32, 16>}]} {
    %c0 = arith.constant 0 : index
    %c0_0 = arith.constant 0 : index
    %0 = vector.load %arg2[%c0, %c0_0] : memref<32x16xf32, #tpu.memory_space<vmem>>, vector<32x16xf32>
    %1 = arith.mulf %0, %0 : vector<32x16xf32>
    %cst = arith.constant dense<0.000000e+00> : vector<16xf32>
    %2 = vector.multi_reduction <add>, %1, %cst [0] : vector<32x16xf32> to vector<16xf32>
    %3 = vector.shape_cast %2 : vector<16xf32> to vector<1x16xf32>
    %cst_1 = arith.constant 1.000000e-10 : f32
    %4 = vector.broadcast %cst_1 : f32 to vector<1x16xf32>
    %5 = arith.mulf %4, %3 : vector<1x16xf32>
    %cst_2 = arith.constant 0.000000e+00 : f32
    %6 = vector.broadcast %cst_2 : f32 to vector<1x16xf32>
    %7 = arith.cmpf oeq, %3, %6 : vector<1x16xf32>
    %cst_3 = arith.constant 0.000000e+00 : f32
    %8 = vector.broadcast %cst_3 : f32 to vector<32x16xf32>
    %cst_4 = arith.constant 0.000000e+00 : f32
    %9 = vector.broadcast %cst_4 : f32 to vector<32x16xf32>
    %cst_5 = arith.constant 1.000000e+00 : f32
    %10 = vector.broadcast %cst_5 : f32 to vector<1x16xf32>
    %c0_i32 = arith.constant 0 : i32
    %11:6 = scf.while (%arg4 = %c0_i32, %arg5 = %8, %arg6 = %0, %arg7 = %9, %arg8 = %10, %arg9 = %3) : (i32, vector<32x16xf32>, vector<32x16xf32>, vector<32x16xf32>, vector<1x16xf32>, vector<1x16xf32>) -> (i32, vector<32x16xf32>, vector<32x16xf32>, vector<32x16xf32>, vector<1x16xf32>, vector<1x16xf32>) {
      %13 = arith.cmpf olt, %arg9, %5 : vector<1x16xf32>
      %14 = arith.ori %13, %7 : vector<1x16xi1>
      %cst_8 = arith.constant 1.000000e+00 : f32
      %cst_9 = arith.constant 0.000000e+00 : f32
      %15 = vector.broadcast %cst_8 : f32 to vector<1x16xf32>
      %16 = vector.broadcast %cst_9 : f32 to vector<1x16xf32>
      %17 = arith.select %14, %15, %16 : vector<1x16xi1>, vector<1x16xf32>
      %18 = vector.shape_cast %17 : vector<1x16xf32> to vector<1x1x16xf32>
      %cst_10 = arith.constant dense<0x7F800000> : vector<1xf32>
      %19 = vector.multi_reduction <minimumf>, %18, %cst_10 [1, 2] : vector<1x1x16xf32> to vector<1xf32>
      %20 = vector.shape_cast %19 : vector<1xf32> to vector<1x1x1xf32>
      %21 = vector.extract %20[0, 0, 0] : f32 from vector<1x1x1xf32>
      %cst_11 = arith.constant 0.000000e+00 : f32
      %22 = arith.cmpf ogt, %21, %cst_11 : f32
      %c320_i32 = arith.constant 320 : i32
      %23 = arith.cmpi slt, %arg4, %c320_i32 : i32
      %true = arith.constant true
      %24 = arith.xori %22, %true : i1
      %25 = arith.andi %23, %24 : i1
      scf.condition(%25) %arg4, %arg5, %arg6, %arg7, %arg8, %arg9 : i32, vector<32x16xf32>, vector<32x16xf32>, vector<32x16xf32>, vector<1x16xf32>, vector<1x16xf32>
    } do {
    ^bb0(%arg4: i32, %arg5: vector<32x16xf32>, %arg6: vector<32x16xf32>, %arg7: vector<32x16xf32>, %arg8: vector<1x16xf32>, %arg9: vector<1x16xf32>):
      %13 = arith.cmpf olt, %arg9, %5 : vector<1x16xf32>
      %14 = arith.ori %13, %7 : vector<1x16xi1>
      %cst_8 = arith.constant 0.000000e+00 : f32
      %15 = vector.broadcast %cst_8 : f32 to vector<1x16xf32>
      %16 = arith.cmpf ogt, %arg8, %15 : vector<1x16xf32>
      %cst_9 = arith.constant 1.000000e+00 : f32
      %17 = vector.broadcast %cst_9 : f32 to vector<1x16xf32>
      %18 = arith.select %16, %arg8, %17 : vector<1x16xi1>, vector<1x16xf32>
      %19 = arith.divf %arg9, %18 : vector<1x16xf32>
      %cst_10 = arith.constant 0.000000e+00 : f32
      %20 = vector.broadcast %cst_10 : f32 to vector<1x16xf32>
      %21 = arith.select %14, %20, %19 : vector<1x16xi1>, vector<1x16xf32>
      %22 = vector.broadcast %21 : vector<1x16xf32> to vector<32x16xf32>
      %23 = arith.mulf %arg7, %22 : vector<32x16xf32>
      %24 = arith.addf %23, %arg6 : vector<32x16xf32>
      %cst_11 = arith.constant 0.000000e+00 : f32
      %25 = vector.broadcast %cst_11 : f32 to vector<32x16xf32>
      %c0_12 = arith.constant 0 : index
      %c0_13 = arith.constant 0 : index
      %c0_14 = arith.constant 0 : index
      %26 = vector.load %arg1[%c0_12, %c0_13, %c0_14] : memref<32x32x16xf32, #tpu.memory_space<vmem>>, vector<1x32x16xf32>
      %27 = vector.shape_cast %26 : vector<1x32x16xf32> to vector<32x16xf32>
      %28 = vector.extract_strided_slice %24 {offsets = [0, 0], sizes = [1, 16], strides = [1, 1]} : vector<32x16xf32> to vector<1x16xf32>
      %29 = vector.broadcast %28 : vector<1x16xf32> to vector<32x16xf32>
      %30 = arith.mulf %27, %29 : vector<32x16xf32>
      %31 = arith.addf %25, %30 : vector<32x16xf32>
      %c1 = arith.constant 1 : index
      %c0_15 = arith.constant 0 : index
      %c0_16 = arith.constant 0 : index
      %32 = vector.load %arg1[%c1, %c0_15, %c0_16] : memref<32x32x16xf32, #tpu.memory_space<vmem>>, vector<1x32x16xf32>
      %33 = vector.shape_cast %32 : vector<1x32x16xf32> to vector<32x16xf32>
      %34 = vector.extract_strided_slice %24 {offsets = [1, 0], sizes = [1, 16], strides = [1, 1]} : vector<32x16xf32> to vector<1x16xf32>
      %35 = vector.broadcast %34 : vector<1x16xf32> to vector<32x16xf32>
      %36 = arith.mulf %33, %35 : vector<32x16xf32>
      %37 = arith.addf %31, %36 : vector<32x16xf32>
      %c2 = arith.constant 2 : index
      %c0_17 = arith.constant 0 : index
      %c0_18 = arith.constant 0 : index
      %38 = vector.load %arg1[%c2, %c0_17, %c0_18] : memref<32x32x16xf32, #tpu.memory_space<vmem>>, vector<1x32x16xf32>
      %39 = vector.shape_cast %38 : vector<1x32x16xf32> to vector<32x16xf32>
      %40 = vector.extract_strided_slice %24 {offsets = [2, 0], sizes = [1, 16], strides = [1, 1]} : vector<32x16xf32> to vector<1x16xf32>
      %41 = vector.broadcast %40 : vector<1x16xf32> to vector<32x16xf32>
      %42 = arith.mulf %39, %41 : vector<32x16xf32>
      %43 = arith.addf %37, %42 : vector<32x16xf32>
      %c3 = arith.constant 3 : index
      %c0_19 = arith.constant 0 : index
      %c0_20 = arith.constant 0 : index
      %44 = vector.load %arg1[%c3, %c0_19, %c0_20] : memref<32x32x16xf32, #tpu.memory_space<vmem>>, vector<1x32x16xf32>
      %45 = vector.shape_cast %44 : vector<1x32x16xf32> to vector<32x16xf32>
      %46 = vector.extract_strided_slice %24 {offsets = [3, 0], sizes = [1, 16], strides = [1, 1]} : vector<32x16xf32> to vector<1x16xf32>
      %47 = vector.broadcast %46 : vector<1x16xf32> to vector<32x16xf32>
      %48 = arith.mulf %45, %47 : vector<32x16xf32>
      %49 = arith.addf %43, %48 : vector<32x16xf32>
      %c4 = arith.constant 4 : index
      %c0_21 = arith.constant 0 : index
      %c0_22 = arith.constant 0 : index
      %50 = vector.load %arg1[%c4, %c0_21, %c0_22] : memref<32x32x16xf32, #tpu.memory_space<vmem>>, vector<1x32x16xf32>
      %51 = vector.shape_cast %50 : vector<1x32x16xf32> to vector<32x16xf32>
      %52 = vector.extract_strided_slice %24 {offsets = [4, 0], sizes = [1, 16], strides = [1, 1]} : vector<32x16xf32> to vector<1x16xf32>
      %53 = vector.broadcast %52 : vector<1x16xf32> to vector<32x16xf32>
      %54 = arith.mulf %51, %53 : vector<32x16xf32>
      %55 = arith.addf %49, %54 : vector<32x16xf32>
      %c5 = arith.constant 5 : index
      %c0_23 = arith.constant 0 : index
      %c0_24 = arith.constant 0 : index
      %56 = vector.load %arg1[%c5, %c0_23, %c0_24] : memref<32x32x16xf32, #tpu.memory_space<vmem>>, vector<1x32x16xf32>
      %57 = vector.shape_cast %56 : vector<1x32x16xf32> to vector<32x16xf32>
      %58 = vector.extract_strided_slice %24 {offsets = [5, 0], sizes = [1, 16], strides = [1, 1]} : vector<32x16xf32> to vector<1x16xf32>
      %59 = vector.broadcast %58 : vector<1x16xf32> to vector<32x16xf32>
      %60 = arith.mulf %57, %59 : vector<32x16xf32>
      %61 = arith.addf %55, %60 : vector<32x16xf32>
      %c6 = arith.constant 6 : index
      %c0_25 = arith.constant 0 : index
      %c0_26 = arith.constant 0 : index
      %62 = vector.load %arg1[%c6, %c0_25, %c0_26] : memref<32x32x16xf32, #tpu.memory_space<vmem>>, vector<1x32x16xf32>
      %63 = vector.shape_cast %62 : vector<1x32x16xf32> to vector<32x16xf32>
      %64 = vector.extract_strided_slice %24 {offsets = [6, 0], sizes = [1, 16], strides = [1, 1]} : vector<32x16xf32> to vector<1x16xf32>
      %65 = vector.broadcast %64 : vector<1x16xf32> to vector<32x16xf32>
      %66 = arith.mulf %63, %65 : vector<32x16xf32>
      %67 = arith.addf %61, %66 : vector<32x16xf32>
      %c7 = arith.constant 7 : index
      %c0_27 = arith.constant 0 : index
      %c0_28 = arith.constant 0 : index
      %68 = vector.load %arg1[%c7, %c0_27, %c0_28] : memref<32x32x16xf32, #tpu.memory_space<vmem>>, vector<1x32x16xf32>
      %69 = vector.shape_cast %68 : vector<1x32x16xf32> to vector<32x16xf32>
      %70 = vector.extract_strided_slice %24 {offsets = [7, 0], sizes = [1, 16], strides = [1, 1]} : vector<32x16xf32> to vector<1x16xf32>
      %71 = vector.broadcast %70 : vector<1x16xf32> to vector<32x16xf32>
      %72 = arith.mulf %69, %71 : vector<32x16xf32>
      %73 = arith.addf %67, %72 : vector<32x16xf32>
      %c8 = arith.constant 8 : index
      %c0_29 = arith.constant 0 : index
      %c0_30 = arith.constant 0 : index
      %74 = vector.load %arg1[%c8, %c0_29, %c0_30] : memref<32x32x16xf32, #tpu.memory_space<vmem>>, vector<1x32x16xf32>
      %75 = vector.shape_cast %74 : vector<1x32x16xf32> to vector<32x16xf32>
      %76 = vector.extract_strided_slice %24 {offsets = [8, 0], sizes = [1, 16], strides = [1, 1]} : vector<32x16xf32> to vector<1x16xf32>
      %77 = vector.broadcast %76 : vector<1x16xf32> to vector<32x16xf32>
      %78 = arith.mulf %75, %77 : vector<32x16xf32>
      %79 = arith.addf %73, %78 : vector<32x16xf32>
      %c9 = arith.constant 9 : index
      %c0_31 = arith.constant 0 : index
      %c0_32 = arith.constant 0 : index
      %80 = vector.load %arg1[%c9, %c0_31, %c0_32] : memref<32x32x16xf32, #tpu.memory_space<vmem>>, vector<1x32x16xf32>
      %81 = vector.shape_cast %80 : vector<1x32x16xf32> to vector<32x16xf32>
      %82 = vector.extract_strided_slice %24 {offsets = [9, 0], sizes = [1, 16], strides = [1, 1]} : vector<32x16xf32> to vector<1x16xf32>
      %83 = vector.broadcast %82 : vector<1x16xf32> to vector<32x16xf32>
      %84 = arith.mulf %81, %83 : vector<32x16xf32>
      %85 = arith.addf %79, %84 : vector<32x16xf32>
      %c10 = arith.constant 10 : index
      %c0_33 = arith.constant 0 : index
      %c0_34 = arith.constant 0 : index
      %86 = vector.load %arg1[%c10, %c0_33, %c0_34] : memref<32x32x16xf32, #tpu.memory_space<vmem>>, vector<1x32x16xf32>
      %87 = vector.shape_cast %86 : vector<1x32x16xf32> to vector<32x16xf32>
      %88 = vector.extract_strided_slice %24 {offsets = [10, 0], sizes = [1, 16], strides = [1, 1]} : vector<32x16xf32> to vector<1x16xf32>
      %89 = vector.broadcast %88 : vector<1x16xf32> to vector<32x16xf32>
      %90 = arith.mulf %87, %89 : vector<32x16xf32>
      %91 = arith.addf %85, %90 : vector<32x16xf32>
      %c11 = arith.constant 11 : index
      %c0_35 = arith.constant 0 : index
      %c0_36 = arith.constant 0 : index
      %92 = vector.load %arg1[%c11, %c0_35, %c0_36] : memref<32x32x16xf32, #tpu.memory_space<vmem>>, vector<1x32x16xf32>
      %93 = vector.shape_cast %92 : vector<1x32x16xf32> to vector<32x16xf32>
      %94 = vector.extract_strided_slice %24 {offsets = [11, 0], sizes = [1, 16], strides = [1, 1]} : vector<32x16xf32> to vector<1x16xf32>
      %95 = vector.broadcast %94 : vector<1x16xf32> to vector<32x16xf32>
      %96 = arith.mulf %93, %95 : vector<32x16xf32>
      %97 = arith.addf %91, %96 : vector<32x16xf32>
      %c12 = arith.constant 12 : index
      %c0_37 = arith.constant 0 : index
      %c0_38 = arith.constant 0 : index
      %98 = vector.load %arg1[%c12, %c0_37, %c0_38] : memref<32x32x16xf32, #tpu.memory_space<vmem>>, vector<1x32x16xf32>
      %99 = vector.shape_cast %98 : vector<1x32x16xf32> to vector<32x16xf32>
      %100 = vector.extract_strided_slice %24 {offsets = [12, 0], sizes = [1, 16], strides = [1, 1]} : vector<32x16xf32> to vector<1x16xf32>
      %101 = vector.broadcast %100 : vector<1x16xf32> to vector<32x16xf32>
      %102 = arith.mulf %99, %101 : vector<32x16xf32>
      %103 = arith.addf %97, %102 : vector<32x16xf32>
      %c13 = arith.constant 13 : index
      %c0_39 = arith.constant 0 : index
      %c0_40 = arith.constant 0 : index
      %104 = vector.load %arg1[%c13, %c0_39, %c0_40] : memref<32x32x16xf32, #tpu.memory_space<vmem>>, vector<1x32x16xf32>
      %105 = vector.shape_cast %104 : vector<1x32x16xf32> to vector<32x16xf32>
      %106 = vector.extract_strided_slice %24 {offsets = [13, 0], sizes = [1, 16], strides = [1, 1]} : vector<32x16xf32> to vector<1x16xf32>
      %107 = vector.broadcast %106 : vector<1x16xf32> to vector<32x16xf32>
      %108 = arith.mulf %105, %107 : vector<32x16xf32>
      %109 = arith.addf %103, %108 : vector<32x16xf32>
      %c14 = arith.constant 14 : index
      %c0_41 = arith.constant 0 : index
      %c0_42 = arith.constant 0 : index
      %110 = vector.load %arg1[%c14, %c0_41, %c0_42] : memref<32x32x16xf32, #tpu.memory_space<vmem>>, vector<1x32x16xf32>
      %111 = vector.shape_cast %110 : vector<1x32x16xf32> to vector<32x16xf32>
      %112 = vector.extract_strided_slice %24 {offsets = [14, 0], sizes = [1, 16], strides = [1, 1]} : vector<32x16xf32> to vector<1x16xf32>
      %113 = vector.broadcast %112 : vector<1x16xf32> to vector<32x16xf32>
      %114 = arith.mulf %111, %113 : vector<32x16xf32>
      %115 = arith.addf %109, %114 : vector<32x16xf32>
      %c15 = arith.constant 15 : index
      %c0_43 = arith.constant 0 : index
      %c0_44 = arith.constant 0 : index
      %116 = vector.load %arg1[%c15, %c0_43, %c0_44] : memref<32x32x16xf32, #tpu.memory_space<vmem>>, vector<1x32x16xf32>
      %117 = vector.shape_cast %116 : vector<1x32x16xf32> to vector<32x16xf32>
      %118 = vector.extract_strided_slice %24 {offsets = [15, 0], sizes = [1, 16], strides = [1, 1]} : vector<32x16xf32> to vector<1x16xf32>
      %119 = vector.broadcast %118 : vector<1x16xf32> to vector<32x16xf32>
      %120 = arith.mulf %117, %119 : vector<32x16xf32>
      %121 = arith.addf %115, %120 : vector<32x16xf32>
      %c16 = arith.constant 16 : index
      %c0_45 = arith.constant 0 : index
      %c0_46 = arith.constant 0 : index
      %122 = vector.load %arg1[%c16, %c0_45, %c0_46] : memref<32x32x16xf32, #tpu.memory_space<vmem>>, vector<1x32x16xf32>
      %123 = vector.shape_cast %122 : vector<1x32x16xf32> to vector<32x16xf32>
      %124 = vector.extract_strided_slice %24 {offsets = [16, 0], sizes = [1, 16], strides = [1, 1]} : vector<32x16xf32> to vector<1x16xf32>
      %125 = vector.broadcast %124 : vector<1x16xf32> to vector<32x16xf32>
      %126 = arith.mulf %123, %125 : vector<32x16xf32>
      %127 = arith.addf %121, %126 : vector<32x16xf32>
      %c17 = arith.constant 17 : index
      %c0_47 = arith.constant 0 : index
      %c0_48 = arith.constant 0 : index
      %128 = vector.load %arg1[%c17, %c0_47, %c0_48] : memref<32x32x16xf32, #tpu.memory_space<vmem>>, vector<1x32x16xf32>
      %129 = vector.shape_cast %128 : vector<1x32x16xf32> to vector<32x16xf32>
      %130 = vector.extract_strided_slice %24 {offsets = [17, 0], sizes = [1, 16], strides = [1, 1]} : vector<32x16xf32> to vector<1x16xf32>
      %131 = vector.broadcast %130 : vector<1x16xf32> to vector<32x16xf32>
      %132 = arith.mulf %129, %131 : vector<32x16xf32>
      %133 = arith.addf %127, %132 : vector<32x16xf32>
      %c18 = arith.constant 18 : index
      %c0_49 = arith.constant 0 : index
      %c0_50 = arith.constant 0 : index
      %134 = vector.load %arg1[%c18, %c0_49, %c0_50] : memref<32x32x16xf32, #tpu.memory_space<vmem>>, vector<1x32x16xf32>
      %135 = vector.shape_cast %134 : vector<1x32x16xf32> to vector<32x16xf32>
      %136 = vector.extract_strided_slice %24 {offsets = [18, 0], sizes = [1, 16], strides = [1, 1]} : vector<32x16xf32> to vector<1x16xf32>
      %137 = vector.broadcast %136 : vector<1x16xf32> to vector<32x16xf32>
      %138 = arith.mulf %135, %137 : vector<32x16xf32>
      %139 = arith.addf %133, %138 : vector<32x16xf32>
      %c19 = arith.constant 19 : index
      %c0_51 = arith.constant 0 : index
      %c0_52 = arith.constant 0 : index
      %140 = vector.load %arg1[%c19, %c0_51, %c0_52] : memref<32x32x16xf32, #tpu.memory_space<vmem>>, vector<1x32x16xf32>
      %141 = vector.shape_cast %140 : vector<1x32x16xf32> to vector<32x16xf32>
      %142 = vector.extract_strided_slice %24 {offsets = [19, 0], sizes = [1, 16], strides = [1, 1]} : vector<32x16xf32> to vector<1x16xf32>
      %143 = vector.broadcast %142 : vector<1x16xf32> to vector<32x16xf32>
      %144 = arith.mulf %141, %143 : vector<32x16xf32>
      %145 = arith.addf %139, %144 : vector<32x16xf32>
      %c20 = arith.constant 20 : index
      %c0_53 = arith.constant 0 : index
      %c0_54 = arith.constant 0 : index
      %146 = vector.load %arg1[%c20, %c0_53, %c0_54] : memref<32x32x16xf32, #tpu.memory_space<vmem>>, vector<1x32x16xf32>
      %147 = vector.shape_cast %146 : vector<1x32x16xf32> to vector<32x16xf32>
      %148 = vector.extract_strided_slice %24 {offsets = [20, 0], sizes = [1, 16], strides = [1, 1]} : vector<32x16xf32> to vector<1x16xf32>
      %149 = vector.broadcast %148 : vector<1x16xf32> to vector<32x16xf32>
      %150 = arith.mulf %147, %149 : vector<32x16xf32>
      %151 = arith.addf %145, %150 : vector<32x16xf32>
      %c21 = arith.constant 21 : index
      %c0_55 = arith.constant 0 : index
      %c0_56 = arith.constant 0 : index
      %152 = vector.load %arg1[%c21, %c0_55, %c0_56] : memref<32x32x16xf32, #tpu.memory_space<vmem>>, vector<1x32x16xf32>
      %153 = vector.shape_cast %152 : vector<1x32x16xf32> to vector<32x16xf32>
      %154 = vector.extract_strided_slice %24 {offsets = [21, 0], sizes = [1, 16], strides = [1, 1]} : vector<32x16xf32> to vector<1x16xf32>
      %155 = vector.broadcast %154 : vector<1x16xf32> to vector<32x16xf32>
      %156 = arith.mulf %153, %155 : vector<32x16xf32>
      %157 = arith.addf %151, %156 : vector<32x16xf32>
      %c22 = arith.constant 22 : index
      %c0_57 = arith.constant 0 : index
      %c0_58 = arith.constant 0 : index
      %158 = vector.load %arg1[%c22, %c0_57, %c0_58] : memref<32x32x16xf32, #tpu.memory_space<vmem>>, vector<1x32x16xf32>
      %159 = vector.shape_cast %158 : vector<1x32x16xf32> to vector<32x16xf32>
      %160 = vector.extract_strided_slice %24 {offsets = [22, 0], sizes = [1, 16], strides = [1, 1]} : vector<32x16xf32> to vector<1x16xf32>
      %161 = vector.broadcast %160 : vector<1x16xf32> to vector<32x16xf32>
      %162 = arith.mulf %159, %161 : vector<32x16xf32>
      %163 = arith.addf %157, %162 : vector<32x16xf32>
      %c23 = arith.constant 23 : index
      %c0_59 = arith.constant 0 : index
      %c0_60 = arith.constant 0 : index
      %164 = vector.load %arg1[%c23, %c0_59, %c0_60] : memref<32x32x16xf32, #tpu.memory_space<vmem>>, vector<1x32x16xf32>
      %165 = vector.shape_cast %164 : vector<1x32x16xf32> to vector<32x16xf32>
      %166 = vector.extract_strided_slice %24 {offsets = [23, 0], sizes = [1, 16], strides = [1, 1]} : vector<32x16xf32> to vector<1x16xf32>
      %167 = vector.broadcast %166 : vector<1x16xf32> to vector<32x16xf32>
      %168 = arith.mulf %165, %167 : vector<32x16xf32>
      %169 = arith.addf %163, %168 : vector<32x16xf32>
      %c24 = arith.constant 24 : index
      %c0_61 = arith.constant 0 : index
      %c0_62 = arith.constant 0 : index
      %170 = vector.load %arg1[%c24, %c0_61, %c0_62] : memref<32x32x16xf32, #tpu.memory_space<vmem>>, vector<1x32x16xf32>
      %171 = vector.shape_cast %170 : vector<1x32x16xf32> to vector<32x16xf32>
      %172 = vector.extract_strided_slice %24 {offsets = [24, 0], sizes = [1, 16], strides = [1, 1]} : vector<32x16xf32> to vector<1x16xf32>
      %173 = vector.broadcast %172 : vector<1x16xf32> to vector<32x16xf32>
      %174 = arith.mulf %171, %173 : vector<32x16xf32>
      %175 = arith.addf %169, %174 : vector<32x16xf32>
      %c25 = arith.constant 25 : index
      %c0_63 = arith.constant 0 : index
      %c0_64 = arith.constant 0 : index
      %176 = vector.load %arg1[%c25, %c0_63, %c0_64] : memref<32x32x16xf32, #tpu.memory_space<vmem>>, vector<1x32x16xf32>
      %177 = vector.shape_cast %176 : vector<1x32x16xf32> to vector<32x16xf32>
      %178 = vector.extract_strided_slice %24 {offsets = [25, 0], sizes = [1, 16], strides = [1, 1]} : vector<32x16xf32> to vector<1x16xf32>
      %179 = vector.broadcast %178 : vector<1x16xf32> to vector<32x16xf32>
      %180 = arith.mulf %177, %179 : vector<32x16xf32>
      %181 = arith.addf %175, %180 : vector<32x16xf32>
      %c26 = arith.constant 26 : index
      %c0_65 = arith.constant 0 : index
      %c0_66 = arith.constant 0 : index
      %182 = vector.load %arg1[%c26, %c0_65, %c0_66] : memref<32x32x16xf32, #tpu.memory_space<vmem>>, vector<1x32x16xf32>
      %183 = vector.shape_cast %182 : vector<1x32x16xf32> to vector<32x16xf32>
      %184 = vector.extract_strided_slice %24 {offsets = [26, 0], sizes = [1, 16], strides = [1, 1]} : vector<32x16xf32> to vector<1x16xf32>
      %185 = vector.broadcast %184 : vector<1x16xf32> to vector<32x16xf32>
      %186 = arith.mulf %183, %185 : vector<32x16xf32>
      %187 = arith.addf %181, %186 : vector<32x16xf32>
      %c27 = arith.constant 27 : index
      %c0_67 = arith.constant 0 : index
      %c0_68 = arith.constant 0 : index
      %188 = vector.load %arg1[%c27, %c0_67, %c0_68] : memref<32x32x16xf32, #tpu.memory_space<vmem>>, vector<1x32x16xf32>
      %189 = vector.shape_cast %188 : vector<1x32x16xf32> to vector<32x16xf32>
      %190 = vector.extract_strided_slice %24 {offsets = [27, 0], sizes = [1, 16], strides = [1, 1]} : vector<32x16xf32> to vector<1x16xf32>
      %191 = vector.broadcast %190 : vector<1x16xf32> to vector<32x16xf32>
      %192 = arith.mulf %189, %191 : vector<32x16xf32>
      %193 = arith.addf %187, %192 : vector<32x16xf32>
      %c28 = arith.constant 28 : index
      %c0_69 = arith.constant 0 : index
      %c0_70 = arith.constant 0 : index
      %194 = vector.load %arg1[%c28, %c0_69, %c0_70] : memref<32x32x16xf32, #tpu.memory_space<vmem>>, vector<1x32x16xf32>
      %195 = vector.shape_cast %194 : vector<1x32x16xf32> to vector<32x16xf32>
      %196 = vector.extract_strided_slice %24 {offsets = [28, 0], sizes = [1, 16], strides = [1, 1]} : vector<32x16xf32> to vector<1x16xf32>
      %197 = vector.broadcast %196 : vector<1x16xf32> to vector<32x16xf32>
      %198 = arith.mulf %195, %197 : vector<32x16xf32>
      %199 = arith.addf %193, %198 : vector<32x16xf32>
      %c29 = arith.constant 29 : index
      %c0_71 = arith.constant 0 : index
      %c0_72 = arith.constant 0 : index
      %200 = vector.load %arg1[%c29, %c0_71, %c0_72] : memref<32x32x16xf32, #tpu.memory_space<vmem>>, vector<1x32x16xf32>
      %201 = vector.shape_cast %200 : vector<1x32x16xf32> to vector<32x16xf32>
      %202 = vector.extract_strided_slice %24 {offsets = [29, 0], sizes = [1, 16], strides = [1, 1]} : vector<32x16xf32> to vector<1x16xf32>
      %203 = vector.broadcast %202 : vector<1x16xf32> to vector<32x16xf32>
      %204 = arith.mulf %201, %203 : vector<32x16xf32>
      %205 = arith.addf %199, %204 : vector<32x16xf32>
      %c30 = arith.constant 30 : index
      %c0_73 = arith.constant 0 : index
      %c0_74 = arith.constant 0 : index
      %206 = vector.load %arg1[%c30, %c0_73, %c0_74] : memref<32x32x16xf32, #tpu.memory_space<vmem>>, vector<1x32x16xf32>
      %207 = vector.shape_cast %206 : vector<1x32x16xf32> to vector<32x16xf32>
      %208 = vector.extract_strided_slice %24 {offsets = [30, 0], sizes = [1, 16], strides = [1, 1]} : vector<32x16xf32> to vector<1x16xf32>
      %209 = vector.broadcast %208 : vector<1x16xf32> to vector<32x16xf32>
      %210 = arith.mulf %207, %209 : vector<32x16xf32>
      %211 = arith.addf %205, %210 : vector<32x16xf32>
      %c31 = arith.constant 31 : index
      %c0_75 = arith.constant 0 : index
      %c0_76 = arith.constant 0 : index
      %212 = vector.load %arg1[%c31, %c0_75, %c0_76] : memref<32x32x16xf32, #tpu.memory_space<vmem>>, vector<1x32x16xf32>
      %213 = vector.shape_cast %212 : vector<1x32x16xf32> to vector<32x16xf32>
      %214 = vector.extract_strided_slice %24 {offsets = [31, 0], sizes = [1, 16], strides = [1, 1]} : vector<32x16xf32> to vector<1x16xf32>
      %215 = vector.broadcast %214 : vector<1x16xf32> to vector<32x16xf32>
      %216 = arith.mulf %213, %215 : vector<32x16xf32>
      %217 = arith.addf %211, %216 : vector<32x16xf32>
      %218 = arith.mulf %24, %217 : vector<32x16xf32>
      %cst_77 = arith.constant dense<0.000000e+00> : vector<16xf32>
      %219 = vector.multi_reduction <add>, %218, %cst_77 [0] : vector<32x16xf32> to vector<16xf32>
      %220 = vector.shape_cast %219 : vector<16xf32> to vector<1x16xf32>
      %cst_78 = arith.constant 0.000000e+00 : f32
      %221 = vector.broadcast %cst_78 : f32 to vector<1x16xf32>
      %222 = arith.cmpf one, %220, %221 : vector<1x16xf32>
      %cst_79 = arith.constant 1.000000e+00 : f32
      %223 = vector.broadcast %cst_79 : f32 to vector<1x16xf32>
      %224 = arith.select %222, %220, %223 : vector<1x16xi1>, vector<1x16xf32>
      %225 = arith.divf %arg9, %224 : vector<1x16xf32>
      %cst_80 = arith.constant 0.000000e+00 : f32
      %226 = vector.broadcast %cst_80 : f32 to vector<1x16xf32>
      %227 = arith.select %14, %226, %225 : vector<1x16xi1>, vector<1x16xf32>
      %228 = vector.broadcast %227 : vector<1x16xf32> to vector<32x16xf32>
      %229 = arith.mulf %228, %24 : vector<32x16xf32>
      %230 = arith.addf %arg5, %229 : vector<32x16xf32>
      %231 = vector.broadcast %227 : vector<1x16xf32> to vector<32x16xf32>
      %232 = arith.mulf %231, %217 : vector<32x16xf32>
      %233 = arith.subf %arg6, %232 : vector<32x16xf32>
      %234 = arith.mulf %233, %233 : vector<32x16xf32>
      %cst_81 = arith.constant dense<0.000000e+00> : vector<16xf32>
      %235 = vector.multi_reduction <add>, %234, %cst_81 [0] : vector<32x16xf32> to vector<16xf32>
      %236 = vector.shape_cast %235 : vector<16xf32> to vector<1x16xf32>
      %237 = arith.cmpf olt, %236, %5 : vector<1x16xf32>
      %238 = arith.ori %237, %7 : vector<1x16xi1>
      %cst_82 = arith.constant 0.000000e+00 : f32
      %239 = vector.broadcast %cst_82 : f32 to vector<1x16xf32>
      %240 = arith.cmpf ogt, %arg9, %239 : vector<1x16xf32>
      %cst_83 = arith.constant 1.000000e+00 : f32
      %241 = vector.broadcast %cst_83 : f32 to vector<1x16xf32>
      %242 = arith.select %240, %arg9, %241 : vector<1x16xi1>, vector<1x16xf32>
      %243 = arith.divf %236, %242 : vector<1x16xf32>
      %cst_84 = arith.constant 0.000000e+00 : f32
      %244 = vector.broadcast %cst_84 : f32 to vector<1x16xf32>
      %245 = arith.select %238, %244, %243 : vector<1x16xi1>, vector<1x16xf32>
      %246 = vector.broadcast %245 : vector<1x16xf32> to vector<32x16xf32>
      %247 = arith.mulf %24, %246 : vector<32x16xf32>
      %248 = arith.addf %247, %233 : vector<32x16xf32>
      %cst_85 = arith.constant 0.000000e+00 : f32
      %249 = vector.broadcast %cst_85 : f32 to vector<32x16xf32>
      %c0_86 = arith.constant 0 : index
      %c0_87 = arith.constant 0 : index
      %c0_88 = arith.constant 0 : index
      %250 = vector.load %arg1[%c0_86, %c0_87, %c0_88] : memref<32x32x16xf32, #tpu.memory_space<vmem>>, vector<1x32x16xf32>
      %251 = vector.shape_cast %250 : vector<1x32x16xf32> to vector<32x16xf32>
      %252 = vector.extract_strided_slice %248 {offsets = [0, 0], sizes = [1, 16], strides = [1, 1]} : vector<32x16xf32> to vector<1x16xf32>
      %253 = vector.broadcast %252 : vector<1x16xf32> to vector<32x16xf32>
      %254 = arith.mulf %251, %253 : vector<32x16xf32>
      %255 = arith.addf %249, %254 : vector<32x16xf32>
      %c1_89 = arith.constant 1 : index
      %c0_90 = arith.constant 0 : index
      %c0_91 = arith.constant 0 : index
      %256 = vector.load %arg1[%c1_89, %c0_90, %c0_91] : memref<32x32x16xf32, #tpu.memory_space<vmem>>, vector<1x32x16xf32>
      %257 = vector.shape_cast %256 : vector<1x32x16xf32> to vector<32x16xf32>
      %258 = vector.extract_strided_slice %248 {offsets = [1, 0], sizes = [1, 16], strides = [1, 1]} : vector<32x16xf32> to vector<1x16xf32>
      %259 = vector.broadcast %258 : vector<1x16xf32> to vector<32x16xf32>
      %260 = arith.mulf %257, %259 : vector<32x16xf32>
      %261 = arith.addf %255, %260 : vector<32x16xf32>
      %c2_92 = arith.constant 2 : index
      %c0_93 = arith.constant 0 : index
      %c0_94 = arith.constant 0 : index
      %262 = vector.load %arg1[%c2_92, %c0_93, %c0_94] : memref<32x32x16xf32, #tpu.memory_space<vmem>>, vector<1x32x16xf32>
      %263 = vector.shape_cast %262 : vector<1x32x16xf32> to vector<32x16xf32>
      %264 = vector.extract_strided_slice %248 {offsets = [2, 0], sizes = [1, 16], strides = [1, 1]} : vector<32x16xf32> to vector<1x16xf32>
      %265 = vector.broadcast %264 : vector<1x16xf32> to vector<32x16xf32>
      %266 = arith.mulf %263, %265 : vector<32x16xf32>
      %267 = arith.addf %261, %266 : vector<32x16xf32>
      %c3_95 = arith.constant 3 : index
      %c0_96 = arith.constant 0 : index
      %c0_97 = arith.constant 0 : index
      %268 = vector.load %arg1[%c3_95, %c0_96, %c0_97] : memref<32x32x16xf32, #tpu.memory_space<vmem>>, vector<1x32x16xf32>
      %269 = vector.shape_cast %268 : vector<1x32x16xf32> to vector<32x16xf32>
      %270 = vector.extract_strided_slice %248 {offsets = [3, 0], sizes = [1, 16], strides = [1, 1]} : vector<32x16xf32> to vector<1x16xf32>
      %271 = vector.broadcast %270 : vector<1x16xf32> to vector<32x16xf32>
      %272 = arith.mulf %269, %271 : vector<32x16xf32>
      %273 = arith.addf %267, %272 : vector<32x16xf32>
      %c4_98 = arith.constant 4 : index
      %c0_99 = arith.constant 0 : index
      %c0_100 = arith.constant 0 : index
      %274 = vector.load %arg1[%c4_98, %c0_99, %c0_100] : memref<32x32x16xf32, #tpu.memory_space<vmem>>, vector<1x32x16xf32>
      %275 = vector.shape_cast %274 : vector<1x32x16xf32> to vector<32x16xf32>
      %276 = vector.extract_strided_slice %248 {offsets = [4, 0], sizes = [1, 16], strides = [1, 1]} : vector<32x16xf32> to vector<1x16xf32>
      %277 = vector.broadcast %276 : vector<1x16xf32> to vector<32x16xf32>
      %278 = arith.mulf %275, %277 : vector<32x16xf32>
      %279 = arith.addf %273, %278 : vector<32x16xf32>
      %c5_101 = arith.constant 5 : index
      %c0_102 = arith.constant 0 : index
      %c0_103 = arith.constant 0 : index
      %280 = vector.load %arg1[%c5_101, %c0_102, %c0_103] : memref<32x32x16xf32, #tpu.memory_space<vmem>>, vector<1x32x16xf32>
      %281 = vector.shape_cast %280 : vector<1x32x16xf32> to vector<32x16xf32>
      %282 = vector.extract_strided_slice %248 {offsets = [5, 0], sizes = [1, 16], strides = [1, 1]} : vector<32x16xf32> to vector<1x16xf32>
      %283 = vector.broadcast %282 : vector<1x16xf32> to vector<32x16xf32>
      %284 = arith.mulf %281, %283 : vector<32x16xf32>
      %285 = arith.addf %279, %284 : vector<32x16xf32>
      %c6_104 = arith.constant 6 : index
      %c0_105 = arith.constant 0 : index
      %c0_106 = arith.constant 0 : index
      %286 = vector.load %arg1[%c6_104, %c0_105, %c0_106] : memref<32x32x16xf32, #tpu.memory_space<vmem>>, vector<1x32x16xf32>
      %287 = vector.shape_cast %286 : vector<1x32x16xf32> to vector<32x16xf32>
      %288 = vector.extract_strided_slice %248 {offsets = [6, 0], sizes = [1, 16], strides = [1, 1]} : vector<32x16xf32> to vector<1x16xf32>
      %289 = vector.broadcast %288 : vector<1x16xf32> to vector<32x16xf32>
      %290 = arith.mulf %287, %289 : vector<32x16xf32>
      %291 = arith.addf %285, %290 : vector<32x16xf32>
      %c7_107 = arith.constant 7 : index
      %c0_108 = arith.constant 0 : index
      %c0_109 = arith.constant 0 : index
      %292 = vector.load %arg1[%c7_107, %c0_108, %c0_109] : memref<32x32x16xf32, #tpu.memory_space<vmem>>, vector<1x32x16xf32>
      %293 = vector.shape_cast %292 : vector<1x32x16xf32> to vector<32x16xf32>
      %294 = vector.extract_strided_slice %248 {offsets = [7, 0], sizes = [1, 16], strides = [1, 1]} : vector<32x16xf32> to vector<1x16xf32>
      %295 = vector.broadcast %294 : vector<1x16xf32> to vector<32x16xf32>
      %296 = arith.mulf %293, %295 : vector<32x16xf32>
      %297 = arith.addf %291, %296 : vector<32x16xf32>
      %c8_110 = arith.constant 8 : index
      %c0_111 = arith.constant 0 : index
      %c0_112 = arith.constant 0 : index
      %298 = vector.load %arg1[%c8_110, %c0_111, %c0_112] : memref<32x32x16xf32, #tpu.memory_space<vmem>>, vector<1x32x16xf32>
      %299 = vector.shape_cast %298 : vector<1x32x16xf32> to vector<32x16xf32>
      %300 = vector.extract_strided_slice %248 {offsets = [8, 0], sizes = [1, 16], strides = [1, 1]} : vector<32x16xf32> to vector<1x16xf32>
      %301 = vector.broadcast %300 : vector<1x16xf32> to vector<32x16xf32>
      %302 = arith.mulf %299, %301 : vector<32x16xf32>
      %303 = arith.addf %297, %302 : vector<32x16xf32>
      %c9_113 = arith.constant 9 : index
      %c0_114 = arith.constant 0 : index
      %c0_115 = arith.constant 0 : index
      %304 = vector.load %arg1[%c9_113, %c0_114, %c0_115] : memref<32x32x16xf32, #tpu.memory_space<vmem>>, vector<1x32x16xf32>
      %305 = vector.shape_cast %304 : vector<1x32x16xf32> to vector<32x16xf32>
      %306 = vector.extract_strided_slice %248 {offsets = [9, 0], sizes = [1, 16], strides = [1, 1]} : vector<32x16xf32> to vector<1x16xf32>
      %307 = vector.broadcast %306 : vector<1x16xf32> to vector<32x16xf32>
      %308 = arith.mulf %305, %307 : vector<32x16xf32>
      %309 = arith.addf %303, %308 : vector<32x16xf32>
      %c10_116 = arith.constant 10 : index
      %c0_117 = arith.constant 0 : index
      %c0_118 = arith.constant 0 : index
      %310 = vector.load %arg1[%c10_116, %c0_117, %c0_118] : memref<32x32x16xf32, #tpu.memory_space<vmem>>, vector<1x32x16xf32>
      %311 = vector.shape_cast %310 : vector<1x32x16xf32> to vector<32x16xf32>
      %312 = vector.extract_strided_slice %248 {offsets = [10, 0], sizes = [1, 16], strides = [1, 1]} : vector<32x16xf32> to vector<1x16xf32>
      %313 = vector.broadcast %312 : vector<1x16xf32> to vector<32x16xf32>
      %314 = arith.mulf %311, %313 : vector<32x16xf32>
      %315 = arith.addf %309, %314 : vector<32x16xf32>
      %c11_119 = arith.constant 11 : index
      %c0_120 = arith.constant 0 : index
      %c0_121 = arith.constant 0 : index
      %316 = vector.load %arg1[%c11_119, %c0_120, %c0_121] : memref<32x32x16xf32, #tpu.memory_space<vmem>>, vector<1x32x16xf32>
      %317 = vector.shape_cast %316 : vector<1x32x16xf32> to vector<32x16xf32>
      %318 = vector.extract_strided_slice %248 {offsets = [11, 0], sizes = [1, 16], strides = [1, 1]} : vector<32x16xf32> to vector<1x16xf32>
      %319 = vector.broadcast %318 : vector<1x16xf32> to vector<32x16xf32>
      %320 = arith.mulf %317, %319 : vector<32x16xf32>
      %321 = arith.addf %315, %320 : vector<32x16xf32>
      %c12_122 = arith.constant 12 : index
      %c0_123 = arith.constant 0 : index
      %c0_124 = arith.constant 0 : index
      %322 = vector.load %arg1[%c12_122, %c0_123, %c0_124] : memref<32x32x16xf32, #tpu.memory_space<vmem>>, vector<1x32x16xf32>
      %323 = vector.shape_cast %322 : vector<1x32x16xf32> to vector<32x16xf32>
      %324 = vector.extract_strided_slice %248 {offsets = [12, 0], sizes = [1, 16], strides = [1, 1]} : vector<32x16xf32> to vector<1x16xf32>
      %325 = vector.broadcast %324 : vector<1x16xf32> to vector<32x16xf32>
      %326 = arith.mulf %323, %325 : vector<32x16xf32>
      %327 = arith.addf %321, %326 : vector<32x16xf32>
      %c13_125 = arith.constant 13 : index
      %c0_126 = arith.constant 0 : index
      %c0_127 = arith.constant 0 : index
      %328 = vector.load %arg1[%c13_125, %c0_126, %c0_127] : memref<32x32x16xf32, #tpu.memory_space<vmem>>, vector<1x32x16xf32>
      %329 = vector.shape_cast %328 : vector<1x32x16xf32> to vector<32x16xf32>
      %330 = vector.extract_strided_slice %248 {offsets = [13, 0], sizes = [1, 16], strides = [1, 1]} : vector<32x16xf32> to vector<1x16xf32>
      %331 = vector.broadcast %330 : vector<1x16xf32> to vector<32x16xf32>
      %332 = arith.mulf %329, %331 : vector<32x16xf32>
      %333 = arith.addf %327, %332 : vector<32x16xf32>
      %c14_128 = arith.constant 14 : index
      %c0_129 = arith.constant 0 : index
      %c0_130 = arith.constant 0 : index
      %334 = vector.load %arg1[%c14_128, %c0_129, %c0_130] : memref<32x32x16xf32, #tpu.memory_space<vmem>>, vector<1x32x16xf32>
      %335 = vector.shape_cast %334 : vector<1x32x16xf32> to vector<32x16xf32>
      %336 = vector.extract_strided_slice %248 {offsets = [14, 0], sizes = [1, 16], strides = [1, 1]} : vector<32x16xf32> to vector<1x16xf32>
      %337 = vector.broadcast %336 : vector<1x16xf32> to vector<32x16xf32>
      %338 = arith.mulf %335, %337 : vector<32x16xf32>
      %339 = arith.addf %333, %338 : vector<32x16xf32>
      %c15_131 = arith.constant 15 : index
      %c0_132 = arith.constant 0 : index
      %c0_133 = arith.constant 0 : index
      %340 = vector.load %arg1[%c15_131, %c0_132, %c0_133] : memref<32x32x16xf32, #tpu.memory_space<vmem>>, vector<1x32x16xf32>
      %341 = vector.shape_cast %340 : vector<1x32x16xf32> to vector<32x16xf32>
      %342 = vector.extract_strided_slice %248 {offsets = [15, 0], sizes = [1, 16], strides = [1, 1]} : vector<32x16xf32> to vector<1x16xf32>
      %343 = vector.broadcast %342 : vector<1x16xf32> to vector<32x16xf32>
      %344 = arith.mulf %341, %343 : vector<32x16xf32>
      %345 = arith.addf %339, %344 : vector<32x16xf32>
      %c16_134 = arith.constant 16 : index
      %c0_135 = arith.constant 0 : index
      %c0_136 = arith.constant 0 : index
      %346 = vector.load %arg1[%c16_134, %c0_135, %c0_136] : memref<32x32x16xf32, #tpu.memory_space<vmem>>, vector<1x32x16xf32>
      %347 = vector.shape_cast %346 : vector<1x32x16xf32> to vector<32x16xf32>
      %348 = vector.extract_strided_slice %248 {offsets = [16, 0], sizes = [1, 16], strides = [1, 1]} : vector<32x16xf32> to vector<1x16xf32>
      %349 = vector.broadcast %348 : vector<1x16xf32> to vector<32x16xf32>
      %350 = arith.mulf %347, %349 : vector<32x16xf32>
      %351 = arith.addf %345, %350 : vector<32x16xf32>
      %c17_137 = arith.constant 17 : index
      %c0_138 = arith.constant 0 : index
      %c0_139 = arith.constant 0 : index
      %352 = vector.load %arg1[%c17_137, %c0_138, %c0_139] : memref<32x32x16xf32, #tpu.memory_space<vmem>>, vector<1x32x16xf32>
      %353 = vector.shape_cast %352 : vector<1x32x16xf32> to vector<32x16xf32>
      %354 = vector.extract_strided_slice %248 {offsets = [17, 0], sizes = [1, 16], strides = [1, 1]} : vector<32x16xf32> to vector<1x16xf32>
      %355 = vector.broadcast %354 : vector<1x16xf32> to vector<32x16xf32>
      %356 = arith.mulf %353, %355 : vector<32x16xf32>
      %357 = arith.addf %351, %356 : vector<32x16xf32>
      %c18_140 = arith.constant 18 : index
      %c0_141 = arith.constant 0 : index
      %c0_142 = arith.constant 0 : index
      %358 = vector.load %arg1[%c18_140, %c0_141, %c0_142] : memref<32x32x16xf32, #tpu.memory_space<vmem>>, vector<1x32x16xf32>
      %359 = vector.shape_cast %358 : vector<1x32x16xf32> to vector<32x16xf32>
      %360 = vector.extract_strided_slice %248 {offsets = [18, 0], sizes = [1, 16], strides = [1, 1]} : vector<32x16xf32> to vector<1x16xf32>
      %361 = vector.broadcast %360 : vector<1x16xf32> to vector<32x16xf32>
      %362 = arith.mulf %359, %361 : vector<32x16xf32>
      %363 = arith.addf %357, %362 : vector<32x16xf32>
      %c19_143 = arith.constant 19 : index
      %c0_144 = arith.constant 0 : index
      %c0_145 = arith.constant 0 : index
      %364 = vector.load %arg1[%c19_143, %c0_144, %c0_145] : memref<32x32x16xf32, #tpu.memory_space<vmem>>, vector<1x32x16xf32>
      %365 = vector.shape_cast %364 : vector<1x32x16xf32> to vector<32x16xf32>
      %366 = vector.extract_strided_slice %248 {offsets = [19, 0], sizes = [1, 16], strides = [1, 1]} : vector<32x16xf32> to vector<1x16xf32>
      %367 = vector.broadcast %366 : vector<1x16xf32> to vector<32x16xf32>
      %368 = arith.mulf %365, %367 : vector<32x16xf32>
      %369 = arith.addf %363, %368 : vector<32x16xf32>
      %c20_146 = arith.constant 20 : index
      %c0_147 = arith.constant 0 : index
      %c0_148 = arith.constant 0 : index
      %370 = vector.load %arg1[%c20_146, %c0_147, %c0_148] : memref<32x32x16xf32, #tpu.memory_space<vmem>>, vector<1x32x16xf32>
      %371 = vector.shape_cast %370 : vector<1x32x16xf32> to vector<32x16xf32>
      %372 = vector.extract_strided_slice %248 {offsets = [20, 0], sizes = [1, 16], strides = [1, 1]} : vector<32x16xf32> to vector<1x16xf32>
      %373 = vector.broadcast %372 : vector<1x16xf32> to vector<32x16xf32>
      %374 = arith.mulf %371, %373 : vector<32x16xf32>
      %375 = arith.addf %369, %374 : vector<32x16xf32>
      %c21_149 = arith.constant 21 : index
      %c0_150 = arith.constant 0 : index
      %c0_151 = arith.constant 0 : index
      %376 = vector.load %arg1[%c21_149, %c0_150, %c0_151] : memref<32x32x16xf32, #tpu.memory_space<vmem>>, vector<1x32x16xf32>
      %377 = vector.shape_cast %376 : vector<1x32x16xf32> to vector<32x16xf32>
      %378 = vector.extract_strided_slice %248 {offsets = [21, 0], sizes = [1, 16], strides = [1, 1]} : vector<32x16xf32> to vector<1x16xf32>
      %379 = vector.broadcast %378 : vector<1x16xf32> to vector<32x16xf32>
      %380 = arith.mulf %377, %379 : vector<32x16xf32>
      %381 = arith.addf %375, %380 : vector<32x16xf32>
      %c22_152 = arith.constant 22 : index
      %c0_153 = arith.constant 0 : index
      %c0_154 = arith.constant 0 : index
      %382 = vector.load %arg1[%c22_152, %c0_153, %c0_154] : memref<32x32x16xf32, #tpu.memory_space<vmem>>, vector<1x32x16xf32>
      %383 = vector.shape_cast %382 : vector<1x32x16xf32> to vector<32x16xf32>
      %384 = vector.extract_strided_slice %248 {offsets = [22, 0], sizes = [1, 16], strides = [1, 1]} : vector<32x16xf32> to vector<1x16xf32>
      %385 = vector.broadcast %384 : vector<1x16xf32> to vector<32x16xf32>
      %386 = arith.mulf %383, %385 : vector<32x16xf32>
      %387 = arith.addf %381, %386 : vector<32x16xf32>
      %c23_155 = arith.constant 23 : index
      %c0_156 = arith.constant 0 : index
      %c0_157 = arith.constant 0 : index
      %388 = vector.load %arg1[%c23_155, %c0_156, %c0_157] : memref<32x32x16xf32, #tpu.memory_space<vmem>>, vector<1x32x16xf32>
      %389 = vector.shape_cast %388 : vector<1x32x16xf32> to vector<32x16xf32>
      %390 = vector.extract_strided_slice %248 {offsets = [23, 0], sizes = [1, 16], strides = [1, 1]} : vector<32x16xf32> to vector<1x16xf32>
      %391 = vector.broadcast %390 : vector<1x16xf32> to vector<32x16xf32>
      %392 = arith.mulf %389, %391 : vector<32x16xf32>
      %393 = arith.addf %387, %392 : vector<32x16xf32>
      %c24_158 = arith.constant 24 : index
      %c0_159 = arith.constant 0 : index
      %c0_160 = arith.constant 0 : index
      %394 = vector.load %arg1[%c24_158, %c0_159, %c0_160] : memref<32x32x16xf32, #tpu.memory_space<vmem>>, vector<1x32x16xf32>
      %395 = vector.shape_cast %394 : vector<1x32x16xf32> to vector<32x16xf32>
      %396 = vector.extract_strided_slice %248 {offsets = [24, 0], sizes = [1, 16], strides = [1, 1]} : vector<32x16xf32> to vector<1x16xf32>
      %397 = vector.broadcast %396 : vector<1x16xf32> to vector<32x16xf32>
      %398 = arith.mulf %395, %397 : vector<32x16xf32>
      %399 = arith.addf %393, %398 : vector<32x16xf32>
      %c25_161 = arith.constant 25 : index
      %c0_162 = arith.constant 0 : index
      %c0_163 = arith.constant 0 : index
      %400 = vector.load %arg1[%c25_161, %c0_162, %c0_163] : memref<32x32x16xf32, #tpu.memory_space<vmem>>, vector<1x32x16xf32>
      %401 = vector.shape_cast %400 : vector<1x32x16xf32> to vector<32x16xf32>
      %402 = vector.extract_strided_slice %248 {offsets = [25, 0], sizes = [1, 16], strides = [1, 1]} : vector<32x16xf32> to vector<1x16xf32>
      %403 = vector.broadcast %402 : vector<1x16xf32> to vector<32x16xf32>
      %404 = arith.mulf %401, %403 : vector<32x16xf32>
      %405 = arith.addf %399, %404 : vector<32x16xf32>
      %c26_164 = arith.constant 26 : index
      %c0_165 = arith.constant 0 : index
      %c0_166 = arith.constant 0 : index
      %406 = vector.load %arg1[%c26_164, %c0_165, %c0_166] : memref<32x32x16xf32, #tpu.memory_space<vmem>>, vector<1x32x16xf32>
      %407 = vector.shape_cast %406 : vector<1x32x16xf32> to vector<32x16xf32>
      %408 = vector.extract_strided_slice %248 {offsets = [26, 0], sizes = [1, 16], strides = [1, 1]} : vector<32x16xf32> to vector<1x16xf32>
      %409 = vector.broadcast %408 : vector<1x16xf32> to vector<32x16xf32>
      %410 = arith.mulf %407, %409 : vector<32x16xf32>
      %411 = arith.addf %405, %410 : vector<32x16xf32>
      %c27_167 = arith.constant 27 : index
      %c0_168 = arith.constant 0 : index
      %c0_169 = arith.constant 0 : index
      %412 = vector.load %arg1[%c27_167, %c0_168, %c0_169] : memref<32x32x16xf32, #tpu.memory_space<vmem>>, vector<1x32x16xf32>
      %413 = vector.shape_cast %412 : vector<1x32x16xf32> to vector<32x16xf32>
      %414 = vector.extract_strided_slice %248 {offsets = [27, 0], sizes = [1, 16], strides = [1, 1]} : vector<32x16xf32> to vector<1x16xf32>
      %415 = vector.broadcast %414 : vector<1x16xf32> to vector<32x16xf32>
      %416 = arith.mulf %413, %415 : vector<32x16xf32>
      %417 = arith.addf %411, %416 : vector<32x16xf32>
      %c28_170 = arith.constant 28 : index
      %c0_171 = arith.constant 0 : index
      %c0_172 = arith.constant 0 : index
      %418 = vector.load %arg1[%c28_170, %c0_171, %c0_172] : memref<32x32x16xf32, #tpu.memory_space<vmem>>, vector<1x32x16xf32>
      %419 = vector.shape_cast %418 : vector<1x32x16xf32> to vector<32x16xf32>
      %420 = vector.extract_strided_slice %248 {offsets = [28, 0], sizes = [1, 16], strides = [1, 1]} : vector<32x16xf32> to vector<1x16xf32>
      %421 = vector.broadcast %420 : vector<1x16xf32> to vector<32x16xf32>
      %422 = arith.mulf %419, %421 : vector<32x16xf32>
      %423 = arith.addf %417, %422 : vector<32x16xf32>
      %c29_173 = arith.constant 29 : index
      %c0_174 = arith.constant 0 : index
      %c0_175 = arith.constant 0 : index
      %424 = vector.load %arg1[%c29_173, %c0_174, %c0_175] : memref<32x32x16xf32, #tpu.memory_space<vmem>>, vector<1x32x16xf32>
      %425 = vector.shape_cast %424 : vector<1x32x16xf32> to vector<32x16xf32>
      %426 = vector.extract_strided_slice %248 {offsets = [29, 0], sizes = [1, 16], strides = [1, 1]} : vector<32x16xf32> to vector<1x16xf32>
      %427 = vector.broadcast %426 : vector<1x16xf32> to vector<32x16xf32>
      %428 = arith.mulf %425, %427 : vector<32x16xf32>
      %429 = arith.addf %423, %428 : vector<32x16xf32>
      %c30_176 = arith.constant 30 : index
      %c0_177 = arith.constant 0 : index
      %c0_178 = arith.constant 0 : index
      %430 = vector.load %arg1[%c30_176, %c0_177, %c0_178] : memref<32x32x16xf32, #tpu.memory_space<vmem>>, vector<1x32x16xf32>
      %431 = vector.shape_cast %430 : vector<1x32x16xf32> to vector<32x16xf32>
      %432 = vector.extract_strided_slice %248 {offsets = [30, 0], sizes = [1, 16], strides = [1, 1]} : vector<32x16xf32> to vector<1x16xf32>
      %433 = vector.broadcast %432 : vector<1x16xf32> to vector<32x16xf32>
      %434 = arith.mulf %431, %433 : vector<32x16xf32>
      %435 = arith.addf %429, %434 : vector<32x16xf32>
      %c31_179 = arith.constant 31 : index
      %c0_180 = arith.constant 0 : index
      %c0_181 = arith.constant 0 : index
      %436 = vector.load %arg1[%c31_179, %c0_180, %c0_181] : memref<32x32x16xf32, #tpu.memory_space<vmem>>, vector<1x32x16xf32>
      %437 = vector.shape_cast %436 : vector<1x32x16xf32> to vector<32x16xf32>
      %438 = vector.extract_strided_slice %248 {offsets = [31, 0], sizes = [1, 16], strides = [1, 1]} : vector<32x16xf32> to vector<1x16xf32>
      %439 = vector.broadcast %438 : vector<1x16xf32> to vector<32x16xf32>
      %440 = arith.mulf %437, %439 : vector<32x16xf32>
      %441 = arith.addf %435, %440 : vector<32x16xf32>
      %442 = arith.mulf %248, %441 : vector<32x16xf32>
      %cst_182 = arith.constant dense<0.000000e+00> : vector<16xf32>
      %443 = vector.multi_reduction <add>, %442, %cst_182 [0] : vector<32x16xf32> to vector<16xf32>
      %444 = vector.shape_cast %443 : vector<16xf32> to vector<1x16xf32>
      %cst_183 = arith.constant 0.000000e+00 : f32
      %445 = vector.broadcast %cst_183 : f32 to vector<1x16xf32>
      %446 = arith.cmpf one, %444, %445 : vector<1x16xf32>
      %cst_184 = arith.constant 1.000000e+00 : f32
      %447 = vector.broadcast %cst_184 : f32 to vector<1x16xf32>
      %448 = arith.select %446, %444, %447 : vector<1x16xi1>, vector<1x16xf32>
      %449 = arith.divf %236, %448 : vector<1x16xf32>
      %cst_185 = arith.constant 0.000000e+00 : f32
      %450 = vector.broadcast %cst_185 : f32 to vector<1x16xf32>
      %451 = arith.select %238, %450, %449 : vector<1x16xi1>, vector<1x16xf32>
      %452 = vector.broadcast %451 : vector<1x16xf32> to vector<32x16xf32>
      %453 = arith.mulf %452, %248 : vector<32x16xf32>
      %454 = arith.addf %230, %453 : vector<32x16xf32>
      %455 = vector.broadcast %451 : vector<1x16xf32> to vector<32x16xf32>
      %456 = arith.mulf %455, %441 : vector<32x16xf32>
      %457 = arith.subf %233, %456 : vector<32x16xf32>
      %458 = arith.mulf %457, %457 : vector<32x16xf32>
      %cst_186 = arith.constant dense<0.000000e+00> : vector<16xf32>
      %459 = vector.multi_reduction <add>, %458, %cst_186 [0] : vector<32x16xf32> to vector<16xf32>
      %460 = vector.shape_cast %459 : vector<16xf32> to vector<1x16xf32>
      %461 = arith.cmpf olt, %460, %5 : vector<1x16xf32>
      %462 = arith.ori %461, %7 : vector<1x16xi1>
      %cst_187 = arith.constant 0.000000e+00 : f32
      %463 = vector.broadcast %cst_187 : f32 to vector<1x16xf32>
      %464 = arith.cmpf ogt, %236, %463 : vector<1x16xf32>
      %cst_188 = arith.constant 1.000000e+00 : f32
      %465 = vector.broadcast %cst_188 : f32 to vector<1x16xf32>
      %466 = arith.select %464, %236, %465 : vector<1x16xi1>, vector<1x16xf32>
      %467 = arith.divf %460, %466 : vector<1x16xf32>
      %cst_189 = arith.constant 0.000000e+00 : f32
      %468 = vector.broadcast %cst_189 : f32 to vector<1x16xf32>
      %469 = arith.select %462, %468, %467 : vector<1x16xi1>, vector<1x16xf32>
      %470 = vector.broadcast %469 : vector<1x16xf32> to vector<32x16xf32>
      %471 = arith.mulf %248, %470 : vector<32x16xf32>
      %472 = arith.addf %471, %457 : vector<32x16xf32>
      %cst_190 = arith.constant 0.000000e+00 : f32
      %473 = vector.broadcast %cst_190 : f32 to vector<32x16xf32>
      %c0_191 = arith.constant 0 : index
      %c0_192 = arith.constant 0 : index
      %c0_193 = arith.constant 0 : index
      %474 = vector.load %arg1[%c0_191, %c0_192, %c0_193] : memref<32x32x16xf32, #tpu.memory_space<vmem>>, vector<1x32x16xf32>
      %475 = vector.shape_cast %474 : vector<1x32x16xf32> to vector<32x16xf32>
      %476 = vector.extract_strided_slice %472 {offsets = [0, 0], sizes = [1, 16], strides = [1, 1]} : vector<32x16xf32> to vector<1x16xf32>
      %477 = vector.broadcast %476 : vector<1x16xf32> to vector<32x16xf32>
      %478 = arith.mulf %475, %477 : vector<32x16xf32>
      %479 = arith.addf %473, %478 : vector<32x16xf32>
      %c1_194 = arith.constant 1 : index
      %c0_195 = arith.constant 0 : index
      %c0_196 = arith.constant 0 : index
      %480 = vector.load %arg1[%c1_194, %c0_195, %c0_196] : memref<32x32x16xf32, #tpu.memory_space<vmem>>, vector<1x32x16xf32>
      %481 = vector.shape_cast %480 : vector<1x32x16xf32> to vector<32x16xf32>
      %482 = vector.extract_strided_slice %472 {offsets = [1, 0], sizes = [1, 16], strides = [1, 1]} : vector<32x16xf32> to vector<1x16xf32>
      %483 = vector.broadcast %482 : vector<1x16xf32> to vector<32x16xf32>
      %484 = arith.mulf %481, %483 : vector<32x16xf32>
      %485 = arith.addf %479, %484 : vector<32x16xf32>
      %c2_197 = arith.constant 2 : index
      %c0_198 = arith.constant 0 : index
      %c0_199 = arith.constant 0 : index
      %486 = vector.load %arg1[%c2_197, %c0_198, %c0_199] : memref<32x32x16xf32, #tpu.memory_space<vmem>>, vector<1x32x16xf32>
      %487 = vector.shape_cast %486 : vector<1x32x16xf32> to vector<32x16xf32>
      %488 = vector.extract_strided_slice %472 {offsets = [2, 0], sizes = [1, 16], strides = [1, 1]} : vector<32x16xf32> to vector<1x16xf32>
      %489 = vector.broadcast %488 : vector<1x16xf32> to vector<32x16xf32>
      %490 = arith.mulf %487, %489 : vector<32x16xf32>
      %491 = arith.addf %485, %490 : vector<32x16xf32>
      %c3_200 = arith.constant 3 : index
      %c0_201 = arith.constant 0 : index
      %c0_202 = arith.constant 0 : index
      %492 = vector.load %arg1[%c3_200, %c0_201, %c0_202] : memref<32x32x16xf32, #tpu.memory_space<vmem>>, vector<1x32x16xf32>
      %493 = vector.shape_cast %492 : vector<1x32x16xf32> to vector<32x16xf32>
      %494 = vector.extract_strided_slice %472 {offsets = [3, 0], sizes = [1, 16], strides = [1, 1]} : vector<32x16xf32> to vector<1x16xf32>
      %495 = vector.broadcast %494 : vector<1x16xf32> to vector<32x16xf32>
      %496 = arith.mulf %493, %495 : vector<32x16xf32>
      %497 = arith.addf %491, %496 : vector<32x16xf32>
      %c4_203 = arith.constant 4 : index
      %c0_204 = arith.constant 0 : index
      %c0_205 = arith.constant 0 : index
      %498 = vector.load %arg1[%c4_203, %c0_204, %c0_205] : memref<32x32x16xf32, #tpu.memory_space<vmem>>, vector<1x32x16xf32>
      %499 = vector.shape_cast %498 : vector<1x32x16xf32> to vector<32x16xf32>
      %500 = vector.extract_strided_slice %472 {offsets = [4, 0], sizes = [1, 16], strides = [1, 1]} : vector<32x16xf32> to vector<1x16xf32>
      %501 = vector.broadcast %500 : vector<1x16xf32> to vector<32x16xf32>
      %502 = arith.mulf %499, %501 : vector<32x16xf32>
      %503 = arith.addf %497, %502 : vector<32x16xf32>
      %c5_206 = arith.constant 5 : index
      %c0_207 = arith.constant 0 : index
      %c0_208 = arith.constant 0 : index
      %504 = vector.load %arg1[%c5_206, %c0_207, %c0_208] : memref<32x32x16xf32, #tpu.memory_space<vmem>>, vector<1x32x16xf32>
      %505 = vector.shape_cast %504 : vector<1x32x16xf32> to vector<32x16xf32>
      %506 = vector.extract_strided_slice %472 {offsets = [5, 0], sizes = [1, 16], strides = [1, 1]} : vector<32x16xf32> to vector<1x16xf32>
      %507 = vector.broadcast %506 : vector<1x16xf32> to vector<32x16xf32>
      %508 = arith.mulf %505, %507 : vector<32x16xf32>
      %509 = arith.addf %503, %508 : vector<32x16xf32>
      %c6_209 = arith.constant 6 : index
      %c0_210 = arith.constant 0 : index
      %c0_211 = arith.constant 0 : index
      %510 = vector.load %arg1[%c6_209, %c0_210, %c0_211] : memref<32x32x16xf32, #tpu.memory_space<vmem>>, vector<1x32x16xf32>
      %511 = vector.shape_cast %510 : vector<1x32x16xf32> to vector<32x16xf32>
      %512 = vector.extract_strided_slice %472 {offsets = [6, 0], sizes = [1, 16], strides = [1, 1]} : vector<32x16xf32> to vector<1x16xf32>
      %513 = vector.broadcast %512 : vector<1x16xf32> to vector<32x16xf32>
      %514 = arith.mulf %511, %513 : vector<32x16xf32>
      %515 = arith.addf %509, %514 : vector<32x16xf32>
      %c7_212 = arith.constant 7 : index
      %c0_213 = arith.constant 0 : index
      %c0_214 = arith.constant 0 : index
      %516 = vector.load %arg1[%c7_212, %c0_213, %c0_214] : memref<32x32x16xf32, #tpu.memory_space<vmem>>, vector<1x32x16xf32>
      %517 = vector.shape_cast %516 : vector<1x32x16xf32> to vector<32x16xf32>
      %518 = vector.extract_strided_slice %472 {offsets = [7, 0], sizes = [1, 16], strides = [1, 1]} : vector<32x16xf32> to vector<1x16xf32>
      %519 = vector.broadcast %518 : vector<1x16xf32> to vector<32x16xf32>
      %520 = arith.mulf %517, %519 : vector<32x16xf32>
      %521 = arith.addf %515, %520 : vector<32x16xf32>
      %c8_215 = arith.constant 8 : index
      %c0_216 = arith.constant 0 : index
      %c0_217 = arith.constant 0 : index
      %522 = vector.load %arg1[%c8_215, %c0_216, %c0_217] : memref<32x32x16xf32, #tpu.memory_space<vmem>>, vector<1x32x16xf32>
      %523 = vector.shape_cast %522 : vector<1x32x16xf32> to vector<32x16xf32>
      %524 = vector.extract_strided_slice %472 {offsets = [8, 0], sizes = [1, 16], strides = [1, 1]} : vector<32x16xf32> to vector<1x16xf32>
      %525 = vector.broadcast %524 : vector<1x16xf32> to vector<32x16xf32>
      %526 = arith.mulf %523, %525 : vector<32x16xf32>
      %527 = arith.addf %521, %526 : vector<32x16xf32>
      %c9_218 = arith.constant 9 : index
      %c0_219 = arith.constant 0 : index
      %c0_220 = arith.constant 0 : index
      %528 = vector.load %arg1[%c9_218, %c0_219, %c0_220] : memref<32x32x16xf32, #tpu.memory_space<vmem>>, vector<1x32x16xf32>
      %529 = vector.shape_cast %528 : vector<1x32x16xf32> to vector<32x16xf32>
      %530 = vector.extract_strided_slice %472 {offsets = [9, 0], sizes = [1, 16], strides = [1, 1]} : vector<32x16xf32> to vector<1x16xf32>
      %531 = vector.broadcast %530 : vector<1x16xf32> to vector<32x16xf32>
      %532 = arith.mulf %529, %531 : vector<32x16xf32>
      %533 = arith.addf %527, %532 : vector<32x16xf32>
      %c10_221 = arith.constant 10 : index
      %c0_222 = arith.constant 0 : index
      %c0_223 = arith.constant 0 : index
      %534 = vector.load %arg1[%c10_221, %c0_222, %c0_223] : memref<32x32x16xf32, #tpu.memory_space<vmem>>, vector<1x32x16xf32>
      %535 = vector.shape_cast %534 : vector<1x32x16xf32> to vector<32x16xf32>
      %536 = vector.extract_strided_slice %472 {offsets = [10, 0], sizes = [1, 16], strides = [1, 1]} : vector<32x16xf32> to vector<1x16xf32>
      %537 = vector.broadcast %536 : vector<1x16xf32> to vector<32x16xf32>
      %538 = arith.mulf %535, %537 : vector<32x16xf32>
      %539 = arith.addf %533, %538 : vector<32x16xf32>
      %c11_224 = arith.constant 11 : index
      %c0_225 = arith.constant 0 : index
      %c0_226 = arith.constant 0 : index
      %540 = vector.load %arg1[%c11_224, %c0_225, %c0_226] : memref<32x32x16xf32, #tpu.memory_space<vmem>>, vector<1x32x16xf32>
      %541 = vector.shape_cast %540 : vector<1x32x16xf32> to vector<32x16xf32>
      %542 = vector.extract_strided_slice %472 {offsets = [11, 0], sizes = [1, 16], strides = [1, 1]} : vector<32x16xf32> to vector<1x16xf32>
      %543 = vector.broadcast %542 : vector<1x16xf32> to vector<32x16xf32>
      %544 = arith.mulf %541, %543 : vector<32x16xf32>
      %545 = arith.addf %539, %544 : vector<32x16xf32>
      %c12_227 = arith.constant 12 : index
      %c0_228 = arith.constant 0 : index
      %c0_229 = arith.constant 0 : index
      %546 = vector.load %arg1[%c12_227, %c0_228, %c0_229] : memref<32x32x16xf32, #tpu.memory_space<vmem>>, vector<1x32x16xf32>
      %547 = vector.shape_cast %546 : vector<1x32x16xf32> to vector<32x16xf32>
      %548 = vector.extract_strided_slice %472 {offsets = [12, 0], sizes = [1, 16], strides = [1, 1]} : vector<32x16xf32> to vector<1x16xf32>
      %549 = vector.broadcast %548 : vector<1x16xf32> to vector<32x16xf32>
      %550 = arith.mulf %547, %549 : vector<32x16xf32>
      %551 = arith.addf %545, %550 : vector<32x16xf32>
      %c13_230 = arith.constant 13 : index
      %c0_231 = arith.constant 0 : index
      %c0_232 = arith.constant 0 : index
      %552 = vector.load %arg1[%c13_230, %c0_231, %c0_232] : memref<32x32x16xf32, #tpu.memory_space<vmem>>, vector<1x32x16xf32>
      %553 = vector.shape_cast %552 : vector<1x32x16xf32> to vector<32x16xf32>
      %554 = vector.extract_strided_slice %472 {offsets = [13, 0], sizes = [1, 16], strides = [1, 1]} : vector<32x16xf32> to vector<1x16xf32>
      %555 = vector.broadcast %554 : vector<1x16xf32> to vector<32x16xf32>
      %556 = arith.mulf %553, %555 : vector<32x16xf32>
      %557 = arith.addf %551, %556 : vector<32x16xf32>
      %c14_233 = arith.constant 14 : index
      %c0_234 = arith.constant 0 : index
      %c0_235 = arith.constant 0 : index
      %558 = vector.load %arg1[%c14_233, %c0_234, %c0_235] : memref<32x32x16xf32, #tpu.memory_space<vmem>>, vector<1x32x16xf32>
      %559 = vector.shape_cast %558 : vector<1x32x16xf32> to vector<32x16xf32>
      %560 = vector.extract_strided_slice %472 {offsets = [14, 0], sizes = [1, 16], strides = [1, 1]} : vector<32x16xf32> to vector<1x16xf32>
      %561 = vector.broadcast %560 : vector<1x16xf32> to vector<32x16xf32>
      %562 = arith.mulf %559, %561 : vector<32x16xf32>
      %563 = arith.addf %557, %562 : vector<32x16xf32>
      %c15_236 = arith.constant 15 : index
      %c0_237 = arith.constant 0 : index
      %c0_238 = arith.constant 0 : index
      %564 = vector.load %arg1[%c15_236, %c0_237, %c0_238] : memref<32x32x16xf32, #tpu.memory_space<vmem>>, vector<1x32x16xf32>
      %565 = vector.shape_cast %564 : vector<1x32x16xf32> to vector<32x16xf32>
      %566 = vector.extract_strided_slice %472 {offsets = [15, 0], sizes = [1, 16], strides = [1, 1]} : vector<32x16xf32> to vector<1x16xf32>
      %567 = vector.broadcast %566 : vector<1x16xf32> to vector<32x16xf32>
      %568 = arith.mulf %565, %567 : vector<32x16xf32>
      %569 = arith.addf %563, %568 : vector<32x16xf32>
      %c16_239 = arith.constant 16 : index
      %c0_240 = arith.constant 0 : index
      %c0_241 = arith.constant 0 : index
      %570 = vector.load %arg1[%c16_239, %c0_240, %c0_241] : memref<32x32x16xf32, #tpu.memory_space<vmem>>, vector<1x32x16xf32>
      %571 = vector.shape_cast %570 : vector<1x32x16xf32> to vector<32x16xf32>
      %572 = vector.extract_strided_slice %472 {offsets = [16, 0], sizes = [1, 16], strides = [1, 1]} : vector<32x16xf32> to vector<1x16xf32>
      %573 = vector.broadcast %572 : vector<1x16xf32> to vector<32x16xf32>
      %574 = arith.mulf %571, %573 : vector<32x16xf32>
      %575 = arith.addf %569, %574 : vector<32x16xf32>
      %c17_242 = arith.constant 17 : index
      %c0_243 = arith.constant 0 : index
      %c0_244 = arith.constant 0 : index
      %576 = vector.load %arg1[%c17_242, %c0_243, %c0_244] : memref<32x32x16xf32, #tpu.memory_space<vmem>>, vector<1x32x16xf32>
      %577 = vector.shape_cast %576 : vector<1x32x16xf32> to vector<32x16xf32>
      %578 = vector.extract_strided_slice %472 {offsets = [17, 0], sizes = [1, 16], strides = [1, 1]} : vector<32x16xf32> to vector<1x16xf32>
      %579 = vector.broadcast %578 : vector<1x16xf32> to vector<32x16xf32>
      %580 = arith.mulf %577, %579 : vector<32x16xf32>
      %581 = arith.addf %575, %580 : vector<32x16xf32>
      %c18_245 = arith.constant 18 : index
      %c0_246 = arith.constant 0 : index
      %c0_247 = arith.constant 0 : index
      %582 = vector.load %arg1[%c18_245, %c0_246, %c0_247] : memref<32x32x16xf32, #tpu.memory_space<vmem>>, vector<1x32x16xf32>
      %583 = vector.shape_cast %582 : vector<1x32x16xf32> to vector<32x16xf32>
      %584 = vector.extract_strided_slice %472 {offsets = [18, 0], sizes = [1, 16], strides = [1, 1]} : vector<32x16xf32> to vector<1x16xf32>
      %585 = vector.broadcast %584 : vector<1x16xf32> to vector<32x16xf32>
      %586 = arith.mulf %583, %585 : vector<32x16xf32>
      %587 = arith.addf %581, %586 : vector<32x16xf32>
      %c19_248 = arith.constant 19 : index
      %c0_249 = arith.constant 0 : index
      %c0_250 = arith.constant 0 : index
      %588 = vector.load %arg1[%c19_248, %c0_249, %c0_250] : memref<32x32x16xf32, #tpu.memory_space<vmem>>, vector<1x32x16xf32>
      %589 = vector.shape_cast %588 : vector<1x32x16xf32> to vector<32x16xf32>
      %590 = vector.extract_strided_slice %472 {offsets = [19, 0], sizes = [1, 16], strides = [1, 1]} : vector<32x16xf32> to vector<1x16xf32>
      %591 = vector.broadcast %590 : vector<1x16xf32> to vector<32x16xf32>
      %592 = arith.mulf %589, %591 : vector<32x16xf32>
      %593 = arith.addf %587, %592 : vector<32x16xf32>
      %c20_251 = arith.constant 20 : index
      %c0_252 = arith.constant 0 : index
      %c0_253 = arith.constant 0 : index
      %594 = vector.load %arg1[%c20_251, %c0_252, %c0_253] : memref<32x32x16xf32, #tpu.memory_space<vmem>>, vector<1x32x16xf32>
      %595 = vector.shape_cast %594 : vector<1x32x16xf32> to vector<32x16xf32>
      %596 = vector.extract_strided_slice %472 {offsets = [20, 0], sizes = [1, 16], strides = [1, 1]} : vector<32x16xf32> to vector<1x16xf32>
      %597 = vector.broadcast %596 : vector<1x16xf32> to vector<32x16xf32>
      %598 = arith.mulf %595, %597 : vector<32x16xf32>
      %599 = arith.addf %593, %598 : vector<32x16xf32>
      %c21_254 = arith.constant 21 : index
      %c0_255 = arith.constant 0 : index
      %c0_256 = arith.constant 0 : index
      %600 = vector.load %arg1[%c21_254, %c0_255, %c0_256] : memref<32x32x16xf32, #tpu.memory_space<vmem>>, vector<1x32x16xf32>
      %601 = vector.shape_cast %600 : vector<1x32x16xf32> to vector<32x16xf32>
      %602 = vector.extract_strided_slice %472 {offsets = [21, 0], sizes = [1, 16], strides = [1, 1]} : vector<32x16xf32> to vector<1x16xf32>
      %603 = vector.broadcast %602 : vector<1x16xf32> to vector<32x16xf32>
      %604 = arith.mulf %601, %603 : vector<32x16xf32>
      %605 = arith.addf %599, %604 : vector<32x16xf32>
      %c22_257 = arith.constant 22 : index
      %c0_258 = arith.constant 0 : index
      %c0_259 = arith.constant 0 : index
      %606 = vector.load %arg1[%c22_257, %c0_258, %c0_259] : memref<32x32x16xf32, #tpu.memory_space<vmem>>, vector<1x32x16xf32>
      %607 = vector.shape_cast %606 : vector<1x32x16xf32> to vector<32x16xf32>
      %608 = vector.extract_strided_slice %472 {offsets = [22, 0], sizes = [1, 16], strides = [1, 1]} : vector<32x16xf32> to vector<1x16xf32>
      %609 = vector.broadcast %608 : vector<1x16xf32> to vector<32x16xf32>
      %610 = arith.mulf %607, %609 : vector<32x16xf32>
      %611 = arith.addf %605, %610 : vector<32x16xf32>
      %c23_260 = arith.constant 23 : index
      %c0_261 = arith.constant 0 : index
      %c0_262 = arith.constant 0 : index
      %612 = vector.load %arg1[%c23_260, %c0_261, %c0_262] : memref<32x32x16xf32, #tpu.memory_space<vmem>>, vector<1x32x16xf32>
      %613 = vector.shape_cast %612 : vector<1x32x16xf32> to vector<32x16xf32>
      %614 = vector.extract_strided_slice %472 {offsets = [23, 0], sizes = [1, 16], strides = [1, 1]} : vector<32x16xf32> to vector<1x16xf32>
      %615 = vector.broadcast %614 : vector<1x16xf32> to vector<32x16xf32>
      %616 = arith.mulf %613, %615 : vector<32x16xf32>
      %617 = arith.addf %611, %616 : vector<32x16xf32>
      %c24_263 = arith.constant 24 : index
      %c0_264 = arith.constant 0 : index
      %c0_265 = arith.constant 0 : index
      %618 = vector.load %arg1[%c24_263, %c0_264, %c0_265] : memref<32x32x16xf32, #tpu.memory_space<vmem>>, vector<1x32x16xf32>
      %619 = vector.shape_cast %618 : vector<1x32x16xf32> to vector<32x16xf32>
      %620 = vector.extract_strided_slice %472 {offsets = [24, 0], sizes = [1, 16], strides = [1, 1]} : vector<32x16xf32> to vector<1x16xf32>
      %621 = vector.broadcast %620 : vector<1x16xf32> to vector<32x16xf32>
      %622 = arith.mulf %619, %621 : vector<32x16xf32>
      %623 = arith.addf %617, %622 : vector<32x16xf32>
      %c25_266 = arith.constant 25 : index
      %c0_267 = arith.constant 0 : index
      %c0_268 = arith.constant 0 : index
      %624 = vector.load %arg1[%c25_266, %c0_267, %c0_268] : memref<32x32x16xf32, #tpu.memory_space<vmem>>, vector<1x32x16xf32>
      %625 = vector.shape_cast %624 : vector<1x32x16xf32> to vector<32x16xf32>
      %626 = vector.extract_strided_slice %472 {offsets = [25, 0], sizes = [1, 16], strides = [1, 1]} : vector<32x16xf32> to vector<1x16xf32>
      %627 = vector.broadcast %626 : vector<1x16xf32> to vector<32x16xf32>
      %628 = arith.mulf %625, %627 : vector<32x16xf32>
      %629 = arith.addf %623, %628 : vector<32x16xf32>
      %c26_269 = arith.constant 26 : index
      %c0_270 = arith.constant 0 : index
      %c0_271 = arith.constant 0 : index
      %630 = vector.load %arg1[%c26_269, %c0_270, %c0_271] : memref<32x32x16xf32, #tpu.memory_space<vmem>>, vector<1x32x16xf32>
      %631 = vector.shape_cast %630 : vector<1x32x16xf32> to vector<32x16xf32>
      %632 = vector.extract_strided_slice %472 {offsets = [26, 0], sizes = [1, 16], strides = [1, 1]} : vector<32x16xf32> to vector<1x16xf32>
      %633 = vector.broadcast %632 : vector<1x16xf32> to vector<32x16xf32>
      %634 = arith.mulf %631, %633 : vector<32x16xf32>
      %635 = arith.addf %629, %634 : vector<32x16xf32>
      %c27_272 = arith.constant 27 : index
      %c0_273 = arith.constant 0 : index
      %c0_274 = arith.constant 0 : index
      %636 = vector.load %arg1[%c27_272, %c0_273, %c0_274] : memref<32x32x16xf32, #tpu.memory_space<vmem>>, vector<1x32x16xf32>
      %637 = vector.shape_cast %636 : vector<1x32x16xf32> to vector<32x16xf32>
      %638 = vector.extract_strided_slice %472 {offsets = [27, 0], sizes = [1, 16], strides = [1, 1]} : vector<32x16xf32> to vector<1x16xf32>
      %639 = vector.broadcast %638 : vector<1x16xf32> to vector<32x16xf32>
      %640 = arith.mulf %637, %639 : vector<32x16xf32>
      %641 = arith.addf %635, %640 : vector<32x16xf32>
      %c28_275 = arith.constant 28 : index
      %c0_276 = arith.constant 0 : index
      %c0_277 = arith.constant 0 : index
      %642 = vector.load %arg1[%c28_275, %c0_276, %c0_277] : memref<32x32x16xf32, #tpu.memory_space<vmem>>, vector<1x32x16xf32>
      %643 = vector.shape_cast %642 : vector<1x32x16xf32> to vector<32x16xf32>
      %644 = vector.extract_strided_slice %472 {offsets = [28, 0], sizes = [1, 16], strides = [1, 1]} : vector<32x16xf32> to vector<1x16xf32>
      %645 = vector.broadcast %644 : vector<1x16xf32> to vector<32x16xf32>
      %646 = arith.mulf %643, %645 : vector<32x16xf32>
      %647 = arith.addf %641, %646 : vector<32x16xf32>
      %c29_278 = arith.constant 29 : index
      %c0_279 = arith.constant 0 : index
      %c0_280 = arith.constant 0 : index
      %648 = vector.load %arg1[%c29_278, %c0_279, %c0_280] : memref<32x32x16xf32, #tpu.memory_space<vmem>>, vector<1x32x16xf32>
      %649 = vector.shape_cast %648 : vector<1x32x16xf32> to vector<32x16xf32>
      %650 = vector.extract_strided_slice %472 {offsets = [29, 0], sizes = [1, 16], strides = [1, 1]} : vector<32x16xf32> to vector<1x16xf32>
      %651 = vector.broadcast %650 : vector<1x16xf32> to vector<32x16xf32>
      %652 = arith.mulf %649, %651 : vector<32x16xf32>
      %653 = arith.addf %647, %652 : vector<32x16xf32>
      %c30_281 = arith.constant 30 : index
      %c0_282 = arith.constant 0 : index
      %c0_283 = arith.constant 0 : index
      %654 = vector.load %arg1[%c30_281, %c0_282, %c0_283] : memref<32x32x16xf32, #tpu.memory_space<vmem>>, vector<1x32x16xf32>
      %655 = vector.shape_cast %654 : vector<1x32x16xf32> to vector<32x16xf32>
      %656 = vector.extract_strided_slice %472 {offsets = [30, 0], sizes = [1, 16], strides = [1, 1]} : vector<32x16xf32> to vector<1x16xf32>
      %657 = vector.broadcast %656 : vector<1x16xf32> to vector<32x16xf32>
      %658 = arith.mulf %655, %657 : vector<32x16xf32>
      %659 = arith.addf %653, %658 : vector<32x16xf32>
      %c31_284 = arith.constant 31 : index
      %c0_285 = arith.constant 0 : index
      %c0_286 = arith.constant 0 : index
      %660 = vector.load %arg1[%c31_284, %c0_285, %c0_286] : memref<32x32x16xf32, #tpu.memory_space<vmem>>, vector<1x32x16xf32>
      %661 = vector.shape_cast %660 : vector<1x32x16xf32> to vector<32x16xf32>
      %662 = vector.extract_strided_slice %472 {offsets = [31, 0], sizes = [1, 16], strides = [1, 1]} : vector<32x16xf32> to vector<1x16xf32>
      %663 = vector.broadcast %662 : vector<1x16xf32> to vector<32x16xf32>
      %664 = arith.mulf %661, %663 : vector<32x16xf32>
      %665 = arith.addf %659, %664 : vector<32x16xf32>
      %666 = arith.mulf %472, %665 : vector<32x16xf32>
      %cst_287 = arith.constant dense<0.000000e+00> : vector<16xf32>
      %667 = vector.multi_reduction <add>, %666, %cst_287 [0] : vector<32x16xf32> to vector<16xf32>
      %668 = vector.shape_cast %667 : vector<16xf32> to vector<1x16xf32>
      %cst_288 = arith.constant 0.000000e+00 : f32
      %669 = vector.broadcast %cst_288 : f32 to vector<1x16xf32>
      %670 = arith.cmpf one, %668, %669 : vector<1x16xf32>
      %cst_289 = arith.constant 1.000000e+00 : f32
      %671 = vector.broadcast %cst_289 : f32 to vector<1x16xf32>
      %672 = arith.select %670, %668, %671 : vector<1x16xi1>, vector<1x16xf32>
      %673 = arith.divf %460, %672 : vector<1x16xf32>
      %cst_290 = arith.constant 0.000000e+00 : f32
      %674 = vector.broadcast %cst_290 : f32 to vector<1x16xf32>
      %675 = arith.select %462, %674, %673 : vector<1x16xi1>, vector<1x16xf32>
      %676 = vector.broadcast %675 : vector<1x16xf32> to vector<32x16xf32>
      %677 = arith.mulf %676, %472 : vector<32x16xf32>
      %678 = arith.addf %454, %677 : vector<32x16xf32>
      %679 = vector.broadcast %675 : vector<1x16xf32> to vector<32x16xf32>
      %680 = arith.mulf %679, %665 : vector<32x16xf32>
      %681 = arith.subf %457, %680 : vector<32x16xf32>
      %682 = arith.mulf %681, %681 : vector<32x16xf32>
      %cst_291 = arith.constant dense<0.000000e+00> : vector<16xf32>
      %683 = vector.multi_reduction <add>, %682, %cst_291 [0] : vector<32x16xf32> to vector<16xf32>
      %684 = vector.shape_cast %683 : vector<16xf32> to vector<1x16xf32>
      %685 = arith.cmpf olt, %684, %5 : vector<1x16xf32>
      %686 = arith.ori %685, %7 : vector<1x16xi1>
      %cst_292 = arith.constant 0.000000e+00 : f32
      %687 = vector.broadcast %cst_292 : f32 to vector<1x16xf32>
      %688 = arith.cmpf ogt, %460, %687 : vector<1x16xf32>
      %cst_293 = arith.constant 1.000000e+00 : f32
      %689 = vector.broadcast %cst_293 : f32 to vector<1x16xf32>
      %690 = arith.select %688, %460, %689 : vector<1x16xi1>, vector<1x16xf32>
      %691 = arith.divf %684, %690 : vector<1x16xf32>
      %cst_294 = arith.constant 0.000000e+00 : f32
      %692 = vector.broadcast %cst_294 : f32 to vector<1x16xf32>
      %693 = arith.select %686, %692, %691 : vector<1x16xi1>, vector<1x16xf32>
      %694 = vector.broadcast %693 : vector<1x16xf32> to vector<32x16xf32>
      %695 = arith.mulf %472, %694 : vector<32x16xf32>
      %696 = arith.addf %695, %681 : vector<32x16xf32>
      %cst_295 = arith.constant 0.000000e+00 : f32
      %697 = vector.broadcast %cst_295 : f32 to vector<32x16xf32>
      %c0_296 = arith.constant 0 : index
      %c0_297 = arith.constant 0 : index
      %c0_298 = arith.constant 0 : index
      %698 = vector.load %arg1[%c0_296, %c0_297, %c0_298] : memref<32x32x16xf32, #tpu.memory_space<vmem>>, vector<1x32x16xf32>
      %699 = vector.shape_cast %698 : vector<1x32x16xf32> to vector<32x16xf32>
      %700 = vector.extract_strided_slice %696 {offsets = [0, 0], sizes = [1, 16], strides = [1, 1]} : vector<32x16xf32> to vector<1x16xf32>
      %701 = vector.broadcast %700 : vector<1x16xf32> to vector<32x16xf32>
      %702 = arith.mulf %699, %701 : vector<32x16xf32>
      %703 = arith.addf %697, %702 : vector<32x16xf32>
      %c1_299 = arith.constant 1 : index
      %c0_300 = arith.constant 0 : index
      %c0_301 = arith.constant 0 : index
      %704 = vector.load %arg1[%c1_299, %c0_300, %c0_301] : memref<32x32x16xf32, #tpu.memory_space<vmem>>, vector<1x32x16xf32>
      %705 = vector.shape_cast %704 : vector<1x32x16xf32> to vector<32x16xf32>
      %706 = vector.extract_strided_slice %696 {offsets = [1, 0], sizes = [1, 16], strides = [1, 1]} : vector<32x16xf32> to vector<1x16xf32>
      %707 = vector.broadcast %706 : vector<1x16xf32> to vector<32x16xf32>
      %708 = arith.mulf %705, %707 : vector<32x16xf32>
      %709 = arith.addf %703, %708 : vector<32x16xf32>
      %c2_302 = arith.constant 2 : index
      %c0_303 = arith.constant 0 : index
      %c0_304 = arith.constant 0 : index
      %710 = vector.load %arg1[%c2_302, %c0_303, %c0_304] : memref<32x32x16xf32, #tpu.memory_space<vmem>>, vector<1x32x16xf32>
      %711 = vector.shape_cast %710 : vector<1x32x16xf32> to vector<32x16xf32>
      %712 = vector.extract_strided_slice %696 {offsets = [2, 0], sizes = [1, 16], strides = [1, 1]} : vector<32x16xf32> to vector<1x16xf32>
      %713 = vector.broadcast %712 : vector<1x16xf32> to vector<32x16xf32>
      %714 = arith.mulf %711, %713 : vector<32x16xf32>
      %715 = arith.addf %709, %714 : vector<32x16xf32>
      %c3_305 = arith.constant 3 : index
      %c0_306 = arith.constant 0 : index
      %c0_307 = arith.constant 0 : index
      %716 = vector.load %arg1[%c3_305, %c0_306, %c0_307] : memref<32x32x16xf32, #tpu.memory_space<vmem>>, vector<1x32x16xf32>
      %717 = vector.shape_cast %716 : vector<1x32x16xf32> to vector<32x16xf32>
      %718 = vector.extract_strided_slice %696 {offsets = [3, 0], sizes = [1, 16], strides = [1, 1]} : vector<32x16xf32> to vector<1x16xf32>
      %719 = vector.broadcast %718 : vector<1x16xf32> to vector<32x16xf32>
      %720 = arith.mulf %717, %719 : vector<32x16xf32>
      %721 = arith.addf %715, %720 : vector<32x16xf32>
      %c4_308 = arith.constant 4 : index
      %c0_309 = arith.constant 0 : index
      %c0_310 = arith.constant 0 : index
      %722 = vector.load %arg1[%c4_308, %c0_309, %c0_310] : memref<32x32x16xf32, #tpu.memory_space<vmem>>, vector<1x32x16xf32>
      %723 = vector.shape_cast %722 : vector<1x32x16xf32> to vector<32x16xf32>
      %724 = vector.extract_strided_slice %696 {offsets = [4, 0], sizes = [1, 16], strides = [1, 1]} : vector<32x16xf32> to vector<1x16xf32>
      %725 = vector.broadcast %724 : vector<1x16xf32> to vector<32x16xf32>
      %726 = arith.mulf %723, %725 : vector<32x16xf32>
      %727 = arith.addf %721, %726 : vector<32x16xf32>
      %c5_311 = arith.constant 5 : index
      %c0_312 = arith.constant 0 : index
      %c0_313 = arith.constant 0 : index
      %728 = vector.load %arg1[%c5_311, %c0_312, %c0_313] : memref<32x32x16xf32, #tpu.memory_space<vmem>>, vector<1x32x16xf32>
      %729 = vector.shape_cast %728 : vector<1x32x16xf32> to vector<32x16xf32>
      %730 = vector.extract_strided_slice %696 {offsets = [5, 0], sizes = [1, 16], strides = [1, 1]} : vector<32x16xf32> to vector<1x16xf32>
      %731 = vector.broadcast %730 : vector<1x16xf32> to vector<32x16xf32>
      %732 = arith.mulf %729, %731 : vector<32x16xf32>
      %733 = arith.addf %727, %732 : vector<32x16xf32>
      %c6_314 = arith.constant 6 : index
      %c0_315 = arith.constant 0 : index
      %c0_316 = arith.constant 0 : index
      %734 = vector.load %arg1[%c6_314, %c0_315, %c0_316] : memref<32x32x16xf32, #tpu.memory_space<vmem>>, vector<1x32x16xf32>
      %735 = vector.shape_cast %734 : vector<1x32x16xf32> to vector<32x16xf32>
      %736 = vector.extract_strided_slice %696 {offsets = [6, 0], sizes = [1, 16], strides = [1, 1]} : vector<32x16xf32> to vector<1x16xf32>
      %737 = vector.broadcast %736 : vector<1x16xf32> to vector<32x16xf32>
      %738 = arith.mulf %735, %737 : vector<32x16xf32>
      %739 = arith.addf %733, %738 : vector<32x16xf32>
      %c7_317 = arith.constant 7 : index
      %c0_318 = arith.constant 0 : index
      %c0_319 = arith.constant 0 : index
      %740 = vector.load %arg1[%c7_317, %c0_318, %c0_319] : memref<32x32x16xf32, #tpu.memory_space<vmem>>, vector<1x32x16xf32>
      %741 = vector.shape_cast %740 : vector<1x32x16xf32> to vector<32x16xf32>
      %742 = vector.extract_strided_slice %696 {offsets = [7, 0], sizes = [1, 16], strides = [1, 1]} : vector<32x16xf32> to vector<1x16xf32>
      %743 = vector.broadcast %742 : vector<1x16xf32> to vector<32x16xf32>
      %744 = arith.mulf %741, %743 : vector<32x16xf32>
      %745 = arith.addf %739, %744 : vector<32x16xf32>
      %c8_320 = arith.constant 8 : index
      %c0_321 = arith.constant 0 : index
      %c0_322 = arith.constant 0 : index
      %746 = vector.load %arg1[%c8_320, %c0_321, %c0_322] : memref<32x32x16xf32, #tpu.memory_space<vmem>>, vector<1x32x16xf32>
      %747 = vector.shape_cast %746 : vector<1x32x16xf32> to vector<32x16xf32>
      %748 = vector.extract_strided_slice %696 {offsets = [8, 0], sizes = [1, 16], strides = [1, 1]} : vector<32x16xf32> to vector<1x16xf32>
      %749 = vector.broadcast %748 : vector<1x16xf32> to vector<32x16xf32>
      %750 = arith.mulf %747, %749 : vector<32x16xf32>
      %751 = arith.addf %745, %750 : vector<32x16xf32>
      %c9_323 = arith.constant 9 : index
      %c0_324 = arith.constant 0 : index
      %c0_325 = arith.constant 0 : index
      %752 = vector.load %arg1[%c9_323, %c0_324, %c0_325] : memref<32x32x16xf32, #tpu.memory_space<vmem>>, vector<1x32x16xf32>
      %753 = vector.shape_cast %752 : vector<1x32x16xf32> to vector<32x16xf32>
      %754 = vector.extract_strided_slice %696 {offsets = [9, 0], sizes = [1, 16], strides = [1, 1]} : vector<32x16xf32> to vector<1x16xf32>
      %755 = vector.broadcast %754 : vector<1x16xf32> to vector<32x16xf32>
      %756 = arith.mulf %753, %755 : vector<32x16xf32>
      %757 = arith.addf %751, %756 : vector<32x16xf32>
      %c10_326 = arith.constant 10 : index
      %c0_327 = arith.constant 0 : index
      %c0_328 = arith.constant 0 : index
      %758 = vector.load %arg1[%c10_326, %c0_327, %c0_328] : memref<32x32x16xf32, #tpu.memory_space<vmem>>, vector<1x32x16xf32>
      %759 = vector.shape_cast %758 : vector<1x32x16xf32> to vector<32x16xf32>
      %760 = vector.extract_strided_slice %696 {offsets = [10, 0], sizes = [1, 16], strides = [1, 1]} : vector<32x16xf32> to vector<1x16xf32>
      %761 = vector.broadcast %760 : vector<1x16xf32> to vector<32x16xf32>
      %762 = arith.mulf %759, %761 : vector<32x16xf32>
      %763 = arith.addf %757, %762 : vector<32x16xf32>
      %c11_329 = arith.constant 11 : index
      %c0_330 = arith.constant 0 : index
      %c0_331 = arith.constant 0 : index
      %764 = vector.load %arg1[%c11_329, %c0_330, %c0_331] : memref<32x32x16xf32, #tpu.memory_space<vmem>>, vector<1x32x16xf32>
      %765 = vector.shape_cast %764 : vector<1x32x16xf32> to vector<32x16xf32>
      %766 = vector.extract_strided_slice %696 {offsets = [11, 0], sizes = [1, 16], strides = [1, 1]} : vector<32x16xf32> to vector<1x16xf32>
      %767 = vector.broadcast %766 : vector<1x16xf32> to vector<32x16xf32>
      %768 = arith.mulf %765, %767 : vector<32x16xf32>
      %769 = arith.addf %763, %768 : vector<32x16xf32>
      %c12_332 = arith.constant 12 : index
      %c0_333 = arith.constant 0 : index
      %c0_334 = arith.constant 0 : index
      %770 = vector.load %arg1[%c12_332, %c0_333, %c0_334] : memref<32x32x16xf32, #tpu.memory_space<vmem>>, vector<1x32x16xf32>
      %771 = vector.shape_cast %770 : vector<1x32x16xf32> to vector<32x16xf32>
      %772 = vector.extract_strided_slice %696 {offsets = [12, 0], sizes = [1, 16], strides = [1, 1]} : vector<32x16xf32> to vector<1x16xf32>
      %773 = vector.broadcast %772 : vector<1x16xf32> to vector<32x16xf32>
      %774 = arith.mulf %771, %773 : vector<32x16xf32>
      %775 = arith.addf %769, %774 : vector<32x16xf32>
      %c13_335 = arith.constant 13 : index
      %c0_336 = arith.constant 0 : index
      %c0_337 = arith.constant 0 : index
      %776 = vector.load %arg1[%c13_335, %c0_336, %c0_337] : memref<32x32x16xf32, #tpu.memory_space<vmem>>, vector<1x32x16xf32>
      %777 = vector.shape_cast %776 : vector<1x32x16xf32> to vector<32x16xf32>
      %778 = vector.extract_strided_slice %696 {offsets = [13, 0], sizes = [1, 16], strides = [1, 1]} : vector<32x16xf32> to vector<1x16xf32>
      %779 = vector.broadcast %778 : vector<1x16xf32> to vector<32x16xf32>
      %780 = arith.mulf %777, %779 : vector<32x16xf32>
      %781 = arith.addf %775, %780 : vector<32x16xf32>
      %c14_338 = arith.constant 14 : index
      %c0_339 = arith.constant 0 : index
      %c0_340 = arith.constant 0 : index
      %782 = vector.load %arg1[%c14_338, %c0_339, %c0_340] : memref<32x32x16xf32, #tpu.memory_space<vmem>>, vector<1x32x16xf32>
      %783 = vector.shape_cast %782 : vector<1x32x16xf32> to vector<32x16xf32>
      %784 = vector.extract_strided_slice %696 {offsets = [14, 0], sizes = [1, 16], strides = [1, 1]} : vector<32x16xf32> to vector<1x16xf32>
      %785 = vector.broadcast %784 : vector<1x16xf32> to vector<32x16xf32>
      %786 = arith.mulf %783, %785 : vector<32x16xf32>
      %787 = arith.addf %781, %786 : vector<32x16xf32>
      %c15_341 = arith.constant 15 : index
      %c0_342 = arith.constant 0 : index
      %c0_343 = arith.constant 0 : index
      %788 = vector.load %arg1[%c15_341, %c0_342, %c0_343] : memref<32x32x16xf32, #tpu.memory_space<vmem>>, vector<1x32x16xf32>
      %789 = vector.shape_cast %788 : vector<1x32x16xf32> to vector<32x16xf32>
      %790 = vector.extract_strided_slice %696 {offsets = [15, 0], sizes = [1, 16], strides = [1, 1]} : vector<32x16xf32> to vector<1x16xf32>
      %791 = vector.broadcast %790 : vector<1x16xf32> to vector<32x16xf32>
      %792 = arith.mulf %789, %791 : vector<32x16xf32>
      %793 = arith.addf %787, %792 : vector<32x16xf32>
      %c16_344 = arith.constant 16 : index
      %c0_345 = arith.constant 0 : index
      %c0_346 = arith.constant 0 : index
      %794 = vector.load %arg1[%c16_344, %c0_345, %c0_346] : memref<32x32x16xf32, #tpu.memory_space<vmem>>, vector<1x32x16xf32>
      %795 = vector.shape_cast %794 : vector<1x32x16xf32> to vector<32x16xf32>
      %796 = vector.extract_strided_slice %696 {offsets = [16, 0], sizes = [1, 16], strides = [1, 1]} : vector<32x16xf32> to vector<1x16xf32>
      %797 = vector.broadcast %796 : vector<1x16xf32> to vector<32x16xf32>
      %798 = arith.mulf %795, %797 : vector<32x16xf32>
      %799 = arith.addf %793, %798 : vector<32x16xf32>
      %c17_347 = arith.constant 17 : index
      %c0_348 = arith.constant 0 : index
      %c0_349 = arith.constant 0 : index
      %800 = vector.load %arg1[%c17_347, %c0_348, %c0_349] : memref<32x32x16xf32, #tpu.memory_space<vmem>>, vector<1x32x16xf32>
      %801 = vector.shape_cast %800 : vector<1x32x16xf32> to vector<32x16xf32>
      %802 = vector.extract_strided_slice %696 {offsets = [17, 0], sizes = [1, 16], strides = [1, 1]} : vector<32x16xf32> to vector<1x16xf32>
      %803 = vector.broadcast %802 : vector<1x16xf32> to vector<32x16xf32>
      %804 = arith.mulf %801, %803 : vector<32x16xf32>
      %805 = arith.addf %799, %804 : vector<32x16xf32>
      %c18_350 = arith.constant 18 : index
      %c0_351 = arith.constant 0 : index
      %c0_352 = arith.constant 0 : index
      %806 = vector.load %arg1[%c18_350, %c0_351, %c0_352] : memref<32x32x16xf32, #tpu.memory_space<vmem>>, vector<1x32x16xf32>
      %807 = vector.shape_cast %806 : vector<1x32x16xf32> to vector<32x16xf32>
      %808 = vector.extract_strided_slice %696 {offsets = [18, 0], sizes = [1, 16], strides = [1, 1]} : vector<32x16xf32> to vector<1x16xf32>
      %809 = vector.broadcast %808 : vector<1x16xf32> to vector<32x16xf32>
      %810 = arith.mulf %807, %809 : vector<32x16xf32>
      %811 = arith.addf %805, %810 : vector<32x16xf32>
      %c19_353 = arith.constant 19 : index
      %c0_354 = arith.constant 0 : index
      %c0_355 = arith.constant 0 : index
      %812 = vector.load %arg1[%c19_353, %c0_354, %c0_355] : memref<32x32x16xf32, #tpu.memory_space<vmem>>, vector<1x32x16xf32>
      %813 = vector.shape_cast %812 : vector<1x32x16xf32> to vector<32x16xf32>
      %814 = vector.extract_strided_slice %696 {offsets = [19, 0], sizes = [1, 16], strides = [1, 1]} : vector<32x16xf32> to vector<1x16xf32>
      %815 = vector.broadcast %814 : vector<1x16xf32> to vector<32x16xf32>
      %816 = arith.mulf %813, %815 : vector<32x16xf32>
      %817 = arith.addf %811, %816 : vector<32x16xf32>
      %c20_356 = arith.constant 20 : index
      %c0_357 = arith.constant 0 : index
      %c0_358 = arith.constant 0 : index
      %818 = vector.load %arg1[%c20_356, %c0_357, %c0_358] : memref<32x32x16xf32, #tpu.memory_space<vmem>>, vector<1x32x16xf32>
      %819 = vector.shape_cast %818 : vector<1x32x16xf32> to vector<32x16xf32>
      %820 = vector.extract_strided_slice %696 {offsets = [20, 0], sizes = [1, 16], strides = [1, 1]} : vector<32x16xf32> to vector<1x16xf32>
      %821 = vector.broadcast %820 : vector<1x16xf32> to vector<32x16xf32>
      %822 = arith.mulf %819, %821 : vector<32x16xf32>
      %823 = arith.addf %817, %822 : vector<32x16xf32>
      %c21_359 = arith.constant 21 : index
      %c0_360 = arith.constant 0 : index
      %c0_361 = arith.constant 0 : index
      %824 = vector.load %arg1[%c21_359, %c0_360, %c0_361] : memref<32x32x16xf32, #tpu.memory_space<vmem>>, vector<1x32x16xf32>
      %825 = vector.shape_cast %824 : vector<1x32x16xf32> to vector<32x16xf32>
      %826 = vector.extract_strided_slice %696 {offsets = [21, 0], sizes = [1, 16], strides = [1, 1]} : vector<32x16xf32> to vector<1x16xf32>
      %827 = vector.broadcast %826 : vector<1x16xf32> to vector<32x16xf32>
      %828 = arith.mulf %825, %827 : vector<32x16xf32>
      %829 = arith.addf %823, %828 : vector<32x16xf32>
      %c22_362 = arith.constant 22 : index
      %c0_363 = arith.constant 0 : index
      %c0_364 = arith.constant 0 : index
      %830 = vector.load %arg1[%c22_362, %c0_363, %c0_364] : memref<32x32x16xf32, #tpu.memory_space<vmem>>, vector<1x32x16xf32>
      %831 = vector.shape_cast %830 : vector<1x32x16xf32> to vector<32x16xf32>
      %832 = vector.extract_strided_slice %696 {offsets = [22, 0], sizes = [1, 16], strides = [1, 1]} : vector<32x16xf32> to vector<1x16xf32>
      %833 = vector.broadcast %832 : vector<1x16xf32> to vector<32x16xf32>
      %834 = arith.mulf %831, %833 : vector<32x16xf32>
      %835 = arith.addf %829, %834 : vector<32x16xf32>
      %c23_365 = arith.constant 23 : index
      %c0_366 = arith.constant 0 : index
      %c0_367 = arith.constant 0 : index
      %836 = vector.load %arg1[%c23_365, %c0_366, %c0_367] : memref<32x32x16xf32, #tpu.memory_space<vmem>>, vector<1x32x16xf32>
      %837 = vector.shape_cast %836 : vector<1x32x16xf32> to vector<32x16xf32>
      %838 = vector.extract_strided_slice %696 {offsets = [23, 0], sizes = [1, 16], strides = [1, 1]} : vector<32x16xf32> to vector<1x16xf32>
      %839 = vector.broadcast %838 : vector<1x16xf32> to vector<32x16xf32>
      %840 = arith.mulf %837, %839 : vector<32x16xf32>
      %841 = arith.addf %835, %840 : vector<32x16xf32>
      %c24_368 = arith.constant 24 : index
      %c0_369 = arith.constant 0 : index
      %c0_370 = arith.constant 0 : index
      %842 = vector.load %arg1[%c24_368, %c0_369, %c0_370] : memref<32x32x16xf32, #tpu.memory_space<vmem>>, vector<1x32x16xf32>
      %843 = vector.shape_cast %842 : vector<1x32x16xf32> to vector<32x16xf32>
      %844 = vector.extract_strided_slice %696 {offsets = [24, 0], sizes = [1, 16], strides = [1, 1]} : vector<32x16xf32> to vector<1x16xf32>
      %845 = vector.broadcast %844 : vector<1x16xf32> to vector<32x16xf32>
      %846 = arith.mulf %843, %845 : vector<32x16xf32>
      %847 = arith.addf %841, %846 : vector<32x16xf32>
      %c25_371 = arith.constant 25 : index
      %c0_372 = arith.constant 0 : index
      %c0_373 = arith.constant 0 : index
      %848 = vector.load %arg1[%c25_371, %c0_372, %c0_373] : memref<32x32x16xf32, #tpu.memory_space<vmem>>, vector<1x32x16xf32>
      %849 = vector.shape_cast %848 : vector<1x32x16xf32> to vector<32x16xf32>
      %850 = vector.extract_strided_slice %696 {offsets = [25, 0], sizes = [1, 16], strides = [1, 1]} : vector<32x16xf32> to vector<1x16xf32>
      %851 = vector.broadcast %850 : vector<1x16xf32> to vector<32x16xf32>
      %852 = arith.mulf %849, %851 : vector<32x16xf32>
      %853 = arith.addf %847, %852 : vector<32x16xf32>
      %c26_374 = arith.constant 26 : index
      %c0_375 = arith.constant 0 : index
      %c0_376 = arith.constant 0 : index
      %854 = vector.load %arg1[%c26_374, %c0_375, %c0_376] : memref<32x32x16xf32, #tpu.memory_space<vmem>>, vector<1x32x16xf32>
      %855 = vector.shape_cast %854 : vector<1x32x16xf32> to vector<32x16xf32>
      %856 = vector.extract_strided_slice %696 {offsets = [26, 0], sizes = [1, 16], strides = [1, 1]} : vector<32x16xf32> to vector<1x16xf32>
      %857 = vector.broadcast %856 : vector<1x16xf32> to vector<32x16xf32>
      %858 = arith.mulf %855, %857 : vector<32x16xf32>
      %859 = arith.addf %853, %858 : vector<32x16xf32>
      %c27_377 = arith.constant 27 : index
      %c0_378 = arith.constant 0 : index
      %c0_379 = arith.constant 0 : index
      %860 = vector.load %arg1[%c27_377, %c0_378, %c0_379] : memref<32x32x16xf32, #tpu.memory_space<vmem>>, vector<1x32x16xf32>
      %861 = vector.shape_cast %860 : vector<1x32x16xf32> to vector<32x16xf32>
      %862 = vector.extract_strided_slice %696 {offsets = [27, 0], sizes = [1, 16], strides = [1, 1]} : vector<32x16xf32> to vector<1x16xf32>
      %863 = vector.broadcast %862 : vector<1x16xf32> to vector<32x16xf32>
      %864 = arith.mulf %861, %863 : vector<32x16xf32>
      %865 = arith.addf %859, %864 : vector<32x16xf32>
      %c28_380 = arith.constant 28 : index
      %c0_381 = arith.constant 0 : index
      %c0_382 = arith.constant 0 : index
      %866 = vector.load %arg1[%c28_380, %c0_381, %c0_382] : memref<32x32x16xf32, #tpu.memory_space<vmem>>, vector<1x32x16xf32>
      %867 = vector.shape_cast %866 : vector<1x32x16xf32> to vector<32x16xf32>
      %868 = vector.extract_strided_slice %696 {offsets = [28, 0], sizes = [1, 16], strides = [1, 1]} : vector<32x16xf32> to vector<1x16xf32>
      %869 = vector.broadcast %868 : vector<1x16xf32> to vector<32x16xf32>
      %870 = arith.mulf %867, %869 : vector<32x16xf32>
      %871 = arith.addf %865, %870 : vector<32x16xf32>
      %c29_383 = arith.constant 29 : index
      %c0_384 = arith.constant 0 : index
      %c0_385 = arith.constant 0 : index
      %872 = vector.load %arg1[%c29_383, %c0_384, %c0_385] : memref<32x32x16xf32, #tpu.memory_space<vmem>>, vector<1x32x16xf32>
      %873 = vector.shape_cast %872 : vector<1x32x16xf32> to vector<32x16xf32>
      %874 = vector.extract_strided_slice %696 {offsets = [29, 0], sizes = [1, 16], strides = [1, 1]} : vector<32x16xf32> to vector<1x16xf32>
      %875 = vector.broadcast %874 : vector<1x16xf32> to vector<32x16xf32>
      %876 = arith.mulf %873, %875 : vector<32x16xf32>
      %877 = arith.addf %871, %876 : vector<32x16xf32>
      %c30_386 = arith.constant 30 : index
      %c0_387 = arith.constant 0 : index
      %c0_388 = arith.constant 0 : index
      %878 = vector.load %arg1[%c30_386, %c0_387, %c0_388] : memref<32x32x16xf32, #tpu.memory_space<vmem>>, vector<1x32x16xf32>
      %879 = vector.shape_cast %878 : vector<1x32x16xf32> to vector<32x16xf32>
      %880 = vector.extract_strided_slice %696 {offsets = [30, 0], sizes = [1, 16], strides = [1, 1]} : vector<32x16xf32> to vector<1x16xf32>
      %881 = vector.broadcast %880 : vector<1x16xf32> to vector<32x16xf32>
      %882 = arith.mulf %879, %881 : vector<32x16xf32>
      %883 = arith.addf %877, %882 : vector<32x16xf32>
      %c31_389 = arith.constant 31 : index
      %c0_390 = arith.constant 0 : index
      %c0_391 = arith.constant 0 : index
      %884 = vector.load %arg1[%c31_389, %c0_390, %c0_391] : memref<32x32x16xf32, #tpu.memory_space<vmem>>, vector<1x32x16xf32>
      %885 = vector.shape_cast %884 : vector<1x32x16xf32> to vector<32x16xf32>
      %886 = vector.extract_strided_slice %696 {offsets = [31, 0], sizes = [1, 16], strides = [1, 1]} : vector<32x16xf32> to vector<1x16xf32>
      %887 = vector.broadcast %886 : vector<1x16xf32> to vector<32x16xf32>
      %888 = arith.mulf %885, %887 : vector<32x16xf32>
      %889 = arith.addf %883, %888 : vector<32x16xf32>
      %890 = arith.mulf %696, %889 : vector<32x16xf32>
      %cst_392 = arith.constant dense<0.000000e+00> : vector<16xf32>
      %891 = vector.multi_reduction <add>, %890, %cst_392 [0] : vector<32x16xf32> to vector<16xf32>
      %892 = vector.shape_cast %891 : vector<16xf32> to vector<1x16xf32>
      %cst_393 = arith.constant 0.000000e+00 : f32
      %893 = vector.broadcast %cst_393 : f32 to vector<1x16xf32>
      %894 = arith.cmpf one, %892, %893 : vector<1x16xf32>
      %cst_394 = arith.constant 1.000000e+00 : f32
      %895 = vector.broadcast %cst_394 : f32 to vector<1x16xf32>
      %896 = arith.select %894, %892, %895 : vector<1x16xi1>, vector<1x16xf32>
      %897 = arith.divf %684, %896 : vector<1x16xf32>
      %cst_395 = arith.constant 0.000000e+00 : f32
      %898 = vector.broadcast %cst_395 : f32 to vector<1x16xf32>
      %899 = arith.select %686, %898, %897 : vector<1x16xi1>, vector<1x16xf32>
      %900 = vector.broadcast %899 : vector<1x16xf32> to vector<32x16xf32>
      %901 = arith.mulf %900, %696 : vector<32x16xf32>
      %902 = arith.addf %678, %901 : vector<32x16xf32>
      %903 = vector.broadcast %899 : vector<1x16xf32> to vector<32x16xf32>
      %904 = arith.mulf %903, %889 : vector<32x16xf32>
      %905 = arith.subf %681, %904 : vector<32x16xf32>
      %906 = arith.mulf %905, %905 : vector<32x16xf32>
      %cst_396 = arith.constant dense<0.000000e+00> : vector<16xf32>
      %907 = vector.multi_reduction <add>, %906, %cst_396 [0] : vector<32x16xf32> to vector<16xf32>
      %908 = vector.shape_cast %907 : vector<16xf32> to vector<1x16xf32>
      %c4_i32 = arith.constant 4 : i32
      %909 = arith.addi %arg4, %c4_i32 : i32
      scf.yield %909, %902, %905, %696, %684, %908 : i32, vector<32x16xf32>, vector<32x16xf32>, vector<32x16xf32>, vector<1x16xf32>, vector<1x16xf32>
    }
    %c0_6 = arith.constant 0 : index
    %c0_7 = arith.constant 0 : index
    %12 = vector.load %arg3[%c0_6, %c0_7] : memref<32x16xf32, #tpu.memory_space<vmem>>, vector<32x16xf32>
    tpu.vector_store %arg3[%c0_6, %c0_7], %11#1 {strides = array<i32>} : memref<32x16xf32, #tpu.memory_space<vmem>>, vector<32x16xf32>,
    return
  }
  func.func @transform_0(%arg0: i32) -> (i32, i32, i32) {
    %c0_i32 = arith.constant 0 : i32
    %c0_i32_0 = arith.constant 0 : i32
    %c0_i32_1 = arith.constant 0 : i32
    return %c0_i32, %c0_i32_0, %arg0 : i32, i32, i32
  }
  func.func @transform_1(%arg0: i32) -> (i32, i32) {
    %c0_i32 = arith.constant 0 : i32
    %c0_i32_0 = arith.constant 0 : i32
    return %c0_i32, %arg0 : i32, i32
  }
  func.func @transform_2(%arg0: i32) -> (i32, i32) {
    %c0_i32 = arith.constant 0 : i32
    %c0_i32_0 = arith.constant 0 : i32
    return %c0_i32, %arg0 : i32, i32
  }
}

</mosaic_0001>

<bundles_post_ra>
// kernel: tpu_custom_call.1
= control target key start
LH: loop header
LB: loop body
LE: loop exit
PB: predicated region body
PF: predicated region fallthrough
CT: control target
= control target key end

     0   :  { %vm19_vm0 = vcmask 130048   ;;  %v2685_v22 = vmov 0.0   ;;  %v2729_v26 = vmov 0.0   ;;  %v2731_v27 = vmov 0.0   ;;  %s5274_s0 = inlined_call_operand.vmem [shape: f32[32,32,16], index: 0, kind: input, shape index: {}]   ;;  %s5275_s1 = inlined_call_operand.vmem [shape: f32[32,16], index: 1, kind: input, shape index: {}]   ;;  %s5276_s2 = inlined_call_operand.vmem [shape: f32[32,16], index: 2, kind: output, shape index: {}]  }
   0x1   :  { %v11_v0 = vld [vmem:[%s5275_s1] sm:$0xff]   ;;  %v12_v1 = vld [vmem:[%s5275_s1 + $0x8] sm:$0xff]   ;;  %v13_v2 = vld [vmem:[%s5275_s1 + $0x10] sm:$0xff]   ;;  %v2733_v28 = vmov 0.0   ;;  %v2735_v29 = vmov 0.0  }
   0x2   :  { %v14_v3 = vld [vmem:[%s5275_s1 + $0x18] sm:$0xff]   ;;  %v15_v4 = vmul.f32 %v11_v0, %v11_v0  ;;  %v16_v5 = vmul.f32 %v12_v1, %v12_v1  ;;  %v17_v6 = vmul.f32 %v13_v2, %v13_v2 }
   0x3   :  { %v18_v7 = vmul.f32 %v14_v3, %v14_v3 }
   0x4   :  { %v20_v8 = vsel %vm19_vm0, %v15_v4, 0.0  ;;  %v21_v9 = vsel %vm19_vm0, %v16_v5, 0.0  ;;  %v23_v10 = vsel %vm19_vm0, %v17_v6, 0.0 }
   0x5   :  { %v22_v11 = vadd.f32 %v21_v9, %v20_v8  ;;  %v25_v12 = vsel %vm19_vm0, %v18_v7, 0.0 }
   0x7   :  { %v24_v13 = vadd.f32 %v23_v10, %v22_v11 }
   0x9   :  { %v26_v14 = vadd.f32 %v25_v12, %v24_v13 }
   0xb   :  { %v27_v15 = vrot.slane %v26_v14, 4 }
   0xd   :  { %v28_v16 = vadd.f32 %v27_v15, %v26_v14 }
   0xf   :  { %v29_v17 = vrot.slane %v28_v16, 2 }
  0x11   :  { %v30_v18 = vadd.f32 %v29_v17, %v28_v16 }
  0x13   :  { %v31_v19 = vrot.slane %v30_v18, 1 }
  0x15   :  { %v2718_v20 = vadd.f32 %v31_v19, %v30_v18  }
  0x17   :  { %5512 = vst [vmem:[#allocation2_spill] sm:$0xff] %v2718_v20  ;;  %v2721_v21 = vmul.f32 1e-10, %v2718_v20  ;;  %vm34_vm1 = vcmp.eq.f32.partialorder %v2718_v20, 0.0 }
  0x19   :  { %5513 = vst [vmem:[#allocation3_spill] sm:$0xff] %v2721_v21  ;;  %vm2064_vm2 = vcmp.lt.f32.partialorder %v2718_v20, %v2721_v21 }
  0x1a   :  { %vm2065_vm3 = vmor %vm2064_vm2, %vm34_vm1 }
  0x1b   :  { %v2066_v23 = vsel %vm2065_vm3, 1.0, %v2685_v22 }
  0x1c   :  { %v2067_v24 = vsel %vm19_vm0, %v2066_v23, inf }
  0x1d   :  { %2068 = vmin.xlane.f32.xlu0 %v2067_v24 }
  0xa6   :  { %v2069_v25 = vpop.xlane.xlu0 %2068 }
  0xa7   :  { %2231 = vpush %v2069_v25 }
  0xd8   :  { %s2232_s1 = spop %2231 }
  0xd9   :  { %p2071_p0 = scmp.gt.f32.partialorder %s2232_s1, 0.0 }
  0xda   :  { %s2766_s17 = smov (!%p2071_p0), 0  }
  0xdb   :  { %2075 = sbr.rel (%p2071_p0) target bundleno = 1047 (0x417), region = 60 }
  0xe0   :  { %v5514_v20 = vld [vmem:[#allocation2_spill] sm:$0xff]  ;;  %v2740_v31 = vmov 1.0   ;;  %v2742_v32 = vmov 0.0   ;;  %v2744_v33 = vmov 0.0   ;;  %v2746_v34 = vmov 0.0  }
  0xe1   :  { %v5515_v30 = vmov %v5514_v20  ;;  %v2748_v35 = vmov 0.0   ;;  %v2758_v36 = vmov 0.0   ;;  %v2760_v37 = vmov 0.0  }
  0xe2   :  { %v2762_v38 = vmov 0.0   ;;  %v2764_v39 = vmov 0.0  }
  0xe3 LB: > { %v5516_v21 = vld [vmem:[#allocation3_spill] sm:$0xff]  ;;  %5518 = vst [vmem:[#allocation4_spill] sm:$0xff] %v2651_v36  ;;  %5519 = vst [vmem:[#allocation5_spill] sm:$0xff] %v2655_v37  ;;  %vm67_vm4 = vcmp.gt.f32.partialorder %v2615_v31, 0.0  ;;  %v84_v41 = vlaneseq  ;;  %v2836_v60 = vld [vmem:[%s5274_s0] sm:$0xff]  ;;  %vm680_vm8 = vcmp.gt.f32.partialorder %v2611_v30, 0.0  ;;  %v2615_v31 = vphi %v2740_v31, %v4937_v31   ;;  %v2611_v30 = vphi %v5515_v30, %v2039_v30   ;;  %s2667_s17 = sphi %s2766_s17, %s6002_s17   ;;  %v2663_v39 = vphi %v2764_v39, %v6001_v39   ;;  %v2659_v38 = vphi %v2762_v38, %v6000_v38   ;;  %v2655_v37 = vphi %v2760_v37, %v5999_v37   ;;  %v2651_v36 = vphi %v2758_v36, %v5998_v36   ;;  %v2647_v0 = vphi %v11_v0, %v2019_v0   ;;  %v2643_v1 = vphi %v12_v1, %v2020_v1   ;;  %v2639_v2 = vphi %v13_v2, %v2021_v2   ;;  %v2635_v3 = vphi %v14_v3, %v2022_v3   ;;  %v2631_v35 = vphi %v2748_v35, %v5997_v35   ;;  %v2627_v34 = vphi %v2746_v34, %v5996_v34   ;;  %v2623_v33 = vphi %v2744_v33, %v4961_v33   ;;  %v2619_v32 = vphi %v2742_v32, %v4964_v32  }
  0xe4   : > { %5520 = vst [vmem:[#allocation6_spill] sm:$0xff] %v2659_v38  ;;  %5521 = vst [vmem:[#allocation7_spill] sm:$0xff] %v2663_v39  ;;  %v68_v40 = vsel %vm67_vm4, %v2615_v31, 1.0  ;;  %vm65_vm5 = vcmp.lt.f32.partialorder %v2611_v30, %v5516_v21  ;;  %v2841_v61 = vld [vmem:[%s5274_s0 + $0x8] sm:$0xff]  ;;  %v2846_v62 = vld [vmem:[%s5274_s0 + $0x10] sm:$0xff]  ;;  %s2040_s26 = sadd.s32 4, %s2667_s17  }
  0xe5   : > { %2389 = vrcp.f32 %v68_v40  ;;  %v85_v42 = vshrl.u32 %v84_v41, 7  ;;  %vm2807_vm6 = vmor %vm65_vm5, %vm34_vm1  ;;  %v2860_v6 = vld [vmem:[%s5274_s0 + $0x18] sm:$0xff]  ;;  %v2865_v7 = vld [vmem:[%s5274_s0 + $0x20] sm:$0xff]  ;;  %p5192_p2 = scmp.lt.s32.totalorder %s2040_s26, 320  ;;  %s6002_s17 = smov %s2040_s26 }
  0xe6   : > { %v2870_v8 = vld [vmem:[%s5274_s0 + $0x28] sm:$0xff]  ;;  %v2877_v10 = vld [vmem:[%s5274_s0 + $0x30] sm:$0xff]  ;;  %v2882_v11 = vld [vmem:[%s5274_s0 + $0x38] sm:$0xff] }
  0xe7   : > { %v2812_v46 = vsub.s32 0, %v85_v42  ;;  %v2816_v48 = vsub.s32 1, %v85_v42  ;;  %v2818_v49 = vsub.s32 2, %v85_v42  ;;  %v2820_v50 = vsub.s32 3, %v85_v42  ;;  %v2889_v13 = vld [vmem:[%s5274_s0 + $0x40] sm:$0xff]  ;;  %v2898_v16 = vld [vmem:[%s5274_s0 + $0x48] sm:$0xff] }
  0xe8   : > { %v2822_v55 = vsub.s32 4, %v85_v42  ;;  %v2824_v56 = vsub.s32 5, %v85_v42  ;;  %v2826_v57 = vsub.s32 6, %v85_v42  ;;  %v2828_v58 = vsub.s32 7, %v85_v42  ;;  %v2903_v17 = vld [vmem:[%s5274_s0 + $0x50] sm:$0xff]  ;;  %v2908_v18 = vld [vmem:[%s5274_s0 + $0x58] sm:$0xff] }
  0xe9   : > { %5524 = vst [vmem:[#allocation8_spill] sm:$0xff] %v2903_v17  ;;  %5525 = vst [vmem:[#allocation9_spill] sm:$0xff] %v2908_v18  ;;  %v2929_v29 = vld [vmem:[%s5274_s0 + $0x60] sm:$0xff]  ;;  %v2943_v40 = vld [vmem:[%s5274_s0 + $0x70] sm:$0xff] }
  0xea   : > { %5526 = vst [vmem:[#allocation10_spill] sm:$0xff] %v2929_v29  ;;  %5528 = vst [vmem:[#allocation12_spill] sm:$0xff] %v2943_v40  ;;  %v2948_v41 = vld [vmem:[%s5274_s0 + $0x78] sm:$0xff]  ;;  %v2967_v36 = vld [vmem:[%s5274_s0 + $0x90] sm:$0xff] }
  0xeb   : > { %5529 = vst [vmem:[#allocation13_spill] sm:$0xff] %v2948_v41  ;;  %5532 = vst [vmem:[#allocation16_spill] sm:$0xff] %v2967_v36  ;;  %v2986_v38 = vld [vmem:[%s5274_s0 + $0xa8] sm:$0xff]  ;;  %v2991_v39 = vld [vmem:[%s5274_s0 + $0xb0] sm:$0xff] }
  0xec   : > { %5535 = vst [vmem:[#allocation19_spill] sm:$0xff] %v2986_v38  ;;  %5536 = vst [vmem:[#allocation20_spill] sm:$0xff] %v2991_v39 }
  0xf2   : > { %v2390_v43 = vpop.eup %2389  ;;  %v5646_v20 = vld [vmem:[#allocation13_spill] sm:$0xff] }
  0xf3   : > { %v70_v45 = vmul.f32 %v2611_v30, %v2390_v43 }
  0xf5   : > { %v71_v47 = vsel %vm2807_vm6, 0.0, %v70_v45 }
  0xf6   : > { %v72_v51 = vmul.f32 %v2631_v35, %v71_v47  ;;  %v73_v52 = vmul.f32 %v2627_v34, %v71_v47  ;;  %v74_v53 = vmul.f32 %v2623_v33, %v71_v47  ;;  %v75_v54 = vmul.f32 %v2619_v32, %v71_v47  ;;  %v2938_v35 = vld [vmem:[%s5274_s0 + $0x68] sm:$0xff] }
  0xf7   : > { %5527 = vst [vmem:[#allocation11_spill] sm:$0xff] %v2938_v35 }
  0xf8   : > { %v2831_v59 = vadd.f32 %v2647_v0, %v72_v51  ;;  %v2849_v63 = vadd.f32 %v2643_v1, %v73_v52  ;;  %v2852_v4 = vadd.f32 %v2639_v2, %v74_v53  ;;  %v2855_v5 = vadd.f32 %v2635_v3, %v75_v54  ;;  %v2957_v51 = vld [vmem:[%s5274_s0 + $0x80] sm:$0xff] }
  0xf9   : > { %5530 = vst [vmem:[#allocation14_spill] sm:$0xff] %v2957_v51 }
  0xfa   : > { %v87_v9 = vrot.slane %v2831_v59, %v2812_v46  ;;  %v104_v12 = vrot.slane %v2831_v59, %v2816_v48  ;;  %v121_v14 = vrot.slane %v2831_v59, %v2818_v49  ;;  %v138_v15 = vrot.slane %v2831_v59, %v2820_v50 }
  0xfb   : > { %v155_v19 = vrot.slane %v2831_v59, %v2822_v55  ;;  %v172_v22 = vrot.slane %v2831_v59, %v2824_v56  ;;  %v2916_v23 = vrot.slane %v2831_v59, %v2826_v57  ;;  %v2920_v24 = vrot.slane %v2831_v59, %v2828_v58 }
  0xfc   : > { %v88_v25 = vmul.f32 %v87_v9, %v2836_v60  ;;  %v89_v26 = vmul.f32 %v87_v9, %v2841_v61  ;;  %v90_v27 = vmul.f32 %v87_v9, %v2846_v62  ;;  %v91_v28 = vmul.f32 %v87_v9, %v2860_v6 }
  0xfd   : > { %v105_v31 = vmul.f32 %v2865_v7, %v104_v12  ;;  %v106_v32 = vmul.f32 %v2870_v8, %v104_v12  ;;  %v107_v33 = vmul.f32 %v2877_v10, %v104_v12  ;;  %v108_v34 = vmul.f32 %v2882_v11, %v104_v12  ;;  %v2962_v12 = vld [vmem:[%s5274_s0 + $0x88] sm:$0xff] }
  0xfe   : > { %v122_v42 = vmul.f32 %v2889_v13, %v121_v14  ;;  %v123_v43 = vmul.f32 %v2898_v16, %v121_v14  ;;  %v124_v45 = vmul.f32 %v2903_v17, %v121_v14  ;;  %v125_v47 = vmul.f32 %v2908_v18, %v121_v14  ;;  %5531 = vst [vmem:[#allocation15_spill] sm:$0xff] %v2962_v12  ;;  %v2972_v14 = vld [vmem:[%s5274_s0 + $0x98] sm:$0xff] }
  0xff   : > { %v109_v52 = vadd.f32 %v105_v31, %v88_v25  ;;  %v110_v53 = vadd.f32 %v106_v32, %v89_v26  ;;  %v111_v54 = vadd.f32 %v107_v33, %v90_v27  ;;  %v112_v9 = vadd.f32 %v108_v34, %v91_v28  ;;  %5533 = vst [vmem:[#allocation17_spill] sm:$0xff] %v2972_v14  ;;  %v2981_v31 = vld [vmem:[%s5274_s0 + $0xa0] sm:$0xff] }
 0x100   : > { %v139_v25 = vmul.f32 %v2929_v29, %v138_v15  ;;  %v140_v26 = vmul.f32 %v2938_v35, %v138_v15  ;;  %v141_v27 = vmul.f32 %v2943_v40, %v138_v15  ;;  %v142_v28 = vmul.f32 %v2948_v41, %v138_v15  ;;  %5534 = vst [vmem:[#allocation18_spill] sm:$0xff] %v2981_v31  ;;  %v2996_v15 = vld [vmem:[%s5274_s0 + $0xb8] sm:$0xff]  ;;  %v3010_v40 = vld [vmem:[%s5274_s0 + $0xc8] sm:$0xff] }
 0x101   : > { %v126_v32 = vadd.f32 %v122_v42, %v109_v52  ;;  %v127_v33 = vadd.f32 %v123_v43, %v110_v53  ;;  %v128_v34 = vadd.f32 %v124_v45, %v111_v54  ;;  %v129_v37 = vadd.f32 %v125_v47, %v112_v9  ;;  %5537 = vst [vmem:[#allocation21_spill] sm:$0xff] %v2996_v15  ;;  %v3005_v52 = vld [vmem:[%s5274_s0 + $0xc0] sm:$0xff] }
 0x102   : > { %v156_v42 = vmul.f32 %v2957_v51, %v155_v19  ;;  %v157_v43 = vmul.f32 %v2962_v12, %v155_v19  ;;  %v158_v45 = vmul.f32 %v2967_v36, %v155_v19  ;;  %v159_v47 = vmul.f32 %v2972_v14, %v155_v19  ;;  %5538 = vst [vmem:[#allocation22_spill] sm:$0xff] %v3005_v52  ;;  %v3015_v36 = vld [vmem:[%s5274_s0 + $0xd0] sm:$0xff]  ;;  %v3020_v19 = vld [vmem:[%s5274_s0 + $0xd8] sm:$0xff]  ;;  %v3034_v12 = vld [vmem:[%s5274_s0 + $0xe8] sm:$0xff] }
 0x103   : > { %v143_v53 = vadd.f32 %v139_v25, %v126_v32  ;;  %v144_v54 = vadd.f32 %v140_v26, %v127_v33  ;;  %v145_v9 = vadd.f32 %v141_v27, %v128_v34  ;;  %v146_v41 = vadd.f32 %v142_v28, %v129_v37  ;;  %5539 = vst [vmem:[#allocation23_spill] sm:$0xff] %v3010_v40  ;;  %v3029_v28 = vld [vmem:[%s5274_s0 + $0xe0] sm:$0xff] }
 0x104   : > { %5540 = vst [vmem:[#allocation24_spill] sm:$0xff] %v3015_v36  ;;  %5541 = vst [vmem:[#allocation25_spill] sm:$0xff] %v3020_v19  ;;  %v173_v25 = vmul.f32 %v2981_v31, %v172_v22  ;;  %v174_v26 = vmul.f32 %v2986_v38, %v172_v22  ;;  %v175_v37 = vmul.f32 %v2991_v39, %v172_v22  ;;  %v3039_v39 = vld [vmem:[%s5274_s0 + $0xf0] sm:$0xff] }
 0x105   : > { %v176_v27 = vmul.f32 %v2996_v15, %v172_v22  ;;  %5542 = vst [vmem:[#allocation26_spill] sm:$0xff] %v3029_v28  ;;  %v160_v32 = vadd.f32 %v156_v42, %v143_v53  ;;  %v161_v33 = vadd.f32 %v157_v43, %v144_v54  ;;  %v162_v34 = vadd.f32 %v158_v45, %v145_v9  ;;  %v3044_v22 = vld [vmem:[%s5274_s0 + $0xf8] sm:$0xff] }
 0x106   : > { %v163_v14 = vadd.f32 %v159_v47, %v146_v41  ;;  %5543 = vst [vmem:[#allocation27_spill] sm:$0xff] %v3034_v12  ;;  %5544 = vst [vmem:[#allocation28_spill] sm:$0xff] %v3039_v39  ;;  %v190_v42 = vmul.f32 %v3005_v52, %v2916_v23  ;;  %v191_v41 = vmul.f32 %v3010_v40, %v2916_v23 }
 0x107   : > { %5545 = vst [vmem:[#allocation29_spill] sm:$0xff] %v3044_v22  ;;  %v192_v43 = vmul.f32 %v3015_v36, %v2916_v23  ;;  %v193_v45 = vmul.f32 %v3020_v19, %v2916_v23  ;;  %v177_v47 = vadd.f32 %v173_v25, %v160_v32  ;;  %v178_v53 = vadd.f32 %v174_v26, %v161_v33  ;;  %v3065_v23 = vld [vmem:[%s5274_s0 + $0x100] sm:$0xff]  ;;  %v3075_v32 = vld [vmem:[%s5274_s0 + $0x110] sm:$0xff] }
 0x108   : > { %v179_v54 = vadd.f32 %v175_v37, %v162_v34  ;;  %v180_v9 = vadd.f32 %v176_v27, %v163_v14  ;;  %v207_v15 = vmul.f32 %v3029_v28, %v2920_v24  ;;  %v208_v38 = vmul.f32 %v3034_v12, %v2920_v24  ;;  %5546 = vst [vmem:[#allocation30_spill] sm:$0xff] %v3065_v23  ;;  %v3070_v14 = vld [vmem:[%s5274_s0 + $0x108] sm:$0xff]  ;;  %v3085_v33 = vld [vmem:[%s5274_s0 + $0x120] sm:$0xff] }
 0x109   : > { %v209_v52 = vmul.f32 %v3039_v39, %v2920_v24  ;;  %v210_v40 = vmul.f32 %v3044_v22, %v2920_v24  ;;  %5547 = vst [vmem:[#allocation31_spill] sm:$0xff] %v3070_v14  ;;  %v194_v25 = vadd.f32 %v190_v42, %v177_v47  ;;  %v195_v26 = vadd.f32 %v191_v41, %v178_v53  ;;  %v3080_v24 = vld [vmem:[%s5274_s0 + $0x118] sm:$0xff]  ;;  %v3092_v42 = vld [vmem:[%s5274_s0 + $0x128] sm:$0xff]  ;;  %v3097_v41 = vld [vmem:[%s5274_s0 + $0x130] sm:$0xff] }
 0x10a   : > { %v196_v37 = vadd.f32 %v192_v43, %v179_v54  ;;  %v197_v27 = vadd.f32 %v193_v45, %v180_v9  ;;  %5548 = vst [vmem:[#allocation32_spill] sm:$0xff] %v3075_v32  ;;  %5549 = vst [vmem:[#allocation33_spill] sm:$0xff] %v3080_v24  ;;  %v223_v34 = vrot.slane %v2849_v63, %v2812_v46  ;;  %v3102_v43 = vld [vmem:[%s5274_s0 + $0x138] sm:$0xff]  ;;  %v3113_v12 = vld [vmem:[%s5274_s0 + $0x140] sm:$0xff] }
 0x10b   : > { %5550 = vst [vmem:[#allocation34_spill] sm:$0xff] %v3085_v33  ;;  %5551 = vst [vmem:[#allocation35_spill] sm:$0xff] %v3092_v42  ;;  %v240_v45 = vrot.slane %v2849_v63, %v2816_v48  ;;  %v257_v47 = vrot.slane %v2849_v63, %v2818_v49  ;;  %v274_v53 = vrot.slane %v2849_v63, %v2820_v50 }
 0x10c   : > { %5552 = vst [vmem:[#allocation36_spill] sm:$0xff] %v3097_v41  ;;  %5553 = vst [vmem:[#allocation37_spill] sm:$0xff] %v3102_v43  ;;  %v211_v54 = vadd.f32 %v207_v15, %v194_v25  ;;  %v212_v9 = vadd.f32 %v208_v38, %v195_v26  ;;  %v213_v22 = vadd.f32 %v209_v52, %v196_v37  ;;  %v3122_v15 = vld [vmem:[%s5274_s0 + $0x148] sm:$0xff]  ;;  %v3127_v38 = vld [vmem:[%s5274_s0 + $0x150] sm:$0xff] }
 0x10d   : > { %v214_v39 = vadd.f32 %v210_v40, %v197_v27  ;;  %5554 = vst [vmem:[#allocation38_spill] sm:$0xff] %v3113_v12  ;;  %v224_v28 = vmul.f32 %v3065_v23, %v223_v34  ;;  %v225_v19 = vmul.f32 %v3070_v14, %v223_v34  ;;  %v226_v36 = vmul.f32 %v3075_v32, %v223_v34  ;;  %v3132_v40 = vld [vmem:[%s5274_s0 + $0x158] sm:$0xff]  ;;  %v3141_v27 = vld [vmem:[%s5274_s0 + $0x160] sm:$0xff]  ;;  %v3146_v23 = vld [vmem:[%s5274_s0 + $0x168] sm:$0xff] }
 0x10e   : > { %v227_v31 = vmul.f32 %v3080_v24, %v223_v34  ;;  %5555 = vst [vmem:[#allocation39_spill] sm:$0xff] %v3122_v15  ;;  %5556 = vst [vmem:[#allocation40_spill] sm:$0xff] %v3127_v38  ;;  %v241_v52 = vmul.f32 %v3085_v33, %v240_v45  ;;  %v242_v25 = vmul.f32 %v3092_v42, %v240_v45 }
 0x10f   : > { %5557 = vst [vmem:[#allocation41_spill] sm:$0xff] %v3132_v40  ;;  %v243_v26 = vmul.f32 %v3097_v41, %v240_v45  ;;  %v244_v37 = vmul.f32 %v3102_v43, %v240_v45  ;;  %5558 = vst [vmem:[#allocation42_spill] sm:$0xff] %v3141_v27  ;;  %v228_v34 = vadd.f32 %v224_v28, %v211_v54  ;;  %v3151_v41 = vld [vmem:[%s5274_s0 + $0x170] sm:$0xff]  ;;  %v3156_v45 = vld [vmem:[%s5274_s0 + $0x178] sm:$0xff] }
 0x110   : > { %v229_v24 = vadd.f32 %v225_v19, %v212_v9  ;;  %v230_v32 = vadd.f32 %v226_v36, %v213_v22  ;;  %v231_v14 = vadd.f32 %v227_v31, %v214_v39  ;;  %5559 = vst [vmem:[#allocation43_spill] sm:$0xff] %v3146_v23  ;;  %5560 = vst [vmem:[#allocation44_spill] sm:$0xff] %v3151_v41 }
 0x111   : > { %5561 = vst [vmem:[#allocation45_spill] sm:$0xff] %v3156_v45  ;;  %v258_v28 = vmul.f32 %v3113_v12, %v257_v47  ;;  %v259_v36 = vmul.f32 %v3122_v15, %v257_v47  ;;  %v260_v39 = vmul.f32 %v3127_v38, %v257_v47  ;;  %v261_v31 = vmul.f32 %v3132_v40, %v257_v47  ;;  %v3169_v15 = vld [vmem:[%s5274_s0 + $0x180] sm:$0xff]  ;;  %v3174_v47 = vld [vmem:[%s5274_s0 + $0x188] sm:$0xff] }
 0x112   : > { %v245_v19 = vadd.f32 %v241_v52, %v228_v34  ;;  %v246_v22 = vadd.f32 %v242_v25, %v229_v24  ;;  %v247_v54 = vadd.f32 %v243_v26, %v230_v32  ;;  %v248_v9 = vadd.f32 %v244_v37, %v231_v14  ;;  %5562 = vst [vmem:[#allocation46_spill] sm:$0xff] %v3169_v15  ;;  %v3179_v25 = vld [vmem:[%s5274_s0 + $0x190] sm:$0xff]  ;;  %v3189_v26 = vld [vmem:[%s5274_s0 + $0x1a0] sm:$0xff]  ;;  %v3196_v34 = vld [vmem:[%s5274_s0 + $0x1a8] sm:$0xff] }
 0x113   : > { %v275_v43 = vmul.f32 %v3141_v27, %v274_v53  ;;  %v276_v42 = vmul.f32 %v3146_v23, %v274_v53  ;;  %v277_v33 = vmul.f32 %v3151_v41, %v274_v53  ;;  %v278_v51 = vmul.f32 %v3156_v45, %v274_v53  ;;  %5563 = vst [vmem:[#allocation47_spill] sm:$0xff] %v3174_v47  ;;  %v3184_v53 = vld [vmem:[%s5274_s0 + $0x198] sm:$0xff]  ;;  %v3217_v41 = vld [vmem:[%s5274_s0 + $0x1c0] sm:$0xff] }
 0x114   : > { %v262_v32 = vadd.f32 %v258_v28, %v245_v19  ;;  %v263_v14 = vadd.f32 %v259_v36, %v246_v22  ;;  %v264_v24 = vadd.f32 %v260_v39, %v247_v54  ;;  %v265_v52 = vadd.f32 %v261_v31, %v248_v9  ;;  %5564 = vst [vmem:[#allocation48_spill] sm:$0xff] %v3179_v25  ;;  %v3201_v28 = vld [vmem:[%s5274_s0 + $0x1b0] sm:$0xff]  ;;  %v3206_v36 = vld [vmem:[%s5274_s0 + $0x1b8] sm:$0xff] }
 0x115   : > { %5565 = vst [vmem:[#allocation49_spill] sm:$0xff] %v3184_v53  ;;  %5566 = vst [vmem:[#allocation50_spill] sm:$0xff] %v3189_v26  ;;  %v291_v37 = vrot.slane %v2849_v63, %v2822_v55  ;;  %v308_v39 = vrot.slane %v2849_v63, %v2824_v56  ;;  %v325_v31 = vrot.slane %v2849_v63, %v2826_v57 }
 0x116   : > { %5567 = vst [vmem:[#allocation51_spill] sm:$0xff] %v3196_v34  ;;  %5568 = vst [vmem:[#allocation52_spill] sm:$0xff] %v3201_v28  ;;  %v342_v19 = vrot.slane %v2849_v63, %v2828_v58  ;;  %v279_v22 = vadd.f32 %v275_v43, %v262_v32  ;;  %v280_v54 = vadd.f32 %v276_v42, %v263_v14  ;;  %v3226_v43 = vld [vmem:[%s5274_s0 + $0x1c8] sm:$0xff] }
 0x117   : > { %5569 = vst [vmem:[#allocation53_spill] sm:$0xff] %v3206_v36  ;;  %v281_v9 = vadd.f32 %v277_v33, %v264_v24  ;;  %v282_v45 = vadd.f32 %v278_v51, %v265_v52  ;;  %5570 = vst [vmem:[#allocation54_spill] sm:$0xff] %v3217_v41  ;;  %v292_v23 = vmul.f32 %v3169_v15, %v291_v37  ;;  %v3231_v51 = vld [vmem:[%s5274_s0 + $0x1d0] sm:$0xff]  ;;  %v3236_v33 = vld [vmem:[%s5274_s0 + $0x1d8] sm:$0xff] }
 0x118   : > { %v293_v27 = vmul.f32 %v3174_v47, %v291_v37  ;;  %v294_v40 = vmul.f32 %v3179_v25, %v291_v37  ;;  %v295_v38 = vmul.f32 %v3184_v53, %v291_v37  ;;  %5571 = vst [vmem:[#allocation55_spill] sm:$0xff] %v3226_v43  ;;  %5572 = vst [vmem:[#allocation56_spill] sm:$0xff] %v3231_v51  ;;  %v3245_v52 = vld [vmem:[%s5274_s0 + $0x1e0] sm:$0xff]  ;;  %v3250_v15 = vld [vmem:[%s5274_s0 + $0x1e8] sm:$0xff] }
 0x119   : > { %5573 = vst [vmem:[#allocation57_spill] sm:$0xff] %v3236_v33  ;;  %v309_v42 = vmul.f32 %v3189_v26, %v308_v39  ;;  %v310_v32 = vmul.f32 %v3196_v34, %v308_v39  ;;  %v311_v14 = vmul.f32 %v3201_v28, %v308_v39  ;;  %v312_v24 = vmul.f32 %v3206_v36, %v308_v39  ;;  %v3255_v28 = vld [vmem:[%s5274_s0 + $0x1f0] sm:$0xff]  ;;  %v3260_v39 = vld [vmem:[%s5274_s0 + $0x1f8] sm:$0xff] }
 0x11a   : > { %5574 = vst [vmem:[#allocation58_spill] sm:$0xff] %v3245_v52  ;;  %v296_v37 = vadd.f32 %v292_v23, %v279_v22  ;;  %v297_v53 = vadd.f32 %v293_v27, %v280_v54  ;;  %v298_v25 = vadd.f32 %v294_v40, %v281_v9  ;;  %v299_v47 = vadd.f32 %v295_v38, %v282_v45 }
 0x11b   : > { %5575 = vst [vmem:[#allocation59_spill] sm:$0xff] %v3250_v15  ;;  %5576 = vst [vmem:[#allocation60_spill] sm:$0xff] %v3255_v28  ;;  %v326_v23 = vmul.f32 %v3217_v41, %v325_v31  ;;  %v327_v40 = vmul.f32 %v3226_v43, %v325_v31  ;;  %v328_v38 = vmul.f32 %v3231_v51, %v325_v31  ;;  %v3273_v43 = vld [vmem:[%s5274_s0 + $0x200] sm:$0xff] }
 0x11c   : > { %5577 = vst [vmem:[#allocation61_spill] sm:$0xff] %v3260_v39  ;;  %v329_v27 = vmul.f32 %v3236_v33, %v325_v31  ;;  %v313_v45 = vadd.f32 %v309_v42, %v296_v37  ;;  %v314_v22 = vadd.f32 %v310_v32, %v297_v53  ;;  %v315_v54 = vadd.f32 %v311_v14, %v298_v25  ;;  %v3278_v31 = vld [vmem:[%s5274_s0 + $0x208] sm:$0xff]  ;;  %v3283_v32 = vld [vmem:[%s5274_s0 + $0x210] sm:$0xff]  ;;  %v3293_v14 = vld [vmem:[%s5274_s0 + $0x220] sm:$0xff] }
 0x11d   : > { %v316_v9 = vadd.f32 %v312_v24, %v299_v47  ;;  %v343_v36 = vmul.f32 %v3245_v52, %v342_v19  ;;  %v344_v34 = vmul.f32 %v3250_v15, %v342_v19  ;;  %v345_v26 = vmul.f32 %v3255_v28, %v342_v19  ;;  %5578 = vst [vmem:[#allocation62_spill] sm:$0xff] %v3273_v43  ;;  %v3300_v37 = vld [vmem:[%s5274_s0 + $0x228] sm:$0xff]  ;;  %v3321_v28 = vld [vmem:[%s5274_s0 + $0x240] sm:$0xff] }
 0x11e   : > { %v346_v12 = vmul.f32 %v3260_v39, %v342_v19  ;;  %5579 = vst [vmem:[#allocation63_spill] sm:$0xff] %v3278_v31  ;;  %v330_v25 = vadd.f32 %v326_v23, %v313_v45  ;;  %v331_v47 = vadd.f32 %v327_v40, %v314_v22  ;;  %v332_v53 = vadd.f32 %v328_v38, %v315_v54  ;;  %v3288_v19 = vld [vmem:[%s5274_s0 + $0x218] sm:$0xff]  ;;  %v3305_v23 = vld [vmem:[%s5274_s0 + $0x230] sm:$0xff] }
 0x11f   : > { %v333_v42 = vadd.f32 %v329_v27, %v316_v9  ;;  %5580 = vst [vmem:[#allocation64_spill] sm:$0xff] %v3283_v32  ;;  %5581 = vst [vmem:[#allocation65_spill] sm:$0xff] %v3288_v19  ;;  %v359_v24 = vrot.slane %v2852_v4, %v2812_v46  ;;  %v3310_v40 = vld [vmem:[%s5274_s0 + $0x238] sm:$0xff]  ;;  %v376_v38 = vrot.slane %v2852_v4, %v2816_v48 }
 0x120   : > { %5582 = vst [vmem:[#allocation66_spill] sm:$0xff] %v3293_v14  ;;  %5583 = vst [vmem:[#allocation67_spill] sm:$0xff] %v3300_v37  ;;  %v393_v27 = vrot.slane %v2852_v4, %v2818_v49  ;;  %v410_v45 = vrot.slane %v2852_v4, %v2820_v50  ;;  %v347_v22 = vadd.f32 %v343_v36, %v330_v25  ;;  %v3330_v36 = vld [vmem:[%s5274_s0 + $0x248] sm:$0xff] }
 0x121   : > { %5584 = vst [vmem:[#allocation68_spill] sm:$0xff] %v3305_v23  ;;  %5585 = vst [vmem:[#allocation69_spill] sm:$0xff] %v3310_v40  ;;  %v348_v54 = vadd.f32 %v344_v34, %v331_v47  ;;  %v349_v9 = vadd.f32 %v345_v26, %v332_v53  ;;  %v350_v39 = vadd.f32 %v346_v12, %v333_v42  ;;  %v3335_v12 = vld [vmem:[%s5274_s0 + $0x250] sm:$0xff]  ;;  %v3340_v26 = vld [vmem:[%s5274_s0 + $0x258] sm:$0xff] }
 0x122   : > { %5586 = vst [vmem:[#allocation70_spill] sm:$0xff] %v3321_v28  ;;  %v360_v15 = vmul.f32 %v3273_v43, %v359_v24  ;;  %v361_v52 = vmul.f32 %v3278_v31, %v359_v24  ;;  %v362_v33 = vmul.f32 %v3283_v32, %v359_v24  ;;  %v363_v51 = vmul.f32 %v3288_v19, %v359_v24  ;;  %v3349_v42 = vld [vmem:[%s5274_s0 + $0x260] sm:$0xff]  ;;  %v3354_v43 = vld [vmem:[%s5274_s0 + $0x268] sm:$0xff] }
 0x123   : > { %5587 = vst [vmem:[#allocation71_spill] sm:$0xff] %v3330_v36  ;;  %5588 = vst [vmem:[#allocation72_spill] sm:$0xff] %v3335_v12  ;;  %v377_v34 = vmul.f32 %v3293_v14, %v376_v38  ;;  %v378_v25 = vmul.f32 %v3300_v37, %v376_v38  ;;  %v379_v47 = vmul.f32 %v3305_v23, %v376_v38  ;;  %v3359_v23 = vld [vmem:[%s5274_s0 + $0x270] sm:$0xff] }
 0x124   : > { %5589 = vst [vmem:[#allocation73_spill] sm:$0xff] %v3340_v26  ;;  %v380_v53 = vmul.f32 %v3310_v40, %v376_v38  ;;  %5590 = vst [vmem:[#allocation74_spill] sm:$0xff] %v3349_v42  ;;  %v364_v24 = vadd.f32 %v360_v15, %v347_v22  ;;  %v365_v19 = vadd.f32 %v361_v52, %v348_v54  ;;  %v3364_v38 = vld [vmem:[%s5274_s0 + $0x278] sm:$0xff] }
 0x125   : > { %v366_v32 = vadd.f32 %v362_v33, %v349_v9  ;;  %v367_v31 = vadd.f32 %v363_v51, %v350_v39  ;;  %5591 = vst [vmem:[#allocation75_spill] sm:$0xff] %v3354_v43  ;;  %5592 = vst [vmem:[#allocation76_spill] sm:$0xff] %v3359_v23  ;;  %v394_v15 = vmul.f32 %v3321_v28, %v393_v27 }
 0x126   : > { %5593 = vst [vmem:[#allocation77_spill] sm:$0xff] %v3364_v38  ;;  %v395_v33 = vmul.f32 %v3330_v36, %v393_v27  ;;  %v396_v51 = vmul.f32 %v3335_v12, %v393_v27  ;;  %v397_v52 = vmul.f32 %v3340_v26, %v393_v27  ;;  %v381_v39 = vadd.f32 %v377_v34, %v364_v24  ;;  %v3377_v36 = vld [vmem:[%s5274_s0 + $0x280] sm:$0xff]  ;;  %v3382_v27 = vld [vmem:[%s5274_s0 + $0x288] sm:$0xff] }
 0x127   : > { %v382_v22 = vadd.f32 %v378_v25, %v365_v19  ;;  %v383_v54 = vadd.f32 %v379_v47, %v366_v32  ;;  %v384_v9 = vadd.f32 %v380_v53, %v367_v31  ;;  %v411_v40 = vmul.f32 %v3349_v42, %v410_v45  ;;  %5594 = vst [vmem:[#allocation78_spill] sm:$0xff] %v3377_v36  ;;  %v3387_v25 = vld [vmem:[%s5274_s0 + $0x290] sm:$0xff]  ;;  %v3397_v47 = vld [vmem:[%s5274_s0 + $0x2a0] sm:$0xff]  ;;  %v3404_v24 = vld [vmem:[%s5274_s0 + $0x2a8] sm:$0xff] }
 0x128   : > { %v412_v37 = vmul.f32 %v3354_v43, %v410_v45  ;;  %v413_v14 = vmul.f32 %v3359_v23, %v410_v45  ;;  %v414_v41 = vmul.f32 %v3364_v38, %v410_v45  ;;  %5595 = vst [vmem:[#allocation79_spill] sm:$0xff] %v3382_v27  ;;  %v398_v32 = vadd.f32 %v394_v15, %v381_v39  ;;  %v3392_v45 = vld [vmem:[%s5274_s0 + $0x298] sm:$0xff]  ;;  %v3409_v15 = vld [vmem:[%s5274_s0 + $0x2b0] sm:$0xff]  ;;  %v3425_v23 = vld [vmem:[%s5274_s0 + $0x2c0] sm:$0xff] }
 0x129   : > { %v399_v31 = vadd.f32 %v395_v33, %v382_v22  ;;  %v400_v19 = vadd.f32 %v396_v51, %v383_v54  ;;  %v401_v34 = vadd.f32 %v397_v52, %v384_v9  ;;  %5596 = vst [vmem:[#allocation80_spill] sm:$0xff] %v3387_v25  ;;  %5597 = vst [vmem:[#allocation81_spill] sm:$0xff] %v3392_v45  ;;  %v3414_v33 = vld [vmem:[%s5274_s0 + $0x2b8] sm:$0xff] }
 0x12a   : > { %5598 = vst [vmem:[#allocation82_spill] sm:$0xff] %v3397_v47  ;;  %v427_v53 = vrot.slane %v2852_v4, %v2822_v55  ;;  %5599 = vst [vmem:[#allocation83_spill] sm:$0xff] %v3404_v24  ;;  %v444_v51 = vrot.slane %v2852_v4, %v2824_v56  ;;  %v461_v52 = vrot.slane %v2852_v4, %v2826_v57 }
 0x12b   : > { %5600 = vst [vmem:[#allocation84_spill] sm:$0xff] %v3409_v15  ;;  %5601 = vst [vmem:[#allocation85_spill] sm:$0xff] %v3414_v33  ;;  %v478_v39 = vrot.slane %v2852_v4, %v2828_v58  ;;  %v415_v22 = vadd.f32 %v411_v40, %v398_v32  ;;  %v416_v54 = vadd.f32 %v412_v37, %v399_v31  ;;  %v3434_v40 = vld [vmem:[%s5274_s0 + $0x2c8] sm:$0xff] }
 0x12c   : > { %v417_v9 = vadd.f32 %v413_v14, %v400_v19  ;;  %v418_v38 = vadd.f32 %v414_v41, %v401_v34  ;;  %5602 = vst [vmem:[#allocation86_spill] sm:$0xff] %v3425_v23  ;;  %v428_v43 = vmul.f32 %v3377_v36, %v427_v53  ;;  %v429_v42 = vmul.f32 %v3382_v27, %v427_v53  ;;  %v3439_v41 = vld [vmem:[%s5274_s0 + $0x2d0] sm:$0xff]  ;;  %v3444_v14 = vld [vmem:[%s5274_s0 + $0x2d8] sm:$0xff]  ;;  %v3453_v34 = vld [vmem:[%s5274_s0 + $0x2e0] sm:$0xff] }
 0x12d   : > { %v430_v26 = vmul.f32 %v3387_v25, %v427_v53  ;;  %v431_v12 = vmul.f32 %v3392_v45, %v427_v53  ;;  %5603 = vst [vmem:[#allocation87_spill] sm:$0xff] %v3434_v40  ;;  %5604 = vst [vmem:[#allocation88_spill] sm:$0xff] %v3439_v41  ;;  %v445_v37 = vmul.f32 %v3397_v47, %v444_v51  ;;  %v3458_v36 = vld [vmem:[%s5274_s0 + $0x2e8] sm:$0xff] }
 0x12e   : > { %5605 = vst [vmem:[#allocation89_spill] sm:$0xff] %v3444_v14  ;;  %v446_v32 = vmul.f32 %v3404_v24, %v444_v51  ;;  %v447_v31 = vmul.f32 %v3409_v15, %v444_v51  ;;  %v448_v19 = vmul.f32 %v3414_v33, %v444_v51  ;;  %5606 = vst [vmem:[#allocation90_spill] sm:$0xff] %v3453_v34  ;;  %v3463_v15 = vld [vmem:[%s5274_s0 + $0x2f0] sm:$0xff]  ;;  %v3468_v51 = vld [vmem:[%s5274_s0 + $0x2f8] sm:$0xff] }
 0x12f   : > { %v432_v53 = vadd.f32 %v428_v43, %v415_v22  ;;  %v433_v45 = vadd.f32 %v429_v42, %v416_v54  ;;  %v434_v25 = vadd.f32 %v430_v26, %v417_v9  ;;  %v435_v27 = vadd.f32 %v431_v12, %v418_v38  ;;  %5607 = vst [vmem:[#allocation91_spill] sm:$0xff] %v3458_v36 }
 0x130   : > { %5608 = vst [vmem:[#allocation92_spill] sm:$0xff] %v3463_v15  ;;  %5609 = vst [vmem:[#allocation93_spill] sm:$0xff] %v3468_v51  ;;  %v462_v43 = vmul.f32 %v3425_v23, %v461_v52  ;;  %v463_v26 = vmul.f32 %v3434_v40, %v461_v52  ;;  %v464_v12 = vmul.f32 %v3439_v41, %v461_v52  ;;  %v3481_v40 = vld [vmem:[%s5274_s0 + $0x300] sm:$0xff] }
 0x131   : > { %v465_v42 = vmul.f32 %v3444_v14, %v461_v52  ;;  %v449_v38 = vadd.f32 %v445_v37, %v432_v53  ;;  %v450_v22 = vadd.f32 %v446_v32, %v433_v45  ;;  %v451_v54 = vadd.f32 %v447_v31, %v434_v25  ;;  %5610 = vst [vmem:[#allocation94_spill] sm:$0xff] %v3481_v40  ;;  %v3486_v52 = vld [vmem:[%s5274_s0 + $0x308] sm:$0xff]  ;;  %v3491_v32 = vld [vmem:[%s5274_s0 + $0x310] sm:$0xff]  ;;  %v3501_v31 = vld [vmem:[%s5274_s0 + $0x320] sm:$0xff] }
 0x132   : > { %v452_v9 = vadd.f32 %v448_v19, %v435_v27  ;;  %v479_v33 = vmul.f32 %v3453_v34, %v478_v39  ;;  %v480_v24 = vmul.f32 %v3458_v36, %v478_v39  ;;  %v481_v47 = vmul.f32 %v3463_v15, %v478_v39  ;;  %5611 = vst [vmem:[#allocation95_spill] sm:$0xff] %v3486_v52  ;;  %v3508_v53 = vld [vmem:[%s5274_s0 + $0x328] sm:$0xff]  ;;  %v3529_v15 = vld [vmem:[%s5274_s0 + $0x340] sm:$0xff] }
 0x133   : > { %v482_v28 = vmul.f32 %v3468_v51, %v478_v39  ;;  %v466_v25 = vadd.f32 %v462_v43, %v449_v38  ;;  %v467_v27 = vadd.f32 %v463_v26, %v450_v22  ;;  %v468_v45 = vadd.f32 %v464_v12, %v451_v54  ;;  %5612 = vst [vmem:[#allocation96_spill] sm:$0xff] %v3491_v32  ;;  %v3496_v39 = vld [vmem:[%s5274_s0 + $0x318] sm:$0xff]  ;;  %v3513_v43 = vld [vmem:[%s5274_s0 + $0x330] sm:$0xff] }
 0x134   : > { %v469_v37 = vadd.f32 %v465_v42, %v452_v9  ;;  %5613 = vst [vmem:[#allocation97_spill] sm:$0xff] %v3496_v39  ;;  %5614 = vst [vmem:[#allocation98_spill] sm:$0xff] %v3501_v31  ;;  %v495_v19 = vrot.slane %v2855_v5, %v2812_v46  ;;  %v3518_v26 = vld [vmem:[%s5274_s0 + $0x338] sm:$0xff]  ;;  %v512_v12 = vrot.slane %v2855_v5, %v2816_v48 }
 0x135   : > { %5615 = vst [vmem:[#allocation99_spill] sm:$0xff] %v3508_v53  ;;  %5616 = vst [vmem:[#allocation100_spill] sm:$0xff] %v3513_v43  ;;  %v529_v42 = vrot.slane %v2855_v5, %v2818_v49  ;;  %v546_v38 = vrot.slane %v2855_v5, %v2820_v50  ;;  %v483_v22 = vadd.f32 %v479_v33, %v466_v25  ;;  %v3538_v33 = vld [vmem:[%s5274_s0 + $0x348] sm:$0xff] }
 0x136   : > { %5617 = vst [vmem:[#allocation101_spill] sm:$0xff] %v3518_v26  ;;  %v484_v54 = vadd.f32 %v480_v24, %v467_v27  ;;  %v485_v9 = vadd.f32 %v481_v47, %v468_v45  ;;  %v486_v51 = vadd.f32 %v482_v28, %v469_v37  ;;  %5618 = vst [vmem:[#allocation102_spill] sm:$0xff] %v3529_v15  ;;  %v3543_v28 = vld [vmem:[%s5274_s0 + $0x350] sm:$0xff]  ;;  %v3548_v47 = vld [vmem:[%s5274_s0 + $0x358] sm:$0xff] }
 0x137   : > { %v496_v36 = vmul.f32 %v3481_v40, %v495_v19  ;;  %v497_v34 = vmul.f32 %v3486_v52, %v495_v19  ;;  %v498_v14 = vmul.f32 %v3491_v32, %v495_v19  ;;  %v499_v41 = vmul.f32 %v3496_v39, %v495_v19  ;;  %5619 = vst [vmem:[#allocation103_spill] sm:$0xff] %v3538_v33  ;;  %v3557_v37 = vld [vmem:[%s5274_s0 + $0x360] sm:$0xff]  ;;  %v3562_v40 = vld [vmem:[%s5274_s0 + $0x368] sm:$0xff] }
 0x138   : > { %5620 = vst [vmem:[#allocation104_spill] sm:$0xff] %v3543_v28  ;;  %5621 = vst [vmem:[#allocation105_spill] sm:$0xff] %v3548_v47  ;;  %v513_v24 = vmul.f32 %v3501_v31, %v512_v12  ;;  %v514_v25 = vmul.f32 %v3508_v53, %v512_v12  ;;  %v515_v27 = vmul.f32 %v3513_v43, %v512_v12  ;;  %v3567_v43 = vld [vmem:[%s5274_s0 + $0x370] sm:$0xff] }
 0x139   : > { %v516_v45 = vmul.f32 %v3518_v26, %v512_v12  ;;  %5622 = vst [vmem:[#allocation106_spill] sm:$0xff] %v3557_v37  ;;  %v500_v19 = vadd.f32 %v496_v36, %v483_v22  ;;  %v501_v39 = vadd.f32 %v497_v34, %v484_v54  ;;  %v502_v32 = vadd.f32 %v498_v14, %v485_v9  ;;  %v3572_v12 = vld [vmem:[%s5274_s0 + $0x378] sm:$0xff] }
 0x13a   : > { %v503_v52 = vadd.f32 %v499_v41, %v486_v51  ;;  %5623 = vst [vmem:[#allocation107_spill] sm:$0xff] %v3562_v40  ;;  %5624 = vst [vmem:[#allocation108_spill] sm:$0xff] %v3567_v43  ;;  %v530_v36 = vmul.f32 %v3529_v15, %v529_v42  ;;  %v531_v14 = vmul.f32 %v3538_v33, %v529_v42  ;;  %v3585_v33 = vld [vmem:[%s5274_s0 + $0x380] sm:$0xff] }
 0x13b   : > { %5625 = vst [vmem:[#allocation109_spill] sm:$0xff] %v3572_v12  ;;  %v532_v41 = vmul.f32 %v3543_v28, %v529_v42  ;;  %v533_v34 = vmul.f32 %v3548_v47, %v529_v42  ;;  %v517_v51 = vadd.f32 %v513_v24, %v500_v19  ;;  %v518_v22 = vadd.f32 %v514_v25, %v501_v39  ;;  %v3590_v42 = vld [vmem:[%s5274_s0 + $0x388] sm:$0xff]  ;;  %v3595_v25 = vld [vmem:[%s5274_s0 + $0x390] sm:$0xff] }
 0x13c   : > { %v519_v54 = vadd.f32 %v515_v27, %v502_v32  ;;  %v520_v9 = vadd.f32 %v516_v45, %v503_v52  ;;  %v547_v26 = vmul.f32 %v3557_v37, %v546_v38  ;;  %v548_v53 = vmul.f32 %v3562_v40, %v546_v38  ;;  %5626 = vst [vmem:[#allocation110_spill] sm:$0xff] %v3585_v33  ;;  %v3605_v27 = vld [vmem:[%s5274_s0 + $0x3a0] sm:$0xff]  ;;  %v3612_v19 = vld [vmem:[%s5274_s0 + $0x3a8] sm:$0xff] }
 0x13d   : > { %v549_v31 = vmul.f32 %v3567_v43, %v546_v38  ;;  %v550_v23 = vmul.f32 %v3572_v12, %v546_v38  ;;  %5627 = vst [vmem:[#allocation111_spill] sm:$0xff] %v3590_v42  ;;  %v534_v32 = vadd.f32 %v530_v36, %v517_v51  ;;  %v535_v52 = vadd.f32 %v531_v14, %v518_v22  ;;  %v3600_v38 = vld [vmem:[%s5274_s0 + $0x398] sm:$0xff]  ;;  %v3617_v36 = vld [vmem:[%s5274_s0 + $0x3b0] sm:$0xff]  ;;  %v3633_v43 = vld [vmem:[%s5274_s0 + $0x3c0] sm:$0xff] }
 0x13e   : > { %v536_v39 = vadd.f32 %v532_v41, %v519_v54  ;;  %v537_v24 = vadd.f32 %v533_v34, %v520_v9  ;;  %5628 = vst [vmem:[#allocation112_spill] sm:$0xff] %v3595_v25  ;;  %5629 = vst [vmem:[#allocation113_spill] sm:$0xff] %v3600_v38  ;;  %v563_v45 = vrot.slane %v2855_v5, %v2822_v55  ;;  %v3622_v14 = vld [vmem:[%s5274_s0 + $0x3b8] sm:$0xff] }
 0x13f   : > { %5630 = vst [vmem:[#allocation114_spill] sm:$0xff] %v3605_v27  ;;  %5631 = vst [vmem:[#allocation115_spill] sm:$0xff] %v3612_v19  ;;  %v580_v41 = vrot.slane %v2855_v5, %v2824_v56  ;;  %v597_v34 = vrot.slane %v2855_v5, %v2826_v57  ;;  %v614_v51 = vrot.slane %v2855_v5, %v2828_v58 }
 0x140   : > { %5632 = vst [vmem:[#allocation116_spill] sm:$0xff] %v3617_v36  ;;  %5633 = vst [vmem:[#allocation117_spill] sm:$0xff] %v3622_v14  ;;  %v551_v22 = vadd.f32 %v547_v26, %v534_v32  ;;  %v552_v54 = vadd.f32 %v548_v53, %v535_v52  ;;  %v553_v9 = vadd.f32 %v549_v31, %v536_v39  ;;  %v3642_v26 = vld [vmem:[%s5274_s0 + $0x3c8] sm:$0xff]  ;;  %v3652_v31 = vld [vmem:[%s5274_s0 + $0x3d8] sm:$0xff] }
 0x141   : > { %v554_v12 = vadd.f32 %v550_v23, %v537_v24  ;;  %5634 = vst [vmem:[#allocation118_spill] sm:$0xff] %v3633_v43  ;;  %v564_v40 = vmul.f32 %v3585_v33, %v563_v45  ;;  %v565_v37 = vmul.f32 %v3590_v42, %v563_v45  ;;  %v566_v47 = vmul.f32 %v3595_v25, %v563_v45  ;;  %v3647_v23 = vld [vmem:[%s5274_s0 + $0x3d0] sm:$0xff]  ;;  %v3661_v24 = vld [vmem:[%s5274_s0 + $0x3e0] sm:$0xff]  ;;  %v3666_v33 = vld [vmem:[%s5274_s0 + $0x3e8] sm:$0xff] }
 0x142   : > { %v567_v28 = vmul.f32 %v3600_v38, %v563_v45  ;;  %5635 = vst [vmem:[#allocation119_spill] sm:$0xff] %v3642_v26  ;;  %5636 = vst [vmem:[#allocation120_spill] sm:$0xff] %v3647_v23  ;;  %v581_v53 = vmul.f32 %v3605_v27, %v580_v41  ;;  %v582_v32 = vmul.f32 %v3612_v19, %v580_v41 }
 0x143   : > { %v583_v52 = vmul.f32 %v3617_v36, %v580_v41  ;;  %v584_v39 = vmul.f32 %v3622_v14, %v580_v41  ;;  %v568_v45 = vadd.f32 %v564_v40, %v551_v22  ;;  %v569_v38 = vadd.f32 %v565_v37, %v552_v54  ;;  %v3671_v36 = vld [vmem:[%s5274_s0 + $0x3f0] sm:$0xff]  ;;  %v3676_v41 = vld [vmem:[%s5274_s0 + $0x3f8] sm:$0xff] }
 0x144   : > { %v570_v25 = vadd.f32 %v566_v47, %v553_v9  ;;  %v571_v42 = vadd.f32 %v567_v28, %v554_v12  ;;  %v598_v40 = vmul.f32 %v3633_v43, %v597_v34  ;;  %v599_v47 = vmul.f32 %v3642_v26, %v597_v34 }
 0x145   : > { %v600_v28 = vmul.f32 %v3647_v23, %v597_v34  ;;  %v601_v37 = vmul.f32 %v3652_v31, %v597_v34  ;;  %v585_v12 = vadd.f32 %v581_v53, %v568_v45  ;;  %v586_v22 = vadd.f32 %v582_v32, %v569_v38 }
 0x146   : > { %v587_v54 = vadd.f32 %v583_v52, %v570_v25  ;;  %v588_v9 = vadd.f32 %v584_v39, %v571_v42  ;;  %v615_v14 = vmul.f32 %v3661_v24, %v614_v51  ;;  %v616_v19 = vmul.f32 %v3666_v33, %v614_v51 }
 0x147   : > { %v617_v27 = vmul.f32 %v3671_v36, %v614_v51  ;;  %v618_v15 = vmul.f32 %v3676_v41, %v614_v51  ;;  %v602_v35 = vadd.f32 %v598_v40, %v585_v12  ;;  %v603_v43 = vadd.f32 %v599_v47, %v586_v22 }
 0x148   : > { %v604_v29 = vadd.f32 %v600_v28, %v587_v54  ;;  %v605_v26 = vadd.f32 %v601_v37, %v588_v9 }
 0x149   : > { %v619_v18 = vadd.f32 %v615_v14, %v602_v35  ;;  %v620_v23 = vadd.f32 %v616_v19, %v603_v43 }
 0x14a   : > { %v621_v17 = vadd.f32 %v617_v27, %v604_v29  ;;  %v622_v34 = vadd.f32 %v618_v15, %v605_v26 }
 0x14b   : > { %v623_v38 = vmul.f32 %v619_v18, %v2831_v59  ;;  %v624_v42 = vmul.f32 %v620_v23, %v2849_v63 }
 0x14c   : > { %v625_v25 = vmul.f32 %v621_v17, %v2852_v4  ;;  %v626_v53 = vmul.f32 %v622_v34, %v2855_v5 }
 0x14d   : > { %v627_v32 = vsel %vm19_vm0, %v623_v38, 0.0  ;;  %v628_v51 = vsel %vm19_vm0, %v624_v42, 0.0 }
 0x14e   : > { %v630_v52 = vsel %vm19_vm0, %v625_v25, 0.0  ;;  %v629_v39 = vadd.f32 %v628_v51, %v627_v32  ;;  %v632_v35 = vsel %vm19_vm0, %v626_v53, 0.0 }
 0x150   : > { %v631_v43 = vadd.f32 %v630_v52, %v629_v39 }
 0x152   : > { %v633_v29 = vadd.f32 %v632_v35, %v631_v43 }
 0x154   : > { %v634_v15 = vrot.slane %v633_v29, 4 }
 0x156   : > { %v635_v27 = vadd.f32 %v634_v15, %v633_v29 }
 0x158   : > { %v636_v19 = vrot.slane %v635_v27, 2 }
 0x15a   : > { %v637_v14 = vadd.f32 %v636_v19, %v635_v27 }
 0x15c   : > { %v638_v26 = vrot.slane %v637_v14, 1 }
 0x15e   : > { %v639_v45 = vadd.f32 %v638_v26, %v637_v14 }
 0x160   : > { %vm640_vm7 = vcmp.ne.f32.partialorder %v639_v45, 0.0 }
 0x161   : > { %v641_v40 = vsel %vm640_vm7, %v639_v45, 1.0 }
 0x162   : > { %2391 = vrcp.f32 %v641_v40 }
 0x16f   : > { %v2392_v47 = vpop.eup %2391 }
 0x170   : > { %v643_v28 = vmul.f32 %v2611_v30, %v2392_v47 }
 0x172   : > { %v3697_v37 = vsel %vm2807_vm6, 0.0, %v643_v28 }
 0x173   : > { %v653_v12 = vmul.f32 %v3697_v37, %v619_v18  ;;  %v654_v22 = vmul.f32 %v3697_v37, %v620_v23  ;;  %v655_v54 = vmul.f32 %v3697_v37, %v621_v17  ;;  %v656_v9 = vmul.f32 %v3697_v37, %v622_v34 }
 0x174   : > { %v681_v34 = vsel %vm680_vm8, %v2611_v30, 1.0 }
 0x175   : > { %v3704_v38 = vsub.f32 %v2647_v0, %v653_v12  ;;  %v3707_v42 = vsub.f32 %v2643_v1, %v654_v22  ;;  %v3710_v25 = vsub.f32 %v2639_v2, %v655_v54  ;;  %v3713_v44 = vsub.f32 %v2635_v3, %v656_v9 }
 0x176   : > { %2393 = vrcp.f32 %v681_v34 }
 0x177   : > { %5637 = vst [vmem:[#allocation121_spill] sm:$0xff] %v3710_v25  ;;  %5638 = vst [vmem:[#allocation122_spill] sm:$0xff] %v3713_v44  ;;  %v661_v18 = vmul.f32 %v3704_v38, %v3704_v38  ;;  %v662_v17 = vmul.f32 %v3707_v42, %v3707_v42  ;;  %v663_v0 = vmul.f32 %v3710_v25, %v3710_v25 }
 0x178   : > { %v664_v1 = vmul.f32 %v3713_v44, %v3713_v44 }
 0x179   : > { %v665_v2 = vsel %vm19_vm0, %v661_v18, 0.0  ;;  %v666_v23 = vsel %vm19_vm0, %v662_v17, 0.0  ;;  %v668_v3 = vsel %vm19_vm0, %v663_v0, 0.0 }
 0x17a   : > { %v667_v53 = vadd.f32 %v666_v23, %v665_v2  ;;  %v670_v32 = vsel %vm19_vm0, %v664_v1, 0.0 }
 0x17c   : > { %v669_v51 = vadd.f32 %v668_v3, %v667_v53 }
 0x17e   : > { %v671_v52 = vadd.f32 %v670_v32, %v669_v51 }
 0x180   : > { %v672_v39 = vrot.slane %v671_v52, 4 }
 0x182   : > { %v673_v35 = vadd.f32 %v672_v39, %v671_v52 }
 0x183   : > { %v2394_v27 = vpop.eup %2393 }
 0x184   : > { %v674_v43 = vrot.slane %v673_v35, 2 }
 0x186   : > { %v675_v29 = vadd.f32 %v674_v43, %v673_v35 }
 0x188   : > { %v676_v15 = vrot.slane %v675_v29, 1 }
 0x18a   : > { %v3729_v19 = vadd.f32 %v676_v15, %v675_v29 }
 0x18c   : > { %vm678_vm9 = vcmp.lt.f32.partialorder %v3729_v19, %v5516_v21  ;;  %v683_v14 = vmul.f32 %v2394_v27, %v3729_v19  ;;  %vm1134_vm12 = vcmp.gt.f32.partialorder %v3729_v19, 0.0 }
 0x18d   : > { %vm3736_vm10 = vmor %vm678_vm9, %vm34_vm1 }
 0x18e   : > { %v684_v26 = vsel %vm3736_vm10, 0.0, %v683_v14  ;;  %v5641_v14 = vld [vmem:[#allocation8_spill] sm:$0xff] }
 0x18f   : > { %v685_v45 = vmul.f32 %v684_v26, %v2831_v59  ;;  %v686_v40 = vmul.f32 %v684_v26, %v2849_v63  ;;  %v687_v47 = vmul.f32 %v684_v26, %v2852_v4  ;;  %v688_v28 = vmul.f32 %v684_v26, %v2855_v5  ;;  %v5642_v26 = vld [vmem:[#allocation9_spill] sm:$0xff] }
 0x191   : > { %v3747_v12 = vadd.f32 %v685_v45, %v3704_v38  ;;  %v3750_v22 = vadd.f32 %v686_v40, %v3707_v42  ;;  %v3753_v54 = vadd.f32 %v687_v47, %v3710_v25  ;;  %v3756_v9 = vadd.f32 %v688_v28, %v3713_v44  ;;  %v5643_v47 = vld [vmem:[#allocation10_spill] sm:$0xff]  ;;  %v5644_v28 = vld [vmem:[#allocation11_spill] sm:$0xff] }
 0x192   : > { %v5647_v44 = vld [vmem:[#allocation14_spill] sm:$0xff]  ;;  %v5648_v25 = vld [vmem:[#allocation15_spill] sm:$0xff] }
 0x193   : > { %v696_v18 = vrot.slane %v3747_v12, %v2812_v46  ;;  %v708_v17 = vrot.slane %v3747_v12, %v2816_v48  ;;  %v720_v0 = vrot.slane %v3747_v12, %v2818_v49  ;;  %v732_v1 = vrot.slane %v3747_v12, %v2820_v50 }
 0x194   : > { %v744_v2 = vrot.slane %v3747_v12, %v2822_v55  ;;  %v756_v23 = vrot.slane %v3747_v12, %v2824_v56  ;;  %v768_v3 = vrot.slane %v3747_v12, %v2826_v57  ;;  %v780_v34 = vrot.slane %v3747_v12, %v2828_v58 }
 0x195   : > { %v697_v53 = vmul.f32 %v696_v18, %v2836_v60  ;;  %v698_v32 = vmul.f32 %v696_v18, %v2841_v61  ;;  %v699_v51 = vmul.f32 %v696_v18, %v2846_v62  ;;  %v700_v52 = vmul.f32 %v696_v18, %v2860_v6  ;;  %v5645_v18 = vld [vmem:[#allocation12_spill] sm:$0xff] }
 0x196   : > { %v709_v39 = vmul.f32 %v2865_v7, %v708_v17  ;;  %v710_v35 = vmul.f32 %v2870_v8, %v708_v17  ;;  %v711_v43 = vmul.f32 %v2877_v10, %v708_v17  ;;  %v712_v29 = vmul.f32 %v2882_v11, %v708_v17 }
 0x197   : > { %v721_v15 = vmul.f32 %v2889_v13, %v720_v0  ;;  %v722_v27 = vmul.f32 %v2898_v16, %v720_v0  ;;  %v723_v60 = vmul.f32 %v5641_v14, %v720_v0  ;;  %v724_v61 = vmul.f32 %v5642_v26, %v720_v0  ;;  %v5651_v26 = vld [vmem:[#allocation18_spill] sm:$0xff] }
 0x198   : > { %v713_v45 = vadd.f32 %v709_v39, %v697_v53  ;;  %v714_v62 = vadd.f32 %v710_v35, %v698_v32  ;;  %v715_v40 = vadd.f32 %v711_v43, %v699_v51  ;;  %v716_v6 = vadd.f32 %v712_v29, %v700_v52  ;;  %v5649_v53 = vld [vmem:[#allocation16_spill] sm:$0xff]  ;;  %v5650_v51 = vld [vmem:[#allocation17_spill] sm:$0xff] }
 0x199   : > { %v733_v7 = vmul.f32 %v5643_v47, %v732_v1  ;;  %v734_v8 = vmul.f32 %v5644_v28, %v732_v1  ;;  %v735_v10 = vmul.f32 %v5645_v18, %v732_v1  ;;  %v736_v11 = vmul.f32 %v5646_v20, %v732_v1  ;;  %v5652_v28 = vld [vmem:[#allocation19_spill] sm:$0xff]  ;;  %v5653_v1 = vld [vmem:[#allocation20_spill] sm:$0xff] }
 0x19a   : > { %v725_v17 = vadd.f32 %v721_v15, %v713_v45  ;;  %v726_v13 = vadd.f32 %v722_v27, %v714_v62  ;;  %v727_v21 = vadd.f32 %v723_v60, %v715_v40  ;;  %v728_v16 = vadd.f32 %v724_v61, %v716_v6  ;;  %v5654_v27 = vld [vmem:[#allocation21_spill] sm:$0xff]  ;;  %v5655_v62 = vld [vmem:[#allocation22_spill] sm:$0xff]  ;;  %v5656_v6 = vld [vmem:[#allocation23_spill] sm:$0xff] }
 0x19b   : > { %v745_v14 = vmul.f32 %v5647_v44, %v744_v2  ;;  %v746_v0 = vmul.f32 %v5648_v25, %v744_v2  ;;  %v747_v32 = vmul.f32 %v5649_v53, %v744_v2  ;;  %v748_v52 = vmul.f32 %v5650_v51, %v744_v2  ;;  %v5660_v51 = vld [vmem:[#allocation27_spill] sm:$0xff] }
 0x19c   : > { %v737_v39 = vadd.f32 %v733_v7, %v725_v17  ;;  %v738_v35 = vadd.f32 %v734_v8, %v726_v13  ;;  %v739_v43 = vadd.f32 %v735_v10, %v727_v21  ;;  %v740_v29 = vadd.f32 %v736_v11, %v728_v16  ;;  %v5657_v7 = vld [vmem:[#allocation24_spill] sm:$0xff]  ;;  %v5658_v21 = vld [vmem:[#allocation25_spill] sm:$0xff]  ;;  %v5659_v16 = vld [vmem:[#allocation26_spill] sm:$0xff] }
 0x19d   : > { %v757_v47 = vmul.f32 %v5651_v26, %v756_v23  ;;  %v758_v20 = vmul.f32 %v5652_v28, %v756_v23  ;;  %v759_v15 = vmul.f32 %v5653_v1, %v756_v23  ;;  %v760_v60 = vmul.f32 %v5654_v27, %v756_v23  ;;  %v5663_v27 = vld [vmem:[#allocation30_spill] sm:$0xff] }
 0x19e   : > { %v749_v61 = vadd.f32 %v745_v14, %v737_v39  ;;  %v750_v44 = vadd.f32 %v746_v0, %v738_v35  ;;  %v751_v45 = vadd.f32 %v747_v32, %v739_v43  ;;  %v752_v25 = vadd.f32 %v748_v52, %v740_v29  ;;  %v5661_v14 = vld [vmem:[#allocation28_spill] sm:$0xff]  ;;  %v5662_v32 = vld [vmem:[#allocation29_spill] sm:$0xff] }
 0x19f   : > { %v769_v40 = vmul.f32 %v5655_v62, %v768_v3  ;;  %v770_v2 = vmul.f32 %v5656_v6, %v768_v3  ;;  %v771_v8 = vmul.f32 %v5657_v7, %v768_v3  ;;  %v772_v18 = vmul.f32 %v5658_v21, %v768_v3  ;;  %v5666_v62 = vld [vmem:[#allocation33_spill] sm:$0xff]  ;;  %v5667_v6 = vld [vmem:[#allocation34_spill] sm:$0xff]  ;;  %v5668_v7 = vld [vmem:[#allocation35_spill] sm:$0xff] }
 0x1a0   : > { %v761_v10 = vadd.f32 %v757_v47, %v749_v61  ;;  %v762_v11 = vadd.f32 %v758_v20, %v750_v44  ;;  %v763_v17 = vadd.f32 %v759_v15, %v751_v45  ;;  %v764_v13 = vadd.f32 %v760_v60, %v752_v25  ;;  %v5664_v61 = vld [vmem:[#allocation31_spill] sm:$0xff]  ;;  %v5665_v45 = vld [vmem:[#allocation32_spill] sm:$0xff] }
 0x1a1   : > { %v781_v53 = vmul.f32 %v5659_v16, %v780_v34  ;;  %v782_v23 = vmul.f32 %v5660_v51, %v780_v34  ;;  %v783_v0 = vmul.f32 %v5661_v14, %v780_v34  ;;  %v784_v52 = vmul.f32 %v5662_v32, %v780_v34  ;;  %v5669_v21 = vld [vmem:[#allocation36_spill] sm:$0xff]  ;;  %v5671_v51 = vld [vmem:[#allocation38_spill] sm:$0xff]  ;;  %v5672_v14 = vld [vmem:[#allocation39_spill] sm:$0xff] }
 0x1a2   : > { %v773_v39 = vadd.f32 %v769_v40, %v761_v10  ;;  %v774_v35 = vadd.f32 %v770_v2, %v762_v11  ;;  %v775_v43 = vadd.f32 %v771_v8, %v763_v17  ;;  %v776_v29 = vadd.f32 %v772_v18, %v764_v13  ;;  %v5670_v10 = vld [vmem:[#allocation37_spill] sm:$0xff]  ;;  %v5673_v32 = vld [vmem:[#allocation40_spill] sm:$0xff] }
 0x1a3   : > { %v792_v26 = vrot.slane %v3750_v22, %v2812_v46  ;;  %v804_v3 = vrot.slane %v3750_v22, %v2816_v48  ;;  %v816_v47 = vrot.slane %v3750_v22, %v2818_v49  ;;  %v828_v28 = vrot.slane %v3750_v22, %v2820_v50 }
 0x1a4   : > { %v785_v20 = vadd.f32 %v781_v53, %v773_v39  ;;  %v786_v1 = vadd.f32 %v782_v23, %v774_v35  ;;  %v787_v15 = vadd.f32 %v783_v0, %v775_v43  ;;  %v788_v34 = vadd.f32 %v784_v52, %v776_v29  ;;  %v5674_v39 = vld [vmem:[#allocation41_spill] sm:$0xff] }
 0x1a5   : > { %v793_v60 = vmul.f32 %v5663_v27, %v792_v26  ;;  %v794_v44 = vmul.f32 %v5664_v61, %v792_v26  ;;  %v795_v25 = vmul.f32 %v5665_v45, %v792_v26  ;;  %v796_v40 = vmul.f32 %v5666_v62, %v792_v26  ;;  %v5675_v61 = vld [vmem:[#allocation42_spill] sm:$0xff]  ;;  %v5676_v62 = vld [vmem:[#allocation43_spill] sm:$0xff] }
 0x1a6   : > { %v805_v2 = vmul.f32 %v5667_v6, %v804_v3  ;;  %v806_v8 = vmul.f32 %v5668_v7, %v804_v3  ;;  %v807_v18 = vmul.f32 %v5669_v21, %v804_v3  ;;  %v808_v11 = vmul.f32 %v5670_v10, %v804_v3  ;;  %v5679_v10 = vld [vmem:[#allocation46_spill] sm:$0xff] }
 0x1a7   : > { %v797_v17 = vadd.f32 %v793_v60, %v785_v20  ;;  %v798_v13 = vadd.f32 %v794_v44, %v786_v1  ;;  %v799_v16 = vadd.f32 %v795_v25, %v787_v15  ;;  %v800_v53 = vadd.f32 %v796_v40, %v788_v34  ;;  %v5677_v20 = vld [vmem:[#allocation44_spill] sm:$0xff]  ;;  %v5678_v15 = vld [vmem:[#allocation45_spill] sm:$0xff] }
 0x1a8   : > { %v817_v23 = vmul.f32 %v5671_v51, %v816_v47  ;;  %v818_v0 = vmul.f32 %v5672_v14, %v816_v47  ;;  %v819_v52 = vmul.f32 %v5673_v32, %v816_v47  ;;  %v820_v35 = vmul.f32 %v5674_v39, %v816_v47  ;;  %v5682_v51 = vld [vmem:[#allocation49_spill] sm:$0xff]  ;;  %v5683_v14 = vld [vmem:[#allocation50_spill] sm:$0xff]  ;;  %v5684_v32 = vld [vmem:[#allocation51_spill] sm:$0xff] }
 0x1a9   : > { %v809_v43 = vadd.f32 %v805_v2, %v797_v17  ;;  %v810_v29 = vadd.f32 %v806_v8, %v798_v13  ;;  %v811_v26 = vadd.f32 %v807_v18, %v799_v16  ;;  %v812_v27 = vadd.f32 %v808_v11, %v800_v53  ;;  %v5680_v17 = vld [vmem:[#allocation47_spill] sm:$0xff]  ;;  %v5681_v16 = vld [vmem:[#allocation48_spill] sm:$0xff] }
 0x1aa   : > { %v829_v45 = vmul.f32 %v5675_v61, %v828_v28  ;;  %v830_v3 = vmul.f32 %v5676_v62, %v828_v28  ;;  %v831_v1 = vmul.f32 %v5677_v20, %v828_v28  ;;  %v832_v34 = vmul.f32 %v5678_v15, %v828_v28  ;;  %v5685_v39 = vld [vmem:[#allocation52_spill] sm:$0xff]  ;;  %v5687_v62 = vld [vmem:[#allocation54_spill] sm:$0xff]  ;;  %v5688_v20 = vld [vmem:[#allocation55_spill] sm:$0xff] }
 0x1ab   : > { %v821_v60 = vadd.f32 %v817_v23, %v809_v43  ;;  %v822_v44 = vadd.f32 %v818_v0, %v810_v29  ;;  %v823_v25 = vadd.f32 %v819_v52, %v811_v26  ;;  %v824_v40 = vadd.f32 %v820_v35, %v812_v27  ;;  %v5686_v43 = vld [vmem:[#allocation53_spill] sm:$0xff]  ;;  %v5689_v15 = vld [vmem:[#allocation56_spill] sm:$0xff] }
 0x1ac   : > { %v840_v6 = vrot.slane %v3750_v22, %v2822_v55  ;;  %v852_v47 = vrot.slane %v3750_v22, %v2824_v56  ;;  %v864_v2 = vrot.slane %v3750_v22, %v2826_v57  ;;  %v876_v7 = vrot.slane %v3750_v22, %v2828_v58 }
 0x1ad   : > { %v833_v8 = vadd.f32 %v829_v45, %v821_v60  ;;  %v834_v21 = vadd.f32 %v830_v3, %v822_v44  ;;  %v835_v18 = vadd.f32 %v831_v1, %v823_v25  ;;  %v836_v28 = vadd.f32 %v832_v34, %v824_v40  ;;  %v5690_v60 = vld [vmem:[#allocation57_spill] sm:$0xff] }
 0x1ae   : > { %v841_v11 = vmul.f32 %v5679_v10, %v840_v6  ;;  %v842_v13 = vmul.f32 %v5680_v17, %v840_v6  ;;  %v843_v53 = vmul.f32 %v5681_v16, %v840_v6  ;;  %v844_v23 = vmul.f32 %v5682_v51, %v840_v6  ;;  %v5691_v17 = vld [vmem:[#allocation58_spill] sm:$0xff]  ;;  %v5692_v51 = vld [vmem:[#allocation59_spill] sm:$0xff] }
 0x1af   : > { %v853_v0 = vmul.f32 %v5683_v14, %v852_v47  ;;  %v854_v52 = vmul.f32 %v5684_v32, %v852_v47  ;;  %v855_v35 = vmul.f32 %v5685_v39, %v852_v47  ;;  %v856_v29 = vmul.f32 %v5686_v43, %v852_v47  ;;  %v5695_v43 = vld [vmem:[#allocation62_spill] sm:$0xff] }
 0x1b0   : > { %v845_v26 = vadd.f32 %v841_v11, %v833_v8  ;;  %v846_v27 = vadd.f32 %v842_v13, %v834_v21  ;;  %v847_v61 = vadd.f32 %v843_v53, %v835_v18  ;;  %v848_v45 = vadd.f32 %v844_v23, %v836_v28  ;;  %v5693_v8 = vld [vmem:[#allocation60_spill] sm:$0xff]  ;;  %v5694_v18 = vld [vmem:[#allocation61_spill] sm:$0xff] }
 0x1b1   : > { %v865_v3 = vmul.f32 %v5687_v62, %v864_v2  ;;  %v866_v1 = vmul.f32 %v5688_v20, %v864_v2  ;;  %v867_v34 = vmul.f32 %v5689_v15, %v864_v2  ;;  %v868_v44 = vmul.f32 %v5690_v60, %v864_v2  ;;  %v5698_v62 = vld [vmem:[#allocation65_spill] sm:$0xff]  ;;  %v5699_v20 = vld [vmem:[#allocation66_spill] sm:$0xff]  ;;  %v5700_v15 = vld [vmem:[#allocation67_spill] sm:$0xff] }
 0x1b2   : > { %v857_v25 = vadd.f32 %v853_v0, %v845_v26  ;;  %v858_v40 = vadd.f32 %v854_v52, %v846_v27  ;;  %v859_v6 = vadd.f32 %v855_v35, %v847_v61  ;;  %v860_v10 = vadd.f32 %v856_v29, %v848_v45  ;;  %v5696_v26 = vld [vmem:[#allocation63_spill] sm:$0xff]  ;;  %v5697_v61 = vld [vmem:[#allocation64_spill] sm:$0xff] }
 0x1b3   : > { %v877_v16 = vmul.f32 %v5691_v17, %v876_v7  ;;  %v878_v47 = vmul.f32 %v5692_v51, %v876_v7  ;;  %v879_v21 = vmul.f32 %v5693_v8, %v876_v7  ;;  %v880_v28 = vmul.f32 %v5694_v18, %v876_v7  ;;  %v5701_v60 = vld [vmem:[#allocation68_spill] sm:$0xff]  ;;  %v5703_v51 = vld [vmem:[#allocation70_spill] sm:$0xff]  ;;  %v5704_v8 = vld [vmem:[#allocation71_spill] sm:$0xff] }
 0x1b4   : > { %v869_v11 = vadd.f32 %v865_v3, %v857_v25  ;;  %v870_v13 = vadd.f32 %v866_v1, %v858_v40  ;;  %v871_v53 = vadd.f32 %v867_v34, %v859_v6  ;;  %v872_v23 = vadd.f32 %v868_v44, %v860_v10  ;;  %v5702_v25 = vld [vmem:[#allocation69_spill] sm:$0xff]  ;;  %v5705_v18 = vld [vmem:[#allocation72_spill] sm:$0xff] }
 0x1b5   : > { %v888_v14 = vrot.slane %v3753_v54, %v2812_v46  ;;  %v900_v2 = vrot.slane %v3753_v54, %v2816_v48  ;;  %v912_v0 = vrot.slane %v3753_v54, %v2818_v49  ;;  %v924_v32 = vrot.slane %v3753_v54, %v2820_v50 }
 0x1b6   : > { %v881_v52 = vadd.f32 %v877_v16, %v869_v11  ;;  %v882_v39 = vadd.f32 %v878_v47, %v870_v13  ;;  %v883_v35 = vadd.f32 %v879_v21, %v871_v53  ;;  %v884_v7 = vadd.f32 %v880_v28, %v872_v23  ;;  %v5706_v11 = vld [vmem:[#allocation73_spill] sm:$0xff] }
 0x1b7   : > { %v889_v29 = vmul.f32 %v5695_v43, %v888_v14  ;;  %v890_v27 = vmul.f32 %v5696_v26, %v888_v14  ;;  %v891_v45 = vmul.f32 %v5697_v61, %v888_v14  ;;  %v892_v3 = vmul.f32 %v5698_v62, %v888_v14  ;;  %v5707_v26 = vld [vmem:[#allocation74_spill] sm:$0xff]  ;;  %v5708_v62 = vld [vmem:[#allocation75_spill] sm:$0xff] }
 0x1b8   : > { %v901_v1 = vmul.f32 %v5699_v20, %v900_v2  ;;  %v902_v34 = vmul.f32 %v5700_v15, %v900_v2  ;;  %v903_v44 = vmul.f32 %v5701_v60, %v900_v2  ;;  %v904_v40 = vmul.f32 %v5702_v25, %v900_v2  ;;  %v5711_v25 = vld [vmem:[#allocation78_spill] sm:$0xff] }
 0x1b9   : > { %v893_v6 = vadd.f32 %v889_v29, %v881_v52  ;;  %v894_v10 = vadd.f32 %v890_v27, %v882_v39  ;;  %v895_v17 = vadd.f32 %v891_v45, %v883_v35  ;;  %v896_v16 = vadd.f32 %v892_v3, %v884_v7  ;;  %v5709_v52 = vld [vmem:[#allocation76_spill] sm:$0xff]  ;;  %v5710_v35 = vld [vmem:[#allocation77_spill] sm:$0xff] }
 0x1ba   : > { %v913_v47 = vmul.f32 %v5703_v51, %v912_v0  ;;  %v914_v21 = vmul.f32 %v5704_v8, %v912_v0  ;;  %v915_v28 = vmul.f32 %v5705_v18, %v912_v0  ;;  %v916_v13 = vmul.f32 %v5706_v11, %v912_v0  ;;  %v5714_v51 = vld [vmem:[#allocation81_spill] sm:$0xff]  ;;  %v5715_v8 = vld [vmem:[#allocation82_spill] sm:$0xff]  ;;  %v5716_v18 = vld [vmem:[#allocation83_spill] sm:$0xff] }
 0x1bb   : > { %v905_v53 = vadd.f32 %v901_v1, %v893_v6  ;;  %v906_v23 = vadd.f32 %v902_v34, %v894_v10  ;;  %v907_v14 = vadd.f32 %v903_v44, %v895_v17  ;;  %v908_v43 = vadd.f32 %v904_v40, %v896_v16  ;;  %v5712_v6 = vld [vmem:[#allocation79_spill] sm:$0xff]  ;;  %v5713_v17 = vld [vmem:[#allocation80_spill] sm:$0xff] }
 0x1bc   : > { %v925_v61 = vmul.f32 %v5707_v26, %v924_v32  ;;  %v926_v2 = vmul.f32 %v5708_v62, %v924_v32  ;;  %v927_v39 = vmul.f32 %v5709_v52, %v924_v32  ;;  %v928_v7 = vmul.f32 %v5710_v35, %v924_v32  ;;  %v5717_v11 = vld [vmem:[#allocation84_spill] sm:$0xff]  ;;  %v5719_v62 = vld [vmem:[#allocation86_spill] sm:$0xff]  ;;  %v5720_v52 = vld [vmem:[#allocation87_spill] sm:$0xff] }
 0x1bd   : > { %v917_v29 = vadd.f32 %v913_v47, %v905_v53  ;;  %v918_v27 = vadd.f32 %v914_v21, %v906_v23  ;;  %v919_v45 = vadd.f32 %v915_v28, %v907_v14  ;;  %v920_v3 = vadd.f32 %v916_v13, %v908_v43  ;;  %v5718_v53 = vld [vmem:[#allocation85_spill] sm:$0xff]  ;;  %v5721_v35 = vld [vmem:[#allocation88_spill] sm:$0xff] }
 0x1be   : > { %v936_v20 = vrot.slane %v3753_v54, %v2822_v55  ;;  %v948_v0 = vrot.slane %v3753_v54, %v2824_v56  ;;  %v960_v1 = vrot.slane %v3753_v54, %v2826_v57  ;;  %v972_v15 = vrot.slane %v3753_v54, %v2828_v58 }
 0x1bf   : > { %v929_v34 = vadd.f32 %v925_v61, %v917_v29  ;;  %v930_v60 = vadd.f32 %v926_v2, %v918_v27  ;;  %v931_v44 = vadd.f32 %v927_v39, %v919_v45  ;;  %v932_v32 = vadd.f32 %v928_v7, %v920_v3  ;;  %v5722_v29 = vld [vmem:[#allocation89_spill] sm:$0xff] }
 0x1c0   : > { %v937_v40 = vmul.f32 %v5711_v25, %v936_v20  ;;  %v938_v10 = vmul.f32 %v5712_v6, %v936_v20  ;;  %v939_v16 = vmul.f32 %v5713_v17, %v936_v20  ;;  %v940_v47 = vmul.f32 %v5714_v51, %v936_v20  ;;  %v5723_v6 = vld [vmem:[#allocation90_spill] sm:$0xff]  ;;  %v5724_v51 = vld [vmem:[#allocation91_spill] sm:$0xff] }
 0x1c1   : > { %v949_v21 = vmul.f32 %v5715_v8, %v948_v0  ;;  %v950_v28 = vmul.f32 %v5716_v18, %v948_v0  ;;  %v951_v13 = vmul.f32 %v5717_v11, %v948_v0  ;;  %v952_v23 = vmul.f32 %v5718_v53, %v948_v0  ;;  %v5727_v53 = vld [vmem:[#allocation94_spill] sm:$0xff] }
 0x1c2   : > { %v941_v14 = vadd.f32 %v937_v40, %v929_v34  ;;  %v942_v43 = vadd.f32 %v938_v10, %v930_v60  ;;  %v943_v26 = vadd.f32 %v939_v16, %v931_v44  ;;  %v944_v61 = vadd.f32 %v940_v47, %v932_v32  ;;  %v5725_v34 = vld [vmem:[#allocation92_spill] sm:$0xff]  ;;  %v5726_v44 = vld [vmem:[#allocation93_spill] sm:$0xff] }
 0x1c3   : > { %v961_v2 = vmul.f32 %v5719_v62, %v960_v1  ;;  %v962_v39 = vmul.f32 %v5720_v52, %v960_v1  ;;  %v963_v7 = vmul.f32 %v5721_v35, %v960_v1  ;;  %v964_v27 = vmul.f32 %v5722_v29, %v960_v1  ;;  %v5730_v62 = vld [vmem:[#allocation97_spill] sm:$0xff]  ;;  %v5731_v52 = vld [vmem:[#allocation98_spill] sm:$0xff]  ;;  %v5732_v35 = vld [vmem:[#allocation99_spill] sm:$0xff] }
 0x1c4   : > { %v953_v45 = vadd.f32 %v949_v21, %v941_v14  ;;  %v954_v3 = vadd.f32 %v950_v28, %v942_v43  ;;  %v955_v20 = vadd.f32 %v951_v13, %v943_v26  ;;  %v956_v25 = vadd.f32 %v952_v23, %v944_v61  ;;  %v5728_v14 = vld [vmem:[#allocation95_spill] sm:$0xff]  ;;  %v5729_v26 = vld [vmem:[#allocation96_spill] sm:$0xff] }
 0x1c5   : > { %v973_v17 = vmul.f32 %v5723_v6, %v972_v15  ;;  %v974_v0 = vmul.f32 %v5724_v51, %v972_v15  ;;  %v975_v60 = vmul.f32 %v5725_v34, %v972_v15  ;;  %v976_v32 = vmul.f32 %v5726_v44, %v972_v15  ;;  %v5733_v29 = vld [vmem:[#allocation100_spill] sm:$0xff]  ;;  %v5735_v51 = vld [vmem:[#allocation102_spill] sm:$0xff]  ;;  %v5736_v34 = vld [vmem:[#allocation103_spill] sm:$0xff] }
 0x1c6   : > { %v965_v40 = vadd.f32 %v961_v2, %v953_v45  ;;  %v966_v10 = vadd.f32 %v962_v39, %v954_v3  ;;  %v967_v16 = vadd.f32 %v963_v7, %v955_v20  ;;  %v968_v47 = vadd.f32 %v964_v27, %v956_v25  ;;  %v5734_v45 = vld [vmem:[#allocation101_spill] sm:$0xff]  ;;  %v5737_v44 = vld [vmem:[#allocation104_spill] sm:$0xff] }
 0x1c7   : > { %v984_v8 = vrot.slane %v3756_v9, %v2812_v46  ;;  %v996_v1 = vrot.slane %v3756_v9, %v2816_v48  ;;  %v1008_v21 = vrot.slane %v3756_v9, %v2818_v49  ;;  %v1020_v18 = vrot.slane %v3756_v9, %v2820_v50 }
 0x1c8   : > { %v977_v28 = vadd.f32 %v973_v17, %v965_v40  ;;  %v978_v11 = vadd.f32 %v974_v0, %v966_v10  ;;  %v979_v13 = vadd.f32 %v975_v60, %v967_v16  ;;  %v980_v15 = vadd.f32 %v976_v32, %v968_v47  ;;  %v5738_v40 = vld [vmem:[#allocation105_spill] sm:$0xff] }
 0x1c9   : > { %v985_v23 = vmul.f32 %v5727_v53, %v984_v8  ;;  %v986_v43 = vmul.f32 %v5728_v14, %v984_v8  ;;  %v987_v61 = vmul.f32 %v5729_v26, %v984_v8  ;;  %v988_v2 = vmul.f32 %v5730_v62, %v984_v8  ;;  %v5739_v14 = vld [vmem:[#allocation106_spill] sm:$0xff]  ;;  %v5740_v62 = vld [vmem:[#allocation107_spill] sm:$0xff] }
 0x1ca   : > { %v997_v39 = vmul.f32 %v5731_v52, %v996_v1  ;;  %v998_v7 = vmul.f32 %v5732_v35, %v996_v1  ;;  %v999_v27 = vmul.f32 %v5733_v29, %v996_v1  ;;  %v1000_v3 = vmul.f32 %v5734_v45, %v996_v1  ;;  %v5743_v45 = vld [vmem:[#allocation110_spill] sm:$0xff] }
 0x1cb   : > { %v989_v20 = vadd.f32 %v985_v23, %v977_v28  ;;  %v990_v25 = vadd.f32 %v986_v43, %v978_v11  ;;  %v991_v6 = vadd.f32 %v987_v61, %v979_v13  ;;  %v992_v17 = vadd.f32 %v988_v2, %v980_v15  ;;  %v5741_v28 = vld [vmem:[#allocation108_spill] sm:$0xff]  ;;  %v5742_v13 = vld [vmem:[#allocation109_spill] sm:$0xff] }
 0x1cc   : > { %v1009_v0 = vmul.f32 %v5735_v51, %v1008_v21  ;;  %v1010_v60 = vmul.f32 %v5736_v34, %v1008_v21  ;;  %v1011_v32 = vmul.f32 %v5737_v44, %v1008_v21  ;;  %v1012_v10 = vmul.f32 %v5738_v40, %v1008_v21  ;;  %v5746_v51 = vld [vmem:[#allocation113_spill] sm:$0xff]  ;;  %v5747_v34 = vld [vmem:[#allocation114_spill] sm:$0xff]  ;;  %v5748_v44 = vld [vmem:[#allocation115_spill] sm:$0xff] }
 0x1cd   : > { %v1001_v16 = vadd.f32 %v997_v39, %v989_v20  ;;  %v1002_v47 = vadd.f32 %v998_v7, %v990_v25  ;;  %v1003_v8 = vadd.f32 %v999_v27, %v991_v6  ;;  %v1004_v53 = vadd.f32 %v1000_v3, %v992_v17  ;;  %v5744_v20 = vld [vmem:[#allocation111_spill] sm:$0xff]  ;;  %v5745_v6 = vld [vmem:[#allocation112_spill] sm:$0xff] }
 0x1ce   : > { %v1021_v26 = vmul.f32 %v5739_v14, %v1020_v18  ;;  %v1022_v1 = vmul.f32 %v5740_v62, %v1020_v18  ;;  %v1023_v11 = vmul.f32 %v5741_v28, %v1020_v18  ;;  %v1024_v15 = vmul.f32 %v5742_v13, %v1020_v18  ;;  %v5749_v40 = vld [vmem:[#allocation116_spill] sm:$0xff]  ;;  %v5751_v62 = vld [vmem:[#allocation118_spill] sm:$0xff]  ;;  %v5752_v28 = vld [vmem:[#allocation119_spill] sm:$0xff] }
 0x1cf   : > { %v1013_v23 = vadd.f32 %v1009_v0, %v1001_v16  ;;  %v1014_v43 = vadd.f32 %v1010_v60, %v1002_v47  ;;  %v1015_v61 = vadd.f32 %v1011_v32, %v1003_v8  ;;  %v1016_v2 = vadd.f32 %v1012_v10, %v1004_v53  ;;  %v5750_v16 = vld [vmem:[#allocation117_spill] sm:$0xff]  ;;  %v5753_v13 = vld [vmem:[#allocation120_spill] sm:$0xff] }
 0x1d0   : > { %v1032_v52 = vrot.slane %v3756_v9, %v2822_v55  ;;  %v1044_v21 = vrot.slane %v3756_v9, %v2824_v56  ;;  %v1056_v39 = vrot.slane %v3756_v9, %v2826_v57  ;;  %v1068_v35 = vrot.slane %v3756_v9, %v2828_v58 }
 0x1d1   : > { %v1025_v7 = vadd.f32 %v1021_v26, %v1013_v23  ;;  %v1026_v29 = vadd.f32 %v1022_v1, %v1014_v43  ;;  %v1027_v27 = vadd.f32 %v1023_v11, %v1015_v61  ;;  %v1028_v18 = vadd.f32 %v1024_v15, %v1016_v2 }
 0x1d2   : > { %v1033_v3 = vmul.f32 %v5743_v45, %v1032_v52  ;;  %v1034_v25 = vmul.f32 %v5744_v20, %v1032_v52  ;;  %v1035_v17 = vmul.f32 %v5745_v6, %v1032_v52  ;;  %v1036_v0 = vmul.f32 %v5746_v51, %v1032_v52 }
 0x1d3   : > { %v1045_v60 = vmul.f32 %v5747_v34, %v1044_v21  ;;  %v1046_v32 = vmul.f32 %v5748_v44, %v1044_v21  ;;  %v1047_v10 = vmul.f32 %v5749_v40, %v1044_v21  ;;  %v1048_v47 = vmul.f32 %v5750_v16, %v1044_v21 }
 0x1d4   : > { %v1037_v8 = vadd.f32 %v1033_v3, %v1025_v7  ;;  %v1038_v53 = vadd.f32 %v1034_v25, %v1026_v29  ;;  %v1039_v14 = vadd.f32 %v1035_v17, %v1027_v27  ;;  %v1040_v26 = vadd.f32 %v1036_v0, %v1028_v18 }
 0x1d5   : > { %v1057_v1 = vmul.f32 %v5751_v62, %v1056_v39  ;;  %v1058_v11 = vmul.f32 %v5752_v28, %v1056_v39  ;;  %v1059_v15 = vmul.f32 %v5753_v13, %v1056_v39  ;;  %v1060_v23 = vmul.f32 %v3652_v31, %v1056_v39  ;;  %v5754_v13 = vld [vmem:[#allocation7_spill] sm:$0xff] }
 0x1d6   : > { %v1049_v43 = vadd.f32 %v1045_v60, %v1037_v8  ;;  %v1050_v61 = vadd.f32 %v1046_v32, %v1038_v53  ;;  %v1051_v2 = vadd.f32 %v1047_v10, %v1039_v14  ;;  %v1052_v52 = vadd.f32 %v1048_v47, %v1040_v26 }
 0x1d7   : > { %v1069_v45 = vmul.f32 %v3661_v24, %v1068_v35  ;;  %v1070_v21 = vmul.f32 %v3666_v33, %v1068_v35  ;;  %v1071_v7 = vmul.f32 %v3671_v36, %v1068_v35  ;;  %v1072_v29 = vmul.f32 %v3676_v41, %v1068_v35 }
 0x1d8   : > { %v1061_v27 = vadd.f32 %v1057_v1, %v1049_v43  ;;  %v1062_v18 = vadd.f32 %v1058_v11, %v1050_v61  ;;  %v1063_v3 = vadd.f32 %v1059_v15, %v1051_v2  ;;  %v1064_v20 = vadd.f32 %v1060_v23, %v1052_v52  ;;  %v5755_v23 = vld [vmem:[#allocation6_spill] sm:$0xff]  ;;  %v5756_v61 = vld [vmem:[#allocation5_spill] sm:$0xff]  ;;  %v5757_v52 = vld [vmem:[#allocation4_spill] sm:$0xff] }
 0x1d9   : > { %v645_v14 = vmul.f32 %v3697_v37, %v2831_v59  ;;  %v646_v26 = vmul.f32 %v3697_v37, %v2849_v63  ;;  %v647_v62 = vmul.f32 %v3697_v37, %v2852_v4  ;;  %v648_v1 = vmul.f32 %v3697_v37, %v2855_v5 }
 0x1da   : > { %v1073_v25 = vadd.f32 %v1069_v45, %v1061_v27  ;;  %v1074_v6 = vadd.f32 %v1070_v21, %v1062_v18  ;;  %v1075_v17 = vadd.f32 %v1071_v7, %v1063_v3  ;;  %v1076_v31 = vadd.f32 %v1072_v29, %v1064_v20 }
 0x1db   : > { %v649_v15 = vadd.f32 %v5754_v13, %v645_v14  ;;  %v650_v43 = vadd.f32 %v5755_v23, %v646_v26  ;;  %v651_v2 = vadd.f32 %v5756_v61, %v647_v62  ;;  %v652_v59 = vadd.f32 %v5757_v52, %v648_v1  ;;  %v5760_v26 = vld [vmem:[#allocation3_spill] sm:$0xff] }
 0x1dc   : > { %v1077_v39 = vmul.f32 %v1073_v25, %v3747_v12  ;;  %v1078_v51 = vmul.f32 %v1074_v6, %v3750_v22  ;;  %v1079_v24 = vmul.f32 %v1075_v17, %v3753_v54  ;;  %v1080_v33 = vmul.f32 %v1076_v31, %v3756_v9 }
 0x1de   : > { %v1081_v36 = vsel %vm19_vm0, %v1077_v39, 0.0  ;;  %v1082_v41 = vsel %vm19_vm0, %v1078_v51, 0.0  ;;  %v1084_v35 = vsel %vm19_vm0, %v1079_v24, 0.0  ;;  %v1086_v34 = vsel %vm19_vm0, %v1080_v33, 0.0  ;;  %v5758_v24 = vld [vmem:[#allocation121_spill] sm:$0xff] }
 0x1df   : > { %v1083_v0 = vadd.f32 %v1082_v41, %v1081_v36 }
 0x1e1   : > { %v1085_v60 = vadd.f32 %v1084_v35, %v1083_v0  ;;  %v1135_v0 = vsel %vm1134_vm12, %v3729_v19, 1.0 }
 0x1e3   : > { %v1087_v44 = vadd.f32 %v1086_v34, %v1085_v60 }
 0x1e5   : > { %v1088_v32 = vrot.slane %v1087_v44, 4 }
 0x1e7   : > { %v1089_v40 = vadd.f32 %v1088_v32, %v1087_v44 }
 0x1e9   : > { %v1090_v10 = vrot.slane %v1089_v40, 2 }
 0x1eb   : > { %v1091_v16 = vadd.f32 %v1090_v10, %v1089_v40 }
 0x1ed   : > { %v1092_v47 = vrot.slane %v1091_v16, 1 }
 0x1ef   : > { %v1093_v8 = vadd.f32 %v1092_v47, %v1091_v16 }
 0x1f1   : > { %vm1094_vm11 = vcmp.ne.f32.partialorder %v1093_v8, 0.0 }
 0x1f2   : > { %v1095_v53 = vsel %vm1094_vm11, %v1093_v8, 1.0 }
 0x1f3   : > { %2395 = vrcp.f32 %v1095_v53 }
 0x1f4   : > { %2397 = vrcp.f32 %v1135_v0 }
 0x200   : > { %v2396_v28 = vpop.eup %2395 }
 0x201   : > { %v1097_v11 = vmul.f32 %v2396_v28, %v3729_v19  ;;  %v2398_v53 = vpop.eup %2397 }
 0x203   : > { %v1098_v63 = vsel %vm3736_vm10, 0.0, %v1097_v11 }
 0x204   : > { %v1099_v45 = vmul.f32 %v1098_v63, %v3747_v12  ;;  %v1100_v4 = vmul.f32 %v1098_v63, %v3750_v22  ;;  %v1101_v5 = vmul.f32 %v1098_v63, %v3753_v54  ;;  %v1102_v37 = vmul.f32 %v1098_v63, %v3756_v9 }
 0x205   : > { %v1107_v21 = vmul.f32 %v1098_v63, %v1073_v25  ;;  %v1108_v7 = vmul.f32 %v1098_v63, %v1074_v6  ;;  %v1109_v29 = vmul.f32 %v1098_v63, %v1075_v17  ;;  %v1110_v27 = vmul.f32 %v1098_v63, %v1076_v31  ;;  %v5759_v25 = vld [vmem:[#allocation122_spill] sm:$0xff] }
 0x206   : > { %v3977_v18 = vadd.f32 %v1099_v45, %v649_v15  ;;  %v3979_v3 = vadd.f32 %v1100_v4, %v650_v43  ;;  %v3981_v20 = vadd.f32 %v1101_v5, %v651_v2  ;;  %v3983_v30 = vadd.f32 %v1102_v37, %v652_v59  ;;  %v4063_v5 = vld [vmem:[%s5274_s0] sm:$0xff] }
 0x207   : > { %v3986_v39 = vsub.f32 %v3704_v38, %v1107_v21  ;;  %v3989_v51 = vsub.f32 %v3707_v42, %v1108_v7  ;;  %v3992_v33 = vsub.f32 %v5758_v24, %v1109_v29  ;;  %v3995_v6 = vsub.f32 %v5759_v25, %v1110_v27  ;;  %v4069_v21 = vld [vmem:[%s5274_s0 + $0x8] sm:$0xff]  ;;  %v4075_v29 = vld [vmem:[%s5274_s0 + $0x10] sm:$0xff]  ;;  %v4081_v24 = vld [vmem:[%s5274_s0 + $0x18] sm:$0xff] }
 0x209   : > { %v1115_v17 = vmul.f32 %v3986_v39, %v3986_v39  ;;  %v1116_v31 = vmul.f32 %v3989_v51, %v3989_v51  ;;  %v1117_v38 = vmul.f32 %v3992_v33, %v3992_v33  ;;  %v1118_v42 = vmul.f32 %v3995_v6, %v3995_v6 }
 0x20b   : > { %v1119_v36 = vsel %vm19_vm0, %v1115_v17, 0.0  ;;  %v1120_v41 = vsel %vm19_vm0, %v1116_v31, 0.0  ;;  %v1122_v35 = vsel %vm19_vm0, %v1117_v38, 0.0  ;;  %v1124_v60 = vsel %vm19_vm0, %v1118_v42, 0.0  ;;  %v4087_v17 = vld [vmem:[%s5274_s0 + $0x20] sm:$0xff]  ;;  %v4093_v38 = vld [vmem:[%s5274_s0 + $0x28] sm:$0xff] }
 0x20c   : > { %v1121_v34 = vadd.f32 %v1120_v41, %v1119_v36  ;;  %v4099_v36 = vld [vmem:[%s5274_s0 + $0x30] sm:$0xff] }
 0x20e   : > { %v1123_v44 = vadd.f32 %v1122_v35, %v1121_v34  ;;  %v4105_v35 = vld [vmem:[%s5274_s0 + $0x38] sm:$0xff]  ;;  %v4111_v34 = vld [vmem:[%s5274_s0 + $0x40] sm:$0xff] }
 0x210   : > { %v1125_v32 = vadd.f32 %v1124_v60, %v1123_v44  ;;  %v4117_v44 = vld [vmem:[%s5274_s0 + $0x48] sm:$0xff] }
 0x212   : > { %v1126_v40 = vrot.slane %v1125_v32, 4 }
 0x214   : > { %v1127_v10 = vadd.f32 %v1126_v40, %v1125_v32  ;;  %v4123_v40 = vld [vmem:[%s5274_s0 + $0x50] sm:$0xff] }
 0x216   : > { %v1128_v16 = vrot.slane %v1127_v10, 2 }
 0x218   : > { %v1129_v47 = vadd.f32 %v1128_v16, %v1127_v10  ;;  %v4129_v16 = vld [vmem:[%s5274_s0 + $0x58] sm:$0xff] }
 0x21a   : > { %v1130_v8 = vrot.slane %v1129_v47, 1 }
 0x21c   : > { %v4011_v14 = vadd.f32 %v1130_v8, %v1129_v47 }
 0x21e   : > { %vm1132_vm13 = vcmp.lt.f32.partialorder %v4011_v14, %v5760_v26  ;;  %v1137_v62 = vmul.f32 %v2398_v53, %v4011_v14  ;;  %vm1588_vm2 = vcmp.gt.f32.partialorder %v4011_v14, 0.0 }
 0x21f   : > { %vm4018_vm14 = vmor %vm1132_vm13, %vm34_vm1 }
 0x220   : > { %v1138_v28 = vsel %vm4018_vm14, 0.0, %v1137_v62 }
 0x221   : > { %v1139_v11 = vmul.f32 %v1138_v28, %v3747_v12  ;;  %v1140_v13 = vmul.f32 %v1138_v28, %v3750_v22  ;;  %v1141_v15 = vmul.f32 %v1138_v28, %v3753_v54  ;;  %v1142_v23 = vmul.f32 %v1138_v28, %v3756_v9 }
 0x223   : > { %v4029_v43 = vadd.f32 %v1139_v11, %v3986_v39  ;;  %v4032_v61 = vadd.f32 %v1140_v13, %v3989_v51  ;;  %v4035_v2 = vadd.f32 %v1141_v15, %v3992_v33  ;;  %v4038_v52 = vadd.f32 %v1142_v23, %v3995_v6  ;;  %v4135_v11 = vld [vmem:[%s5274_s0 + $0x60] sm:$0xff]  ;;  %v4141_v15 = vld [vmem:[%s5274_s0 + $0x68] sm:$0xff] }
 0x224   : > { %5764 = vst [vmem:[#allocation8_spill] sm:$0xff] %v4141_v15 }
 0x225   : > { %v1150_v12 = vrot.slane %v4029_v43, %v2812_v46  ;;  %v1162_v22 = vrot.slane %v4029_v43, %v2816_v48  ;;  %v1174_v54 = vrot.slane %v4029_v43, %v2818_v49  ;;  %v1186_v9 = vrot.slane %v4029_v43, %v2820_v50 }
 0x226   : > { %v1198_v59 = vrot.slane %v4029_v43, %v2822_v55  ;;  %v1210_v63 = vrot.slane %v4029_v43, %v2824_v56  ;;  %v4054_v45 = vrot.slane %v4029_v43, %v2826_v57  ;;  %v4058_v4 = vrot.slane %v4029_v43, %v2828_v58 }
 0x227   : > { %v1151_v37 = vmul.f32 %v4063_v5, %v1150_v12  ;;  %v1152_v7 = vmul.f32 %v4069_v21, %v1150_v12  ;;  %v1153_v27 = vmul.f32 %v4075_v29, %v1150_v12  ;;  %v1154_v25 = vmul.f32 %v4081_v24, %v1150_v12  ;;  %v4147_v12 = vld [vmem:[%s5274_s0 + $0x70] sm:$0xff] }
 0x228   : > { %v1163_v31 = vmul.f32 %v4087_v17, %v1162_v22  ;;  %v1164_v42 = vmul.f32 %v4093_v38, %v1162_v22  ;;  %v1165_v41 = vmul.f32 %v4099_v36, %v1162_v22  ;;  %v1166_v0 = vmul.f32 %v4105_v35, %v1162_v22  ;;  %5765 = vst [vmem:[#allocation9_spill] sm:$0xff] %v4147_v12 }
 0x229   : > { %v1175_v60 = vmul.f32 %v4111_v34, %v1174_v54  ;;  %v1176_v32 = vmul.f32 %v4117_v44, %v1174_v54  ;;  %v1177_v10 = vmul.f32 %v4123_v40, %v1174_v54  ;;  %v1178_v47 = vmul.f32 %v4129_v16, %v1174_v54  ;;  %v4153_v54 = vld [vmem:[%s5274_s0 + $0x78] sm:$0xff] }
 0x22a   : > { %v1167_v8 = vadd.f32 %v1163_v31, %v1151_v37  ;;  %v1168_v53 = vadd.f32 %v1164_v42, %v1152_v7  ;;  %v1169_v62 = vadd.f32 %v1165_v41, %v1153_v27  ;;  %v1170_v28 = vadd.f32 %v1166_v0, %v1154_v25  ;;  %5766 = vst [vmem:[#allocation10_spill] sm:$0xff] %v4153_v54  ;;  %v4159_v42 = vld [vmem:[%s5274_s0 + $0x80] sm:$0xff]  ;;  %v4165_v0 = vld [vmem:[%s5274_s0 + $0x88] sm:$0xff] }
 0x22b   : > { %v1187_v13 = vmul.f32 %v4135_v11, %v1186_v9  ;;  %v1188_v23 = vmul.f32 %v4141_v15, %v1186_v9  ;;  %v1189_v22 = vmul.f32 %v4147_v12, %v1186_v9  ;;  %v1190_v37 = vmul.f32 %v4153_v54, %v1186_v9  ;;  %5767 = vst [vmem:[#allocation11_spill] sm:$0xff] %v4159_v42  ;;  %v4171_v9 = vld [vmem:[%s5274_s0 + $0x90] sm:$0xff] }
 0x22c   : > { %v1179_v7 = vadd.f32 %v1175_v60, %v1167_v8  ;;  %v1180_v27 = vadd.f32 %v1176_v32, %v1168_v53  ;;  %v1181_v25 = vadd.f32 %v1177_v10, %v1169_v62  ;;  %v1182_v31 = vadd.f32 %v1178_v47, %v1170_v28  ;;  %5768 = vst [vmem:[#allocation12_spill] sm:$0xff] %v4165_v0  ;;  %v4177_v32 = vld [vmem:[%s5274_s0 + $0x98] sm:$0xff]  ;;  %v4183_v28 = vld [vmem:[%s5274_s0 + $0xa0] sm:$0xff] }
 0x22d   : > { %v1199_v41 = vmul.f32 %v4159_v42, %v1198_v59  ;;  %v1200_v12 = vmul.f32 %v4165_v0, %v1198_v59  ;;  %5769 = vst [vmem:[#allocation13_spill] sm:$0xff] %v4171_v9  ;;  %v1201_v60 = vmul.f32 %v4171_v9, %v1198_v59  ;;  %5770 = vst [vmem:[#allocation14_spill] sm:$0xff] %v4177_v32  ;;  %v4189_v9 = vld [vmem:[%s5274_s0 + $0xa8] sm:$0xff] }
 0x22e   : > { %v1202_v10 = vmul.f32 %v4177_v32, %v1198_v59  ;;  %v1191_v47 = vadd.f32 %v1187_v13, %v1179_v7  ;;  %v1192_v8 = vadd.f32 %v1188_v23, %v1180_v27  ;;  %v1193_v53 = vadd.f32 %v1189_v22, %v1181_v25  ;;  %5771 = vst [vmem:[#allocation15_spill] sm:$0xff] %v4183_v28  ;;  %v4195_v59 = vld [vmem:[%s5274_s0 + $0xb0] sm:$0xff]  ;;  %v4201_v23 = vld [vmem:[%s5274_s0 + $0xb8] sm:$0xff] }
 0x22f   : > { %v1194_v62 = vadd.f32 %v1190_v37, %v1182_v31  ;;  %v1211_v0 = vmul.f32 %v4183_v28, %v1210_v63  ;;  %5772 = vst [vmem:[#allocation16_spill] sm:$0xff] %v4189_v9  ;;  %v1212_v42 = vmul.f32 %v4189_v9, %v1210_v63  ;;  %5773 = vst [vmem:[#allocation17_spill] sm:$0xff] %v4195_v59  ;;  %v4207_v31 = vld [vmem:[%s5274_s0 + $0xc0] sm:$0xff] }
 0x230   : > { %v1213_v13 = vmul.f32 %v4195_v59, %v1210_v63  ;;  %5774 = vst [vmem:[#allocation18_spill] sm:$0xff] %v4201_v23  ;;  %v1214_v22 = vmul.f32 %v4201_v23, %v1210_v63  ;;  %v1203_v37 = vadd.f32 %v1199_v41, %v1191_v47  ;;  %v1204_v7 = vadd.f32 %v1200_v12, %v1192_v8  ;;  %v4214_v59 = vld [vmem:[%s5274_s0 + $0xc8] sm:$0xff]  ;;  %v4221_v12 = vld [vmem:[%s5274_s0 + $0xd0] sm:$0xff] }
 0x231   : > { %v1205_v27 = vadd.f32 %v1201_v60, %v1193_v53  ;;  %v1206_v25 = vadd.f32 %v1202_v10, %v1194_v62  ;;  %5775 = vst [vmem:[#allocation19_spill] sm:$0xff] %v4207_v31  ;;  %v1223_v9 = vmul.f32 %v4207_v31, %v4054_v45  ;;  %5776 = vst [vmem:[#allocation20_spill] sm:$0xff] %v4214_v59  ;;  %v4228_v60 = vld [vmem:[%s5274_s0 + $0xd8] sm:$0xff]  ;;  %v4242_v31 = vld [vmem:[%s5274_s0 + $0xe8] sm:$0xff] }
 0x232   : > { %v1224_v63 = vmul.f32 %v4214_v59, %v4054_v45  ;;  %5777 = vst [vmem:[#allocation21_spill] sm:$0xff] %v4221_v12  ;;  %v1225_v41 = vmul.f32 %v4221_v12, %v4054_v45  ;;  %5778 = vst [vmem:[#allocation22_spill] sm:$0xff] %v4228_v60  ;;  %v1226_v10 = vmul.f32 %v4228_v60, %v4054_v45  ;;  %v4235_v59 = vld [vmem:[%s5274_s0 + $0xe0] sm:$0xff] }
 0x233   : > { %v1215_v47 = vadd.f32 %v1211_v0, %v1203_v37  ;;  %v1216_v8 = vadd.f32 %v1212_v42, %v1204_v7  ;;  %v1217_v53 = vadd.f32 %v1213_v13, %v1205_v27  ;;  %v1218_v62 = vadd.f32 %v1214_v22, %v1206_v25  ;;  %5779 = vst [vmem:[#allocation23_spill] sm:$0xff] %v4235_v59  ;;  %v4249_v42 = vld [vmem:[%s5274_s0 + $0xf0] sm:$0xff]  ;;  %v4256_v13 = vld [vmem:[%s5274_s0 + $0xf8] sm:$0xff] }
 0x234   : > { %v1235_v12 = vmul.f32 %v4235_v59, %v4058_v4  ;;  %5780 = vst [vmem:[#allocation24_spill] sm:$0xff] %v4242_v31  ;;  %v1236_v45 = vmul.f32 %v4242_v31, %v4058_v4  ;;  %5781 = vst [vmem:[#allocation25_spill] sm:$0xff] %v4249_v42  ;;  %v1237_v0 = vmul.f32 %v4249_v42, %v4058_v4 }
 0x235   : > { %5782 = vst [vmem:[#allocation26_spill] sm:$0xff] %v4256_v13  ;;  %v1238_v22 = vmul.f32 %v4256_v13, %v4058_v4  ;;  %v1227_v37 = vadd.f32 %v1223_v9, %v1215_v47  ;;  %v1228_v7 = vadd.f32 %v1224_v63, %v1216_v8  ;;  %v1229_v27 = vadd.f32 %v1225_v41, %v1217_v53  ;;  %v4271_v9 = vld [vmem:[%s5274_s0 + $0x100] sm:$0xff]  ;;  %v4277_v41 = vld [vmem:[%s5274_s0 + $0x108] sm:$0xff]  ;;  %v4289_v8 = vld [vmem:[%s5274_s0 + $0x118] sm:$0xff] }
 0x236   : > { %v1230_v25 = vadd.f32 %v1226_v10, %v1218_v62  ;;  %v1246_v31 = vrot.slane %v4032_v61, %v2812_v46  ;;  %v1258_v59 = vrot.slane %v4032_v61, %v2816_v48  ;;  %v1270_v42 = vrot.slane %v4032_v61, %v2818_v49  ;;  %5783 = vst [vmem:[#allocation27_spill] sm:$0xff] %v4271_v9  ;;  %v4295_v62 = vld [vmem:[%s5274_s0 + $0x120] sm:$0xff] }
 0x237   : > { %v1282_v60 = vrot.slane %v4032_v61, %v2820_v50  ;;  %v1239_v23 = vadd.f32 %v1235_v12, %v1227_v37  ;;  %v1240_v28 = vadd.f32 %v1236_v45, %v1228_v7  ;;  %v1241_v32 = vadd.f32 %v1237_v0, %v1229_v27  ;;  %5784 = vst [vmem:[#allocation28_spill] sm:$0xff] %v4277_v41  ;;  %v4283_v12 = vld [vmem:[%s5274_s0 + $0x110] sm:$0xff]  ;;  %v4301_v0 = vld [vmem:[%s5274_s0 + $0x128] sm:$0xff]  ;;  %v4313_v7 = vld [vmem:[%s5274_s0 + $0x138] sm:$0xff] }
 0x238   : > { %v1242_v4 = vadd.f32 %v1238_v22, %v1230_v25  ;;  %v1247_v63 = vmul.f32 %v4271_v9, %v1246_v31  ;;  %v1248_v10 = vmul.f32 %v4277_v41, %v1246_v31  ;;  %5785 = vst [vmem:[#allocation29_spill] sm:$0xff] %v4283_v12  ;;  %v1249_v47 = vmul.f32 %v4283_v12, %v1246_v31  ;;  %v4307_v37 = vld [vmem:[%s5274_s0 + $0x130] sm:$0xff] }
 0x239   : > { %5786 = vst [vmem:[#allocation30_spill] sm:$0xff] %v4289_v8  ;;  %v1250_v53 = vmul.f32 %v4289_v8, %v1246_v31  ;;  %5787 = vst [vmem:[#allocation31_spill] sm:$0xff] %v4295_v62  ;;  %v1259_v45 = vmul.f32 %v4295_v62, %v1258_v59  ;;  %v1260_v22 = vmul.f32 %v4301_v0, %v1258_v59 }
 0x23a   : > { %5788 = vst [vmem:[#allocation32_spill] sm:$0xff] %v4301_v0  ;;  %5789 = vst [vmem:[#allocation33_spill] sm:$0xff] %v4307_v37  ;;  %v1261_v31 = vmul.f32 %v4307_v37, %v1258_v59  ;;  %v1262_v27 = vmul.f32 %v4313_v7, %v1258_v59  ;;  %v1251_v25 = vadd.f32 %v1247_v63, %v1239_v23  ;;  %v4319_v0 = vld [vmem:[%s5274_s0 + $0x140] sm:$0xff]  ;;  %v4325_v37 = vld [vmem:[%s5274_s0 + $0x148] sm:$0xff] }
 0x23b   : > { %5790 = vst [vmem:[#allocation34_spill] sm:$0xff] %v4313_v7  ;;  %v1252_v62 = vadd.f32 %v1248_v10, %v1240_v28  ;;  %v1253_v8 = vadd.f32 %v1249_v47, %v1241_v32  ;;  %v1254_v12 = vadd.f32 %v1250_v53, %v1242_v4  ;;  %5791 = vst [vmem:[#allocation35_spill] sm:$0xff] %v4319_v0  ;;  %v4331_v28 = vld [vmem:[%s5274_s0 + $0x150] sm:$0xff]  ;;  %v4337_v59 = vld [vmem:[%s5274_s0 + $0x158] sm:$0xff] }
 0x23c   : > { %v1271_v41 = vmul.f32 %v4319_v0, %v1270_v42  ;;  %5792 = vst [vmem:[#allocation36_spill] sm:$0xff] %v4325_v37  ;;  %v1272_v9 = vmul.f32 %v4325_v37, %v1270_v42  ;;  %5793 = vst [vmem:[#allocation37_spill] sm:$0xff] %v4331_v28  ;;  %v1273_v32 = vmul.f32 %v4331_v28, %v1270_v42  ;;  %v4343_v53 = vld [vmem:[%s5274_s0 + $0x160] sm:$0xff]  ;;  %v4349_v28 = vld [vmem:[%s5274_s0 + $0x168] sm:$0xff] }
 0x23d   : > { %5794 = vst [vmem:[#allocation38_spill] sm:$0xff] %v4337_v59  ;;  %v1274_v23 = vmul.f32 %v4337_v59, %v1270_v42  ;;  %v1263_v4 = vadd.f32 %v1259_v45, %v1251_v25  ;;  %v1264_v63 = vadd.f32 %v1260_v22, %v1252_v62  ;;  %v1265_v10 = vadd.f32 %v1261_v31, %v1253_v8  ;;  %v4355_v42 = vld [vmem:[%s5274_s0 + $0x170] sm:$0xff]  ;;  %v4361_v8 = vld [vmem:[%s5274_s0 + $0x178] sm:$0xff] }
 0x23e   : > { %v1266_v47 = vadd.f32 %v1262_v27, %v1254_v12  ;;  %5795 = vst [vmem:[#allocation39_spill] sm:$0xff] %v4343_v53  ;;  %v1283_v37 = vmul.f32 %v4343_v53, %v1282_v60  ;;  %5796 = vst [vmem:[#allocation40_spill] sm:$0xff] %v4349_v28  ;;  %v1284_v0 = vmul.f32 %v4349_v28, %v1282_v60 }
 0x23f   : > { %5797 = vst [vmem:[#allocation41_spill] sm:$0xff] %v4355_v42  ;;  %v1285_v12 = vmul.f32 %v4355_v42, %v1282_v60  ;;  %5798 = vst [vmem:[#allocation42_spill] sm:$0xff] %v4361_v8  ;;  %v1286_v62 = vmul.f32 %v4361_v8, %v1282_v60  ;;  %v1275_v45 = vadd.f32 %v1271_v41, %v1263_v4  ;;  %v4393_v4 = vld [vmem:[%s5274_s0 + $0x198] sm:$0xff] }
 0x240   : > { %v1276_v22 = vadd.f32 %v1272_v9, %v1264_v63  ;;  %v1277_v31 = vadd.f32 %v1273_v32, %v1265_v10  ;;  %v1278_v27 = vadd.f32 %v1274_v23, %v1266_v47  ;;  %v1294_v25 = vrot.slane %v4032_v61, %v2822_v55  ;;  %v4375_v9 = vld [vmem:[%s5274_s0 + $0x180] sm:$0xff]  ;;  %v4381_v32 = vld [vmem:[%s5274_s0 + $0x188] sm:$0xff]  ;;  %5802 = vst [vmem:[#allocation46_spill] sm:$0xff] %v4393_v4 }
 0x241   : > { %v1306_v28 = vrot.slane %v4032_v61, %v2824_v56  ;;  %v1318_v42 = vrot.slane %v4032_v61, %v2826_v57  ;;  %v1330_v53 = vrot.slane %v4032_v61, %v2828_v58  ;;  %v1287_v59 = vadd.f32 %v1283_v37, %v1275_v45  ;;  %5799 = vst [vmem:[#allocation43_spill] sm:$0xff] %v4375_v9  ;;  %v4399_v10 = vld [vmem:[%s5274_s0 + $0x1a0] sm:$0xff]  ;;  %v4411_v45 = vld [vmem:[%s5274_s0 + $0x1b0] sm:$0xff] }
 0x242   : > { %v1288_v7 = vadd.f32 %v1284_v0, %v1276_v22  ;;  %v1289_v13 = vadd.f32 %v1285_v12, %v1277_v31  ;;  %v1290_v60 = vadd.f32 %v1286_v62, %v1278_v27  ;;  %v1295_v41 = vmul.f32 %v4375_v9, %v1294_v25  ;;  %5800 = vst [vmem:[#allocation44_spill] sm:$0xff] %v4381_v32  ;;  %v4387_v0 = vld [vmem:[%s5274_s0 + $0x190] sm:$0xff]  ;;  %v4405_v12 = vld [vmem:[%s5274_s0 + $0x1a8] sm:$0xff]  ;;  %v4417_v31 = vld [vmem:[%s5274_s0 + $0x1b8] sm:$0xff] }
 0x243   : > { %v1296_v23 = vmul.f32 %v4381_v32, %v1294_v25  ;;  %5801 = vst [vmem:[#allocation45_spill] sm:$0xff] %v4387_v0  ;;  %v1297_v37 = vmul.f32 %v4387_v0, %v1294_v25  ;;  %v1298_v63 = vmul.f32 %v4393_v4, %v1294_v25  ;;  %5803 = vst [vmem:[#allocation47_spill] sm:$0xff] %v4399_v10 }
 0x244   : > { %v1307_v47 = vmul.f32 %v4399_v10, %v1306_v28  ;;  %5804 = vst [vmem:[#allocation48_spill] sm:$0xff] %v4405_v12  ;;  %v1308_v62 = vmul.f32 %v4405_v12, %v1306_v28  ;;  %5805 = vst [vmem:[#allocation49_spill] sm:$0xff] %v4411_v45  ;;  %v1309_v22 = vmul.f32 %v4411_v45, %v1306_v28  ;;  %v4423_v12 = vld [vmem:[%s5274_s0 + $0x1c0] sm:$0xff]  ;;  %v4429_v45 = vld [vmem:[%s5274_s0 + $0x1c8] sm:$0xff] }
 0x245   : > { %5806 = vst [vmem:[#allocation50_spill] sm:$0xff] %v4417_v31  ;;  %v1310_v27 = vmul.f32 %v4417_v31, %v1306_v28  ;;  %v1299_v25 = vadd.f32 %v1295_v41, %v1287_v59  ;;  %v1300_v10 = vadd.f32 %v1296_v23, %v1288_v7  ;;  %v1301_v4 = vadd.f32 %v1297_v37, %v1289_v13  ;;  %v4435_v7 = vld [vmem:[%s5274_s0 + $0x1d0] sm:$0xff]  ;;  %v4441_v28 = vld [vmem:[%s5274_s0 + $0x1d8] sm:$0xff] }
 0x246   : > { %v1302_v0 = vadd.f32 %v1298_v63, %v1290_v60  ;;  %5807 = vst [vmem:[#allocation51_spill] sm:$0xff] %v4423_v12  ;;  %v1319_v32 = vmul.f32 %v4423_v12, %v1318_v42  ;;  %5808 = vst [vmem:[#allocation52_spill] sm:$0xff] %v4429_v45  ;;  %v1320_v9 = vmul.f32 %v4429_v45, %v1318_v42  ;;  %v4447_v63 = vld [vmem:[%s5274_s0 + $0x1e0] sm:$0xff] }
 0x247   : > { %5809 = vst [vmem:[#allocation53_spill] sm:$0xff] %v4435_v7  ;;  %v1321_v13 = vmul.f32 %v4435_v7, %v1318_v42  ;;  %5810 = vst [vmem:[#allocation54_spill] sm:$0xff] %v4441_v28  ;;  %v1322_v59 = vmul.f32 %v4441_v28, %v1318_v42  ;;  %v1311_v60 = vadd.f32 %v1307_v47, %v1299_v25  ;;  %v4453_v7 = vld [vmem:[%s5274_s0 + $0x1e8] sm:$0xff]  ;;  %v4459_v42 = vld [vmem:[%s5274_s0 + $0x1f0] sm:$0xff] }
 0x248   : > { %v1312_v41 = vadd.f32 %v1308_v62, %v1300_v10  ;;  %v1313_v23 = vadd.f32 %v1309_v22, %v1301_v4  ;;  %v1314_v37 = vadd.f32 %v1310_v27, %v1302_v0  ;;  %5811 = vst [vmem:[#allocation55_spill] sm:$0xff] %v4447_v63  ;;  %v1331_v45 = vmul.f32 %v4447_v63, %v1330_v53  ;;  %v4465_v4 = vld [vmem:[%s5274_s0 + $0x1f8] sm:$0xff] }
 0x249   : > { %5812 = vst [vmem:[#allocation56_spill] sm:$0xff] %v4453_v7  ;;  %v1332_v12 = vmul.f32 %v4453_v7, %v1330_v53  ;;  %5813 = vst [vmem:[#allocation57_spill] sm:$0xff] %v4459_v42  ;;  %v1333_v0 = vmul.f32 %v4459_v42, %v1330_v53  ;;  %v1334_v10 = vmul.f32 %v4465_v4, %v1330_v53 }
 0x24a   : > { %5814 = vst [vmem:[#allocation58_spill] sm:$0xff] %v4465_v4  ;;  %v1323_v47 = vadd.f32 %v1319_v32, %v1311_v60  ;;  %v1324_v62 = vadd.f32 %v1320_v9, %v1312_v41  ;;  %v1325_v22 = vadd.f32 %v1321_v13, %v1313_v23  ;;  %v1326_v27 = vadd.f32 %v1322_v59, %v1314_v37  ;;  %v4479_v9 = vld [vmem:[%s5274_s0 + $0x200] sm:$0xff]  ;;  %v4485_v13 = vld [vmem:[%s5274_s0 + $0x208] sm:$0xff]  ;;  %v4497_v60 = vld [vmem:[%s5274_s0 + $0x218] sm:$0xff] }
 0x24b   : > { %v1342_v25 = vrot.slane %v4035_v2, %v2812_v46  ;;  %v1354_v7 = vrot.slane %v4035_v2, %v2816_v48  ;;  %v1366_v42 = vrot.slane %v4035_v2, %v2818_v49  ;;  %v1378_v63 = vrot.slane %v4035_v2, %v2820_v50  ;;  %5815 = vst [vmem:[#allocation59_spill] sm:$0xff] %v4479_v9  ;;  %v4503_v23 = vld [vmem:[%s5274_s0 + $0x220] sm:$0xff] }
 0x24c   : > { %v1335_v28 = vadd.f32 %v1331_v45, %v1323_v47  ;;  %v1336_v31 = vadd.f32 %v1332_v12, %v1324_v62  ;;  %v1337_v8 = vadd.f32 %v1333_v0, %v1325_v22  ;;  %v1338_v53 = vadd.f32 %v1334_v10, %v1326_v27  ;;  %5816 = vst [vmem:[#allocation60_spill] sm:$0xff] %v4485_v13  ;;  %v4491_v12 = vld [vmem:[%s5274_s0 + $0x210] sm:$0xff]  ;;  %v4509_v0 = vld [vmem:[%s5274_s0 + $0x228] sm:$0xff]  ;;  %v4521_v22 = vld [vmem:[%s5274_s0 + $0x238] sm:$0xff] }
 0x24d   : > { %v1343_v32 = vmul.f32 %v4479_v9, %v1342_v25  ;;  %v1344_v59 = vmul.f32 %v4485_v13, %v1342_v25  ;;  %5817 = vst [vmem:[#allocation61_spill] sm:$0xff] %v4491_v12  ;;  %v1345_v45 = vmul.f32 %v4491_v12, %v1342_v25  ;;  %5818 = vst [vmem:[#allocation62_spill] sm:$0xff] %v4497_v60  ;;  %v4515_v47 = vld [vmem:[%s5274_s0 + $0x230] sm:$0xff] }
 0x24e   : > { %v1346_v41 = vmul.f32 %v4497_v60, %v1342_v25  ;;  %5819 = vst [vmem:[#allocation63_spill] sm:$0xff] %v4503_v23  ;;  %v1355_v37 = vmul.f32 %v4503_v23, %v1354_v7  ;;  %5820 = vst [vmem:[#allocation64_spill] sm:$0xff] %v4509_v0  ;;  %v1356_v10 = vmul.f32 %v4509_v0, %v1354_v7  ;;  %v4527_v0 = vld [vmem:[%s5274_s0 + $0x240] sm:$0xff] }
 0x24f   : > { %5821 = vst [vmem:[#allocation65_spill] sm:$0xff] %v4515_v47  ;;  %v1357_v62 = vmul.f32 %v4515_v47, %v1354_v7  ;;  %5822 = vst [vmem:[#allocation66_spill] sm:$0xff] %v4521_v22  ;;  %v1358_v27 = vmul.f32 %v4521_v22, %v1354_v7  ;;  %v1347_v25 = vadd.f32 %v1343_v32, %v1335_v28  ;;  %v4533_v47 = vld [vmem:[%s5274_s0 + $0x248] sm:$0xff]  ;;  %v4545_v7 = vld [vmem:[%s5274_s0 + $0x258] sm:$0xff] }
 0x250   : > { %v1348_v23 = vadd.f32 %v1344_v59, %v1336_v31  ;;  %v1349_v60 = vadd.f32 %v1345_v45, %v1337_v8  ;;  %v1350_v12 = vadd.f32 %v1346_v41, %v1338_v53  ;;  %5823 = vst [vmem:[#allocation67_spill] sm:$0xff] %v4527_v0  ;;  %v1367_v13 = vmul.f32 %v4527_v0, %v1366_v42  ;;  %v4539_v31 = vld [vmem:[%s5274_s0 + $0x250] sm:$0xff]  ;;  %v4551_v41 = vld [vmem:[%s5274_s0 + $0x260] sm:$0xff] }
 0x251   : > { %5824 = vst [vmem:[#allocation68_spill] sm:$0xff] %v4533_v47  ;;  %v1368_v9 = vmul.f32 %v4533_v47, %v1366_v42  ;;  %5825 = vst [vmem:[#allocation69_spill] sm:$0xff] %v4539_v31  ;;  %v1369_v8 = vmul.f32 %v4539_v31, %v1366_v42  ;;  %v1370_v28 = vmul.f32 %v4545_v7, %v1366_v42  ;;  %v4557_v31 = vld [vmem:[%s5274_s0 + $0x268] sm:$0xff]  ;;  %v4563_v42 = vld [vmem:[%s5274_s0 + $0x270] sm:$0xff] }
 0x252   : > { %5826 = vst [vmem:[#allocation70_spill] sm:$0xff] %v4545_v7  ;;  %v1359_v53 = vadd.f32 %v1355_v37, %v1347_v25  ;;  %v1360_v32 = vadd.f32 %v1356_v10, %v1348_v23  ;;  %v1361_v59 = vadd.f32 %v1357_v62, %v1349_v60  ;;  %v1362_v45 = vadd.f32 %v1358_v27, %v1350_v12  ;;  %v4569_v60 = vld [vmem:[%s5274_s0 + $0x278] sm:$0xff] }
 0x253   : > { %5827 = vst [vmem:[#allocation71_spill] sm:$0xff] %v4551_v41  ;;  %v1379_v47 = vmul.f32 %v4551_v41, %v1378_v63  ;;  %5828 = vst [vmem:[#allocation72_spill] sm:$0xff] %v4557_v31  ;;  %v1380_v0 = vmul.f32 %v4557_v31, %v1378_v63  ;;  %v1381_v12 = vmul.f32 %v4563_v42, %v1378_v63 }
 0x254   : > { %5829 = vst [vmem:[#allocation73_spill] sm:$0xff] %v4563_v42  ;;  %5830 = vst [vmem:[#allocation74_spill] sm:$0xff] %v4569_v60  ;;  %v1382_v23 = vmul.f32 %v4569_v60, %v1378_v63  ;;  %v1371_v37 = vadd.f32 %v1367_v13, %v1359_v53  ;;  %v1372_v10 = vadd.f32 %v1368_v9, %v1360_v32  ;;  %v4583_v9 = vld [vmem:[%s5274_s0 + $0x280] sm:$0xff]  ;;  %v4601_v53 = vld [vmem:[%s5274_s0 + $0x298] sm:$0xff] }
 0x255   : > { %v1373_v62 = vadd.f32 %v1369_v8, %v1361_v59  ;;  %v1374_v27 = vadd.f32 %v1370_v28, %v1362_v45  ;;  %v1390_v25 = vrot.slane %v4035_v2, %v2822_v55  ;;  %v1402_v31 = vrot.slane %v4035_v2, %v2824_v56  ;;  %5831 = vst [vmem:[#allocation75_spill] sm:$0xff] %v4583_v9  ;;  %v4589_v8 = vld [vmem:[%s5274_s0 + $0x288] sm:$0xff]  ;;  %v4607_v59 = vld [vmem:[%s5274_s0 + $0x2a0] sm:$0xff] }
 0x256   : > { %v1414_v42 = vrot.slane %v4035_v2, %v2826_v57  ;;  %v1426_v41 = vrot.slane %v4035_v2, %v2828_v58  ;;  %v1383_v7 = vadd.f32 %v1379_v47, %v1371_v37  ;;  %v1384_v22 = vadd.f32 %v1380_v0, %v1372_v10  ;;  %5832 = vst [vmem:[#allocation76_spill] sm:$0xff] %v4589_v8  ;;  %v4595_v0 = vld [vmem:[%s5274_s0 + $0x290] sm:$0xff] }
 0x257   : > { %v1385_v4 = vadd.f32 %v1381_v12, %v1373_v62  ;;  %v1386_v63 = vadd.f32 %v1382_v23, %v1374_v27  ;;  %v1391_v13 = vmul.f32 %v4583_v9, %v1390_v25  ;;  %v1392_v28 = vmul.f32 %v4589_v8, %v1390_v25  ;;  %5833 = vst [vmem:[#allocation77_spill] sm:$0xff] %v4595_v0  ;;  %v4613_v12 = vld [vmem:[%s5274_s0 + $0x2a8] sm:$0xff]  ;;  %v4619_v37 = vld [vmem:[%s5274_s0 + $0x2b0] sm:$0xff]  ;;  %v4625_v62 = vld [vmem:[%s5274_s0 + $0x2b8] sm:$0xff] }
 0x258   : > { %v1393_v47 = vmul.f32 %v4595_v0, %v1390_v25  ;;  %5834 = vst [vmem:[#allocation78_spill] sm:$0xff] %v4601_v53  ;;  %v1394_v32 = vmul.f32 %v4601_v53, %v1390_v25  ;;  %5835 = vst [vmem:[#allocation79_spill] sm:$0xff] %v4607_v59  ;;  %v1403_v45 = vmul.f32 %v4607_v59, %v1402_v31 }
 0x259   : > { %5836 = vst [vmem:[#allocation80_spill] sm:$0xff] %v4613_v12  ;;  %v1404_v23 = vmul.f32 %v4613_v12, %v1402_v31  ;;  %5837 = vst [vmem:[#allocation81_spill] sm:$0xff] %v4619_v37  ;;  %v1405_v10 = vmul.f32 %v4619_v37, %v1402_v31  ;;  %v1406_v27 = vmul.f32 %v4625_v62, %v1402_v31  ;;  %v4631_v12 = vld [vmem:[%s5274_s0 + $0x2c0] sm:$0xff]  ;;  %v4637_v37 = vld [vmem:[%s5274_s0 + $0x2c8] sm:$0xff] }
 0x25a   : > { %5838 = vst [vmem:[#allocation82_spill] sm:$0xff] %v4625_v62  ;;  %v1395_v25 = vadd.f32 %v1391_v13, %v1383_v7  ;;  %v1396_v59 = vadd.f32 %v1392_v28, %v1384_v22  ;;  %v1397_v53 = vadd.f32 %v1393_v47, %v1385_v4  ;;  %v1398_v0 = vadd.f32 %v1394_v32, %v1386_v63  ;;  %v4643_v22 = vld [vmem:[%s5274_s0 + $0x2d0] sm:$0xff]  ;;  %v4649_v31 = vld [vmem:[%s5274_s0 + $0x2d8] sm:$0xff]  ;;  %v4655_v32 = vld [vmem:[%s5274_s0 + $0x2e0] sm:$0xff] }
 0x25b   : > { %5839 = vst [vmem:[#allocation83_spill] sm:$0xff] %v4631_v12  ;;  %v1415_v8 = vmul.f32 %v4631_v12, %v1414_v42  ;;  %5840 = vst [vmem:[#allocation84_spill] sm:$0xff] %v4637_v37  ;;  %v1416_v9 = vmul.f32 %v4637_v37, %v1414_v42  ;;  %v1417_v4 = vmul.f32 %v4643_v22, %v1414_v42 }
 0x25c   : > { %5841 = vst [vmem:[#allocation85_spill] sm:$0xff] %v4643_v22  ;;  %5842 = vst [vmem:[#allocation86_spill] sm:$0xff] %v4649_v31  ;;  %v1418_v7 = vmul.f32 %v4649_v31, %v1414_v42  ;;  %v1407_v63 = vadd.f32 %v1403_v45, %v1395_v25  ;;  %v1408_v13 = vadd.f32 %v1404_v23, %v1396_v59  ;;  %v4661_v22 = vld [vmem:[%s5274_s0 + $0x2e8] sm:$0xff]  ;;  %v4667_v42 = vld [vmem:[%s5274_s0 + $0x2f0] sm:$0xff] }
 0x25d   : > { %v1409_v28 = vadd.f32 %v1405_v10, %v1397_v53  ;;  %v1410_v47 = vadd.f32 %v1406_v27, %v1398_v0  ;;  %5843 = vst [vmem:[#allocation87_spill] sm:$0xff] %v4655_v32  ;;  %v1427_v37 = vmul.f32 %v4655_v32, %v1426_v41  ;;  %5844 = vst [vmem:[#allocation88_spill] sm:$0xff] %v4661_v22  ;;  %v4673_v53 = vld [vmem:[%s5274_s0 + $0x2f8] sm:$0xff] }
 0x25e   : > { %v1428_v12 = vmul.f32 %v4661_v22, %v1426_v41  ;;  %5845 = vst [vmem:[#allocation89_spill] sm:$0xff] %v4667_v42  ;;  %v1429_v0 = vmul.f32 %v4667_v42, %v1426_v41  ;;  %5846 = vst [vmem:[#allocation90_spill] sm:$0xff] %v4673_v53  ;;  %v1430_v59 = vmul.f32 %v4673_v53, %v1426_v41 }
 0x25f   : > { %v1419_v45 = vadd.f32 %v1415_v8, %v1407_v63  ;;  %v1420_v23 = vadd.f32 %v1416_v9, %v1408_v13  ;;  %v1421_v10 = vadd.f32 %v1417_v4, %v1409_v28  ;;  %v1422_v27 = vadd.f32 %v1418_v7, %v1410_v47  ;;  %v4687_v9 = vld [vmem:[%s5274_s0 + $0x300] sm:$0xff]  ;;  %v4693_v4 = vld [vmem:[%s5274_s0 + $0x308] sm:$0xff]  ;;  %v4705_v63 = vld [vmem:[%s5274_s0 + $0x318] sm:$0xff] }
 0x260   : > { %v1438_v25 = vrot.slane %v4038_v52, %v2812_v46  ;;  %v1450_v22 = vrot.slane %v4038_v52, %v2816_v48  ;;  %v1462_v42 = vrot.slane %v4038_v52, %v2818_v49  ;;  %v1474_v32 = vrot.slane %v4038_v52, %v2820_v50  ;;  %5847 = vst [vmem:[#allocation91_spill] sm:$0xff] %v4687_v9  ;;  %v4711_v28 = vld [vmem:[%s5274_s0 + $0x320] sm:$0xff] }
 0x261   : > { %v1431_v31 = vadd.f32 %v1427_v37, %v1419_v45  ;;  %v1432_v62 = vadd.f32 %v1428_v12, %v1420_v23  ;;  %v1433_v60 = vadd.f32 %v1429_v0, %v1421_v10  ;;  %v1434_v41 = vadd.f32 %v1430_v59, %v1422_v27  ;;  %5848 = vst [vmem:[#allocation92_spill] sm:$0xff] %v4693_v4  ;;  %v4699_v12 = vld [vmem:[%s5274_s0 + $0x310] sm:$0xff]  ;;  %v4717_v0 = vld [vmem:[%s5274_s0 + $0x328] sm:$0xff]  ;;  %v4729_v10 = vld [vmem:[%s5274_s0 + $0x338] sm:$0xff] }
 0x262   : > { %v1439_v8 = vmul.f32 %v4687_v9, %v1438_v25  ;;  %v1440_v7 = vmul.f32 %v4693_v4, %v1438_v25  ;;  %5849 = vst [vmem:[#allocation93_spill] sm:$0xff] %v4699_v12  ;;  %v1441_v37 = vmul.f32 %v4699_v12, %v1438_v25  ;;  %5850 = vst [vmem:[#allocation94_spill] sm:$0xff] %v4705_v63  ;;  %v4723_v45 = vld [vmem:[%s5274_s0 + $0x330] sm:$0xff] }
 0x263   : > { %v1442_v13 = vmul.f32 %v4705_v63, %v1438_v25  ;;  %5851 = vst [vmem:[#allocation95_spill] sm:$0xff] %v4711_v28  ;;  %v1451_v47 = vmul.f32 %v4711_v28, %v1450_v22  ;;  %5852 = vst [vmem:[#allocation96_spill] sm:$0xff] %v4717_v0  ;;  %v1452_v59 = vmul.f32 %v4717_v0, %v1450_v22  ;;  %v4735_v0 = vld [vmem:[%s5274_s0 + $0x340] sm:$0xff] }
 0x264   : > { %5853 = vst [vmem:[#allocation97_spill] sm:$0xff] %v4723_v45  ;;  %v1453_v23 = vmul.f32 %v4723_v45, %v1450_v22  ;;  %5854 = vst [vmem:[#allocation98_spill] sm:$0xff] %v4729_v10  ;;  %v1454_v27 = vmul.f32 %v4729_v10, %v1450_v22  ;;  %v1443_v25 = vadd.f32 %v1439_v8, %v1431_v31  ;;  %v4741_v45 = vld [vmem:[%s5274_s0 + $0x348] sm:$0xff]  ;;  %v4753_v22 = vld [vmem:[%s5274_s0 + $0x358] sm:$0xff] }
 0x265   : > { %v1444_v28 = vadd.f32 %v1440_v7, %v1432_v62  ;;  %v1445_v63 = vadd.f32 %v1441_v37, %v1433_v60  ;;  %v1446_v12 = vadd.f32 %v1442_v13, %v1434_v41  ;;  %5855 = vst [vmem:[#allocation99_spill] sm:$0xff] %v4735_v0  ;;  %v1463_v4 = vmul.f32 %v4735_v0, %v1462_v42  ;;  %v4747_v62 = vld [vmem:[%s5274_s0 + $0x350] sm:$0xff]  ;;  %v4759_v13 = vld [vmem:[%s5274_s0 + $0x360] sm:$0xff] }
 0x266   : > { %5856 = vst [vmem:[#allocation100_spill] sm:$0xff] %v4741_v45  ;;  %v1464_v9 = vmul.f32 %v4741_v45, %v1462_v42  ;;  %5857 = vst [vmem:[#allocation101_spill] sm:$0xff] %v4747_v62  ;;  %v1465_v60 = vmul.f32 %v4747_v62, %v1462_v42  ;;  %v1466_v31 = vmul.f32 %v4753_v22, %v1462_v42  ;;  %v4765_v62 = vld [vmem:[%s5274_s0 + $0x368] sm:$0xff]  ;;  %v4771_v42 = vld [vmem:[%s5274_s0 + $0x370] sm:$0xff] }
 0x267   : > { %5858 = vst [vmem:[#allocation102_spill] sm:$0xff] %v4753_v22  ;;  %v1455_v41 = vadd.f32 %v1451_v47, %v1443_v25  ;;  %v1456_v8 = vadd.f32 %v1452_v59, %v1444_v28  ;;  %v1457_v7 = vadd.f32 %v1453_v23, %v1445_v63  ;;  %v1458_v37 = vadd.f32 %v1454_v27, %v1446_v12  ;;  %v4777_v63 = vld [vmem:[%s5274_s0 + $0x378] sm:$0xff] }
 0x268   : > { %5859 = vst [vmem:[#allocation103_spill] sm:$0xff] %v4759_v13  ;;  %v1475_v45 = vmul.f32 %v4759_v13, %v1474_v32  ;;  %5860 = vst [vmem:[#allocation104_spill] sm:$0xff] %v4765_v62  ;;  %v1476_v0 = vmul.f32 %v4765_v62, %v1474_v32  ;;  %v1477_v12 = vmul.f32 %v4771_v42, %v1474_v32 }
 0x269   : > { %5861 = vst [vmem:[#allocation105_spill] sm:$0xff] %v4771_v42  ;;  %5862 = vst [vmem:[#allocation106_spill] sm:$0xff] %v4777_v63  ;;  %v1478_v28 = vmul.f32 %v4777_v63, %v1474_v32  ;;  %v1467_v47 = vadd.f32 %v1463_v4, %v1455_v41  ;;  %v1468_v59 = vadd.f32 %v1464_v9, %v1456_v8  ;;  %v4791_v9 = vld [vmem:[%s5274_s0 + $0x380] sm:$0xff]  ;;  %v4809_v41 = vld [vmem:[%s5274_s0 + $0x398] sm:$0xff] }
 0x26a   : > { %v1469_v23 = vadd.f32 %v1465_v60, %v1457_v7  ;;  %v1470_v27 = vadd.f32 %v1466_v31, %v1458_v37  ;;  %v1486_v25 = vrot.slane %v4038_v52, %v2822_v55  ;;  %v1498_v62 = vrot.slane %v4038_v52, %v2824_v56  ;;  %5863 = vst [vmem:[#allocation107_spill] sm:$0xff] %v4791_v9  ;;  %v4797_v60 = vld [vmem:[%s5274_s0 + $0x388] sm:$0xff]  ;;  %v4815_v7 = vld [vmem:[%s5274_s0 + $0x3a0] sm:$0xff] }
 0x26b   : > { %v1510_v42 = vrot.slane %v4038_v52, %v2826_v57  ;;  %v1522_v13 = vrot.slane %v4038_v52, %v2828_v58  ;;  %v1479_v22 = vadd.f32 %v1475_v45, %v1467_v47  ;;  %v1480_v10 = vadd.f32 %v1476_v0, %v1468_v59  ;;  %5864 = vst [vmem:[#allocation108_spill] sm:$0xff] %v4797_v60  ;;  %v4803_v0 = vld [vmem:[%s5274_s0 + $0x390] sm:$0xff] }
 0x26c   : > { %v1481_v53 = vadd.f32 %v1477_v12, %v1469_v23  ;;  %v1482_v32 = vadd.f32 %v1478_v28, %v1470_v27  ;;  %v1487_v4 = vmul.f32 %v4791_v9, %v1486_v25  ;;  %v1488_v31 = vmul.f32 %v4797_v60, %v1486_v25  ;;  %5865 = vst [vmem:[#allocation109_spill] sm:$0xff] %v4803_v0  ;;  %v4821_v12 = vld [vmem:[%s5274_s0 + $0x3a8] sm:$0xff]  ;;  %v4827_v47 = vld [vmem:[%s5274_s0 + $0x3b0] sm:$0xff]  ;;  %v4833_v23 = vld [vmem:[%s5274_s0 + $0x3b8] sm:$0xff] }
 0x26d   : > { %v1489_v45 = vmul.f32 %v4803_v0, %v1486_v25  ;;  %5866 = vst [vmem:[#allocation110_spill] sm:$0xff] %v4809_v41  ;;  %v1490_v8 = vmul.f32 %v4809_v41, %v1486_v25  ;;  %5867 = vst [vmem:[#allocation111_spill] sm:$0xff] %v4815_v7  ;;  %v1499_v37 = vmul.f32 %v4815_v7, %v1498_v62 }
 0x26e   : > { %5868 = vst [vmem:[#allocation112_spill] sm:$0xff] %v4821_v12  ;;  %v1500_v28 = vmul.f32 %v4821_v12, %v1498_v62  ;;  %5869 = vst [vmem:[#allocation113_spill] sm:$0xff] %v4827_v47  ;;  %v1501_v59 = vmul.f32 %v4827_v47, %v1498_v62  ;;  %v1502_v27 = vmul.f32 %v4833_v23, %v1498_v62  ;;  %v4839_v12 = vld [vmem:[%s5274_s0 + $0x3c0] sm:$0xff]  ;;  %v4845_v47 = vld [vmem:[%s5274_s0 + $0x3c8] sm:$0xff] }
 0x26f   : > { %5870 = vst [vmem:[#allocation114_spill] sm:$0xff] %v4833_v23  ;;  %v1491_v25 = vadd.f32 %v1487_v4, %v1479_v22  ;;  %v1492_v7 = vadd.f32 %v1488_v31, %v1480_v10  ;;  %v1493_v41 = vadd.f32 %v1489_v45, %v1481_v53  ;;  %v1494_v0 = vadd.f32 %v1490_v8, %v1482_v32  ;;  %v4851_v10 = vld [vmem:[%s5274_s0 + $0x3d0] sm:$0xff]  ;;  %v4857_v62 = vld [vmem:[%s5274_s0 + $0x3d8] sm:$0xff]  ;;  %v4863_v8 = vld [vmem:[%s5274_s0 + $0x3e0] sm:$0xff] }
 0x270   : > { %5871 = vst [vmem:[#allocation115_spill] sm:$0xff] %v4839_v12  ;;  %v1511_v60 = vmul.f32 %v4839_v12, %v1510_v42  ;;  %5872 = vst [vmem:[#allocation116_spill] sm:$0xff] %v4845_v47  ;;  %v1512_v9 = vmul.f32 %v4845_v47, %v1510_v42  ;;  %v1513_v53 = vmul.f32 %v4851_v10, %v1510_v42 }
 0x271   : > { %5873 = vst [vmem:[#allocation117_spill] sm:$0xff] %v4851_v10  ;;  %5874 = vst [vmem:[#allocation118_spill] sm:$0xff] %v4857_v62  ;;  %v1514_v22 = vmul.f32 %v4857_v62, %v1510_v42  ;;  %v1503_v32 = vadd.f32 %v1499_v37, %v1491_v25  ;;  %v1504_v4 = vadd.f32 %v1500_v28, %v1492_v7  ;;  %v4869_v10 = vld [vmem:[%s5274_s0 + $0x3e8] sm:$0xff]  ;;  %v4875_v42 = vld [vmem:[%s5274_s0 + $0x3f0] sm:$0xff] }
 0x272   : > { %v1505_v31 = vadd.f32 %v1501_v59, %v1493_v41  ;;  %v1506_v45 = vadd.f32 %v1502_v27, %v1494_v0  ;;  %5875 = vst [vmem:[#allocation119_spill] sm:$0xff] %v4863_v8  ;;  %v1523_v47 = vmul.f32 %v4863_v8, %v1522_v13  ;;  %5876 = vst [vmem:[#allocation120_spill] sm:$0xff] %v4869_v10  ;;  %v4881_v41 = vld [vmem:[%s5274_s0 + $0x3f8] sm:$0xff] }
 0x273   : > { %v1524_v12 = vmul.f32 %v4869_v10, %v1522_v13  ;;  %5877 = vst [vmem:[#allocation7_spill] sm:$0xff] %v4875_v42  ;;  %v1525_v0 = vmul.f32 %v4875_v42, %v1522_v13  ;;  %v1526_v7 = vmul.f32 %v4881_v41, %v1522_v13  ;;  %v1515_v37 = vadd.f32 %v1511_v60, %v1503_v32 }
 0x274   : > { %v1516_v28 = vadd.f32 %v1512_v9, %v1504_v4  ;;  %v1517_v59 = vadd.f32 %v1513_v53, %v1505_v31  ;;  %v1518_v27 = vadd.f32 %v1514_v22, %v1506_v45 }
 0x275   : > { %v1527_v25 = vadd.f32 %v1523_v47, %v1515_v37 }
 0x276   : > { %v1528_v10 = vadd.f32 %v1524_v12, %v1516_v28  ;;  %v1529_v8 = vadd.f32 %v1525_v0, %v1517_v59  ;;  %v1530_v62 = vadd.f32 %v1526_v7, %v1518_v27 }
 0x277   : > { %v1531_v23 = vmul.f32 %v1527_v25, %v4029_v43 }
 0x278   : > { %v1532_v63 = vmul.f32 %v1528_v10, %v4032_v61  ;;  %v1533_v42 = vmul.f32 %v1529_v8, %v4035_v2  ;;  %v1534_v54 = vmul.f32 %v1530_v62, %v4038_v52 }
 0x279   : > { %v1535_v15 = vsel %vm19_vm0, %v1531_v23, 0.0 }
 0x27a   : > { %v1536_v13 = vsel %vm19_vm0, %v1532_v63, 0.0  ;;  %v1538_v9 = vsel %vm19_vm0, %v1533_v42, 0.0  ;;  %v1540_v47 = vsel %vm19_vm0, %v1534_v54, 0.0 }
 0x27b   : > { %v1537_v60 = vadd.f32 %v1536_v13, %v1535_v15 }
 0x27d   : > { %v1539_v12 = vadd.f32 %v1538_v9, %v1537_v60 }
 0x27f   : > { %v1541_v53 = vadd.f32 %v1540_v47, %v1539_v12 }
 0x281   : > { %v1542_v22 = vrot.slane %v1541_v53, 4 }
 0x283   : > { %v1543_v32 = vadd.f32 %v1542_v22, %v1541_v53 }
 0x285   : > { %v1544_v4 = vrot.slane %v1543_v32, 2 }
 0x287   : > { %v1545_v31 = vadd.f32 %v1544_v4, %v1543_v32 }
 0x289   : > { %v1546_v45 = vrot.slane %v1545_v31, 1 }
 0x28b   : > { %v1547_v0 = vadd.f32 %v1546_v45, %v1545_v31 }
 0x28d   : > { %vm1548_vm15 = vcmp.ne.f32.partialorder %v1547_v0, 0.0 }
 0x28e   : > { %v1549_v7 = vsel %vm1548_vm15, %v1547_v0, 1.0 }
 0x28f   : > { %2399 = vrcp.f32 %v1549_v7 }
 0x29c   : > { %v2400_v37 = vpop.eup %2399 }
 0x29d   : > { %v1551_v23 = vmul.f32 %v2400_v37, %v4011_v14 }
 0x29f   : > { %v1552_v63 = vsel %vm4018_vm14, 0.0, %v1551_v23 }
 0x2a0   : > { %v1553_v15 = vmul.f32 %v1552_v63, %v4029_v43  ;;  %v1554_v54 = vmul.f32 %v1552_v63, %v4032_v61  ;;  %v1555_v42 = vmul.f32 %v1552_v63, %v4035_v2  ;;  %v1556_v28 = vmul.f32 %v1552_v63, %v4038_v52 }
 0x2a1   : > { %v1561_v59 = vmul.f32 %v1552_v63, %v1527_v25  ;;  %v1562_v27 = vmul.f32 %v1552_v63, %v1528_v10  ;;  %v1563_v13 = vmul.f32 %v1552_v63, %v1529_v8  ;;  %v1564_v9 = vmul.f32 %v1552_v63, %v1530_v62 }
 0x2a2   : > { %v4900_v60 = vadd.f32 %v1553_v15, %v3977_v18  ;;  %v4903_v47 = vadd.f32 %v1554_v54, %v3979_v3  ;;  %v4906_v1 = vadd.f32 %v1555_v42, %v3981_v20  ;;  %v4909_v12 = vadd.f32 %v1556_v28, %v3983_v30 }
 0x2a3   : > { %v4912_v53 = vsub.f32 %v3986_v39, %v1561_v59  ;;  %v4915_v25 = vsub.f32 %v3989_v51, %v1562_v27  ;;  %v4918_v10 = vsub.f32 %v3992_v33, %v1563_v13  ;;  %v4921_v18 = vsub.f32 %v3995_v6, %v1564_v9 }
 0x2a4   : > { %v1589_v62 = vsel %vm1588_vm2, %v4011_v14, 1.0 }
 0x2a5   : > { %v1569_v3 = vmul.f32 %v4912_v53, %v4912_v53  ;;  %v1570_v20 = vmul.f32 %v4915_v25, %v4915_v25  ;;  %v1571_v30 = vmul.f32 %v4918_v10, %v4918_v10  ;;  %v1572_v39 = vmul.f32 %v4921_v18, %v4921_v18 }
 0x2a6   : > { %2401 = vrcp.f32 %v1589_v62 }
 0x2a7   : > { %v1573_v51 = vsel %vm19_vm0, %v1569_v3, 0.0  ;;  %v1574_v33 = vsel %vm19_vm0, %v1570_v20, 0.0  ;;  %v1576_v6 = vsel %vm19_vm0, %v1571_v30, 0.0  ;;  %v1578_v22 = vsel %vm19_vm0, %v1572_v39, 0.0 }
 0x2a8   : > { %v1575_v8 = vadd.f32 %v1574_v33, %v1573_v51 }
 0x2aa   : > { %v1577_v32 = vadd.f32 %v1576_v6, %v1575_v8 }
 0x2ac   : > { %v1579_v4 = vadd.f32 %v1578_v22, %v1577_v32 }
 0x2ae   : > { %v1580_v31 = vrot.slane %v1579_v4, 4 }
 0x2b0   : > { %v1581_v45 = vadd.f32 %v1580_v31, %v1579_v4 }
 0x2b2   : > { %v1582_v0 = vrot.slane %v1581_v45, 2 }
 0x2b3   : > { %v2402_v23 = vpop.eup %2401 }
 0x2b4   : > { %v1583_v7 = vadd.f32 %v1582_v0, %v1581_v45 }
 0x2b6   : > { %v1584_v37 = vrot.slane %v1583_v7, 1 }
 0x2b8   : > { %v4937_v31 = vadd.f32 %v1584_v37, %v1583_v7  }
 0x2ba   : > { %vm1586_vm3 = vcmp.lt.f32.partialorder %v4937_v31, %v5760_v26  ;;  %v1591_v63 = vmul.f32 %v2402_v23, %v4937_v31 }
 0x2bb   : > { %vm4944_vm4 = vmor %vm1586_vm3, %vm34_vm1 }
 0x2bc   : > { %v1592_v15 = vsel %vm4944_vm4, 0.0, %v1591_v63  ;;  %v5880_v63 = vld [vmem:[#allocation8_spill] sm:$0xff] }
 0x2bd   : > { %v1593_v54 = vmul.f32 %v1592_v15, %v4029_v43  ;;  %v1594_v42 = vmul.f32 %v1592_v15, %v4032_v61  ;;  %v1595_v28 = vmul.f32 %v1592_v15, %v4035_v2  ;;  %v1596_v59 = vmul.f32 %v1592_v15, %v4038_v52 }
 0x2bf   : > { %v4955_v27 = vadd.f32 %v1593_v54, %v4912_v53   ;;  %v4958_v13 = vadd.f32 %v1594_v42, %v4915_v25   ;;  %v4961_v33 = vadd.f32 %v1595_v28, %v4918_v10   ;;  %v4964_v32 = vadd.f32 %v1596_v59, %v4921_v18  }
 0x2c1   : > { %v1604_v43 = vrot.slane %v4955_v27, %v2812_v46  ;;  %v1616_v61 = vrot.slane %v4955_v27, %v2816_v48  ;;  %v1628_v2 = vrot.slane %v4955_v27, %v2818_v49  ;;  %v1640_v52 = vrot.slane %v4955_v27, %v2820_v50 }
 0x2c2   : > { %v1652_v9 = vrot.slane %v4955_v27, %v2822_v55  ;;  %v1664_v3 = vrot.slane %v4955_v27, %v2824_v56  ;;  %v1676_v20 = vrot.slane %v4955_v27, %v2826_v57  ;;  %v1688_v30 = vrot.slane %v4955_v27, %v2828_v58 }
 0x2c3   : > { %v1605_v39 = vmul.f32 %v4063_v5, %v1604_v43  ;;  %v1606_v51 = vmul.f32 %v4069_v21, %v1604_v43  ;;  %v1607_v6 = vmul.f32 %v4075_v29, %v1604_v43  ;;  %v1608_v62 = vmul.f32 %v4081_v24, %v1604_v43 }
 0x2c4   : > { %v1617_v8 = vmul.f32 %v4087_v17, %v1616_v61  ;;  %v1618_v22 = vmul.f32 %v4093_v38, %v1616_v61  ;;  %v1619_v4 = vmul.f32 %v4099_v36, %v1616_v61  ;;  %v1620_v45 = vmul.f32 %v4105_v35, %v1616_v61  ;;  %v5881_v36 = vld [vmem:[#allocation9_spill] sm:$0xff]  ;;  %v5882_v35 = vld [vmem:[#allocation10_spill] sm:$0xff] }
 0x2c5   : > { %v1629_v0 = vmul.f32 %v4111_v34, %v1628_v2  ;;  %v1630_v7 = vmul.f32 %v4117_v44, %v1628_v2  ;;  %v1631_v5 = vmul.f32 %v4123_v40, %v1628_v2  ;;  %v1632_v21 = vmul.f32 %v4129_v16, %v1628_v2  ;;  %v5883_v40 = vld [vmem:[#allocation11_spill] sm:$0xff]  ;;  %v5884_v16 = vld [vmem:[#allocation12_spill] sm:$0xff]  ;;  %v5885_v61 = vld [vmem:[#allocation13_spill] sm:$0xff] }
 0x2c6   : > { %v1621_v37 = vadd.f32 %v1617_v8, %v1605_v39  ;;  %v1622_v29 = vadd.f32 %v1618_v22, %v1606_v51  ;;  %v1623_v23 = vadd.f32 %v1619_v4, %v1607_v6  ;;  %v1624_v24 = vadd.f32 %v1620_v45, %v1608_v62  ;;  %v5886_v39 = vld [vmem:[#allocation14_spill] sm:$0xff]  ;;  %v5887_v22 = vld [vmem:[#allocation15_spill] sm:$0xff] }
 0x2c7   : > { %v1641_v17 = vmul.f32 %v4135_v11, %v1640_v52  ;;  %v1642_v38 = vmul.f32 %v5880_v63, %v1640_v52  ;;  %v1643_v15 = vmul.f32 %v5881_v36, %v1640_v52  ;;  %v1644_v54 = vmul.f32 %v5882_v35, %v1640_v52  ;;  %v5888_v52 = vld [vmem:[#allocation16_spill] sm:$0xff]  ;;  %v5891_v63 = vld [vmem:[#allocation19_spill] sm:$0xff]  ;;  %v5894_v35 = vld [vmem:[#allocation22_spill] sm:$0xff] }
 0x2c8   : > { %v1633_v34 = vadd.f32 %v1629_v0, %v1621_v37  ;;  %v1634_v42 = vadd.f32 %v1630_v7, %v1622_v29  ;;  %v1635_v44 = vadd.f32 %v1631_v5, %v1623_v23  ;;  %v1636_v28 = vadd.f32 %v1632_v21, %v1624_v24  ;;  %v5889_v0 = vld [vmem:[#allocation17_spill] sm:$0xff]  ;;  %v5890_v5 = vld [vmem:[#allocation18_spill] sm:$0xff] }
 0x2c9   : > { %v1653_v59 = vmul.f32 %v5883_v40, %v1652_v9  ;;  %v1654_v43 = vmul.f32 %v5884_v16, %v1652_v9  ;;  %v1655_v2 = vmul.f32 %v5885_v61, %v1652_v9  ;;  %v1656_v51 = vmul.f32 %v5886_v39, %v1652_v9  ;;  %v5892_v9 = vld [vmem:[#allocation20_spill] sm:$0xff]  ;;  %v5895_v40 = vld [vmem:[#allocation23_spill] sm:$0xff] }
 0x2ca   : > { %v1645_v11 = vadd.f32 %v1641_v17, %v1633_v34  ;;  %v1646_v6 = vadd.f32 %v1642_v38, %v1634_v42  ;;  %v1647_v62 = vadd.f32 %v1643_v15, %v1635_v44  ;;  %v1648_v8 = vadd.f32 %v1644_v54, %v1636_v28  ;;  %v5893_v38 = vld [vmem:[#allocation21_spill] sm:$0xff]  ;;  %v5896_v61 = vld [vmem:[#allocation24_spill] sm:$0xff] }
 0x2cb   : > { %v1665_v4 = vmul.f32 %v5887_v22, %v1664_v3  ;;  %v1666_v45 = vmul.f32 %v5888_v52, %v1664_v3  ;;  %v1667_v7 = vmul.f32 %v5889_v0, %v1664_v3  ;;  %v1668_v21 = vmul.f32 %v5890_v5, %v1664_v3 }
 0x2cc   : > { %v1657_v37 = vadd.f32 %v1653_v59, %v1645_v11  ;;  %v1658_v29 = vadd.f32 %v1654_v43, %v1646_v6  ;;  %v1659_v23 = vadd.f32 %v1655_v2, %v1647_v62  ;;  %v1660_v24 = vadd.f32 %v1656_v51, %v1648_v8  ;;  %v5897_v59 = vld [vmem:[#allocation25_spill] sm:$0xff]  ;;  %v5898_v2 = vld [vmem:[#allocation26_spill] sm:$0xff] }
 0x2cd   : > { %v1677_v36 = vmul.f32 %v5891_v63, %v1676_v20  ;;  %v1678_v17 = vmul.f32 %v5892_v9, %v1676_v20  ;;  %v1679_v15 = vmul.f32 %v5893_v38, %v1676_v20  ;;  %v1680_v54 = vmul.f32 %v5894_v35, %v1676_v20 }
 0x2ce   : > { %v1669_v34 = vadd.f32 %v1665_v4, %v1657_v37  ;;  %v1670_v42 = vadd.f32 %v1666_v45, %v1658_v29  ;;  %v1671_v44 = vadd.f32 %v1667_v7, %v1659_v23  ;;  %v1672_v28 = vadd.f32 %v1668_v21, %v1660_v24  ;;  %v5899_v7 = vld [vmem:[#allocation27_spill] sm:$0xff]  ;;  %v5900_v21 = vld [vmem:[#allocation28_spill] sm:$0xff]  ;;  %v5901_v29 = vld [vmem:[#allocation29_spill] sm:$0xff] }
 0x2cf   : > { %v1689_v16 = vmul.f32 %v5895_v40, %v1688_v30  ;;  %v1690_v3 = vmul.f32 %v5896_v61, %v1688_v30  ;;  %v1691_v43 = vmul.f32 %v5897_v59, %v1688_v30  ;;  %v1692_v39 = vmul.f32 %v5898_v2, %v1688_v30  ;;  %v5902_v24 = vld [vmem:[#allocation30_spill] sm:$0xff] }
 0x2d0   : > { %v1681_v51 = vadd.f32 %v1677_v36, %v1669_v34  ;;  %v1682_v11 = vadd.f32 %v1678_v17, %v1670_v42  ;;  %v1683_v6 = vadd.f32 %v1679_v15, %v1671_v44  ;;  %v1684_v62 = vadd.f32 %v1680_v54, %v1672_v28  ;;  %v5903_v36 = vld [vmem:[#allocation31_spill] sm:$0xff]  ;;  %v5904_v17 = vld [vmem:[#allocation32_spill] sm:$0xff]  ;;  %v5905_v15 = vld [vmem:[#allocation33_spill] sm:$0xff] }
 0x2d1   : > { %v1700_v8 = vrot.slane %v4958_v13, %v2812_v46  ;;  %v1712_v20 = vrot.slane %v4958_v13, %v2816_v48  ;;  %v1724_v22 = vrot.slane %v4958_v13, %v2818_v49  ;;  %v1736_v4 = vrot.slane %v4958_v13, %v2820_v50  ;;  %v5906_v54 = vld [vmem:[#allocation34_spill] sm:$0xff] }
 0x2d2   : > { %v1693_v52 = vadd.f32 %v1689_v16, %v1681_v51  ;;  %v1694_v45 = vadd.f32 %v1690_v3, %v1682_v11  ;;  %v1695_v0 = vadd.f32 %v1691_v43, %v1683_v6  ;;  %v1696_v30 = vadd.f32 %v1692_v39, %v1684_v62  ;;  %v5907_v16 = vld [vmem:[#allocation35_spill] sm:$0xff]  ;;  %v5908_v3 = vld [vmem:[#allocation36_spill] sm:$0xff]  ;;  %v5909_v43 = vld [vmem:[#allocation37_spill] sm:$0xff] }
 0x2d3   : > { %v1701_v5 = vmul.f32 %v5899_v7, %v1700_v8  ;;  %v1702_v37 = vmul.f32 %v5900_v21, %v1700_v8  ;;  %v1703_v23 = vmul.f32 %v5901_v29, %v1700_v8  ;;  %v1704_v63 = vmul.f32 %v5902_v24, %v1700_v8  ;;  %v5910_v39 = vld [vmem:[#allocation38_spill] sm:$0xff]  ;;  %v5911_v7 = vld [vmem:[#allocation39_spill] sm:$0xff]  ;;  %v5912_v29 = vld [vmem:[#allocation40_spill] sm:$0xff] }
 0x2d4   : > { %v1713_v9 = vmul.f32 %v5903_v36, %v1712_v20  ;;  %v1714_v38 = vmul.f32 %v5904_v17, %v1712_v20  ;;  %v1715_v35 = vmul.f32 %v5905_v15, %v1712_v20  ;;  %v1716_v34 = vmul.f32 %v5906_v54, %v1712_v20 }
 0x2d5   : > { %v1705_v42 = vadd.f32 %v1701_v5, %v1693_v52  ;;  %v1706_v44 = vadd.f32 %v1702_v37, %v1694_v45  ;;  %v1707_v28 = vadd.f32 %v1703_v23, %v1695_v0  ;;  %v1708_v40 = vadd.f32 %v1704_v63, %v1696_v30  ;;  %v5913_v52 = vld [vmem:[#allocation41_spill] sm:$0xff]  ;;  %v5914_v0 = vld [vmem:[#allocation42_spill] sm:$0xff] }
 0x2d6   : > { %v1725_v61 = vmul.f32 %v5907_v16, %v1724_v22  ;;  %v1726_v59 = vmul.f32 %v5908_v3, %v1724_v22  ;;  %v1727_v2 = vmul.f32 %v5909_v43, %v1724_v22  ;;  %v1728_v51 = vmul.f32 %v5910_v39, %v1724_v22 }
 0x2d7   : > { %v1717_v11 = vadd.f32 %v1713_v9, %v1705_v42  ;;  %v1718_v6 = vadd.f32 %v1714_v38, %v1706_v44  ;;  %v1719_v62 = vadd.f32 %v1715_v35, %v1707_v28  ;;  %v1720_v8 = vadd.f32 %v1716_v34, %v1708_v40  ;;  %v5915_v35 = vld [vmem:[#allocation43_spill] sm:$0xff]  ;;  %v5916_v34 = vld [vmem:[#allocation44_spill] sm:$0xff]  ;;  %v5917_v44 = vld [vmem:[#allocation45_spill] sm:$0xff] }
 0x2d8   : > { %v1737_v21 = vmul.f32 %v5911_v7, %v1736_v4  ;;  %v1738_v20 = vmul.f32 %v5912_v29, %v1736_v4  ;;  %v1739_v45 = vmul.f32 %v5913_v52, %v1736_v4  ;;  %v1740_v30 = vmul.f32 %v5914_v0, %v1736_v4  ;;  %v5918_v40 = vld [vmem:[#allocation46_spill] sm:$0xff] }
 0x2d9   : > { %v1729_v5 = vadd.f32 %v1725_v61, %v1717_v11  ;;  %v1730_v37 = vadd.f32 %v1726_v59, %v1718_v6  ;;  %v1731_v23 = vadd.f32 %v1727_v2, %v1719_v62  ;;  %v1732_v24 = vadd.f32 %v1728_v51, %v1720_v8  ;;  %v5919_v61 = vld [vmem:[#allocation47_spill] sm:$0xff]  ;;  %v5920_v59 = vld [vmem:[#allocation48_spill] sm:$0xff]  ;;  %v5921_v2 = vld [vmem:[#allocation49_spill] sm:$0xff] }
 0x2da   : > { %v1748_v63 = vrot.slane %v4958_v13, %v2822_v55  ;;  %v1760_v22 = vrot.slane %v4958_v13, %v2824_v56  ;;  %v1772_v36 = vrot.slane %v4958_v13, %v2826_v57  ;;  %v1784_v9 = vrot.slane %v4958_v13, %v2828_v58  ;;  %v5922_v51 = vld [vmem:[#allocation50_spill] sm:$0xff] }
 0x2db   : > { %v1741_v17 = vadd.f32 %v1737_v21, %v1729_v5  ;;  %v1742_v38 = vadd.f32 %v1738_v20, %v1730_v37  ;;  %v1743_v15 = vadd.f32 %v1739_v45, %v1731_v23  ;;  %v1744_v4 = vadd.f32 %v1740_v30, %v1732_v24  ;;  %v5923_v21 = vld [vmem:[#allocation51_spill] sm:$0xff]  ;;  %v5924_v20 = vld [vmem:[#allocation52_spill] sm:$0xff]  ;;  %v5925_v45 = vld [vmem:[#allocation53_spill] sm:$0xff] }
 0x2dc   : > { %v1749_v54 = vmul.f32 %v5915_v35, %v1748_v63  ;;  %v1750_v42 = vmul.f32 %v5916_v34, %v1748_v63  ;;  %v1751_v28 = vmul.f32 %v5917_v44, %v1748_v63  ;;  %v1752_v16 = vmul.f32 %v5918_v40, %v1748_v63  ;;  %v5926_v30 = vld [vmem:[#allocation54_spill] sm:$0xff]  ;;  %v5927_v35 = vld [vmem:[#allocation55_spill] sm:$0xff]  ;;  %v5928_v44 = vld [vmem:[#allocation56_spill] sm:$0xff] }
 0x2dd   : > { %v1761_v3 = vmul.f32 %v5919_v61, %v1760_v22  ;;  %v1762_v43 = vmul.f32 %v5920_v59, %v1760_v22  ;;  %v1763_v39 = vmul.f32 %v5921_v2, %v1760_v22  ;;  %v1764_v11 = vmul.f32 %v5922_v51, %v1760_v22 }
 0x2de   : > { %v1753_v6 = vadd.f32 %v1749_v54, %v1741_v17  ;;  %v1754_v62 = vadd.f32 %v1750_v42, %v1742_v38  ;;  %v1755_v8 = vadd.f32 %v1751_v28, %v1743_v15  ;;  %v1756_v7 = vadd.f32 %v1752_v16, %v1744_v4  ;;  %v5929_v17 = vld [vmem:[#allocation57_spill] sm:$0xff]  ;;  %v5930_v15 = vld [vmem:[#allocation58_spill] sm:$0xff] }
 0x2df   : > { %v1773_v29 = vmul.f32 %v5923_v21, %v1772_v36  ;;  %v1774_v52 = vmul.f32 %v5924_v20, %v1772_v36  ;;  %v1775_v0 = vmul.f32 %v5925_v45, %v1772_v36  ;;  %v1776_v5 = vmul.f32 %v5926_v30, %v1772_v36 }
 0x2e0   : > { %v1765_v37 = vadd.f32 %v1761_v3, %v1753_v6  ;;  %v1766_v23 = vadd.f32 %v1762_v43, %v1754_v62  ;;  %v1767_v24 = vadd.f32 %v1763_v39, %v1755_v8  ;;  %v1768_v63 = vadd.f32 %v1764_v11, %v1756_v7  ;;  %v5931_v39 = vld [vmem:[#allocation59_spill] sm:$0xff]  ;;  %v5932_v11 = vld [vmem:[#allocation60_spill] sm:$0xff]  ;;  %v5933_v62 = vld [vmem:[#allocation61_spill] sm:$0xff] }
 0x2e1   : > { %v1785_v34 = vmul.f32 %v5927_v35, %v1784_v9  ;;  %v1786_v22 = vmul.f32 %v5928_v44, %v1784_v9  ;;  %v1787_v38 = vmul.f32 %v5929_v17, %v1784_v9  ;;  %v1788_v4 = vmul.f32 %v5930_v15, %v1784_v9  ;;  %v5934_v7 = vld [vmem:[#allocation62_spill] sm:$0xff] }
 0x2e2   : > { %v1777_v54 = vadd.f32 %v1773_v29, %v1765_v37  ;;  %v1778_v42 = vadd.f32 %v1774_v52, %v1766_v23  ;;  %v1779_v28 = vadd.f32 %v1775_v0, %v1767_v24  ;;  %v1780_v40 = vadd.f32 %v1776_v5, %v1768_v63  ;;  %v5935_v29 = vld [vmem:[#allocation63_spill] sm:$0xff]  ;;  %v5936_v52 = vld [vmem:[#allocation64_spill] sm:$0xff]  ;;  %v5937_v0 = vld [vmem:[#allocation65_spill] sm:$0xff] }
 0x2e3   : > { %v1796_v16 = vrot.slane %v4961_v33, %v2812_v46  ;;  %v1808_v36 = vrot.slane %v4961_v33, %v2816_v48  ;;  %v1820_v61 = vrot.slane %v4961_v33, %v2818_v49  ;;  %v1832_v3 = vrot.slane %v4961_v33, %v2820_v50  ;;  %v5938_v5 = vld [vmem:[#allocation66_spill] sm:$0xff] }
 0x2e4   : > { %v1789_v59 = vadd.f32 %v1785_v34, %v1777_v54  ;;  %v1790_v43 = vadd.f32 %v1786_v22, %v1778_v42  ;;  %v1791_v2 = vadd.f32 %v1787_v38, %v1779_v28  ;;  %v1792_v9 = vadd.f32 %v1788_v4, %v1780_v40  ;;  %v5939_v34 = vld [vmem:[#allocation67_spill] sm:$0xff]  ;;  %v5940_v22 = vld [vmem:[#allocation68_spill] sm:$0xff]  ;;  %v5941_v38 = vld [vmem:[#allocation69_spill] sm:$0xff] }
 0x2e5   : > { %v1797_v51 = vmul.f32 %v5931_v39, %v1796_v16  ;;  %v1798_v6 = vmul.f32 %v5932_v11, %v1796_v16  ;;  %v1799_v8 = vmul.f32 %v5933_v62, %v1796_v16  ;;  %v1800_v21 = vmul.f32 %v5934_v7, %v1796_v16  ;;  %v5942_v4 = vld [vmem:[#allocation70_spill] sm:$0xff]  ;;  %v5943_v39 = vld [vmem:[#allocation71_spill] sm:$0xff]  ;;  %v5944_v62 = vld [vmem:[#allocation72_spill] sm:$0xff] }
 0x2e6   : > { %v1809_v20 = vmul.f32 %v5935_v29, %v1808_v36  ;;  %v1810_v45 = vmul.f32 %v5936_v52, %v1808_v36  ;;  %v1811_v30 = vmul.f32 %v5937_v0, %v1808_v36  ;;  %v1812_v37 = vmul.f32 %v5938_v5, %v1808_v36 }
 0x2e7   : > { %v1801_v23 = vadd.f32 %v1797_v51, %v1789_v59  ;;  %v1802_v24 = vadd.f32 %v1798_v6, %v1790_v43  ;;  %v1803_v63 = vadd.f32 %v1799_v8, %v1791_v2  ;;  %v1804_v35 = vadd.f32 %v1800_v21, %v1792_v9  ;;  %v5945_v59 = vld [vmem:[#allocation73_spill] sm:$0xff]  ;;  %v5946_v2 = vld [vmem:[#allocation74_spill] sm:$0xff] }
 0x2e8   : > { %v1821_v44 = vmul.f32 %v5939_v34, %v1820_v61  ;;  %v1822_v17 = vmul.f32 %v5940_v22, %v1820_v61  ;;  %v1823_v15 = vmul.f32 %v5941_v38, %v1820_v61  ;;  %v1824_v54 = vmul.f32 %v5942_v4, %v1820_v61 }
 0x2e9   : > { %v1813_v42 = vadd.f32 %v1809_v20, %v1801_v23  ;;  %v1814_v28 = vadd.f32 %v1810_v45, %v1802_v24  ;;  %v1815_v40 = vadd.f32 %v1811_v30, %v1803_v63  ;;  %v1816_v16 = vadd.f32 %v1812_v37, %v1804_v35  ;;  %v5947_v30 = vld [vmem:[#allocation75_spill] sm:$0xff]  ;;  %v5948_v37 = vld [vmem:[#allocation76_spill] sm:$0xff]  ;;  %v5949_v24 = vld [vmem:[#allocation77_spill] sm:$0xff] }
 0x2ea   : > { %v1833_v11 = vmul.f32 %v5943_v39, %v1832_v3  ;;  %v1834_v36 = vmul.f32 %v5944_v62, %v1832_v3  ;;  %v1835_v43 = vmul.f32 %v5945_v59, %v1832_v3  ;;  %v1836_v9 = vmul.f32 %v5946_v2, %v1832_v3  ;;  %v5950_v35 = vld [vmem:[#allocation78_spill] sm:$0xff] }
 0x2eb   : > { %v1825_v51 = vadd.f32 %v1821_v44, %v1813_v42  ;;  %v1826_v6 = vadd.f32 %v1822_v17, %v1814_v28  ;;  %v1827_v8 = vadd.f32 %v1823_v15, %v1815_v40  ;;  %v1828_v7 = vadd.f32 %v1824_v54, %v1816_v16  ;;  %v5951_v44 = vld [vmem:[#allocation79_spill] sm:$0xff]  ;;  %v5952_v17 = vld [vmem:[#allocation80_spill] sm:$0xff]  ;;  %v5953_v15 = vld [vmem:[#allocation81_spill] sm:$0xff] }
 0x2ec   : > { %v1844_v21 = vrot.slane %v4961_v33, %v2822_v55  ;;  %v1856_v61 = vrot.slane %v4961_v33, %v2824_v56  ;;  %v1868_v29 = vrot.slane %v4961_v33, %v2826_v57  ;;  %v1880_v20 = vrot.slane %v4961_v33, %v2828_v58  ;;  %v5954_v54 = vld [vmem:[#allocation82_spill] sm:$0xff] }
 0x2ed   : > { %v1837_v52 = vadd.f32 %v1833_v11, %v1825_v51  ;;  %v1838_v45 = vadd.f32 %v1834_v36, %v1826_v6  ;;  %v1839_v0 = vadd.f32 %v1835_v43, %v1827_v8  ;;  %v1840_v3 = vadd.f32 %v1836_v9, %v1828_v7  ;;  %v5955_v11 = vld [vmem:[#allocation83_spill] sm:$0xff]  ;;  %v5956_v36 = vld [vmem:[#allocation84_spill] sm:$0xff]  ;;  %v5957_v43 = vld [vmem:[#allocation85_spill] sm:$0xff] }
 0x2ee   : > { %v1845_v5 = vmul.f32 %v5947_v30, %v1844_v21  ;;  %v1846_v23 = vmul.f32 %v5948_v37, %v1844_v21  ;;  %v1847_v63 = vmul.f32 %v5949_v24, %v1844_v21  ;;  %v1848_v34 = vmul.f32 %v5950_v35, %v1844_v21  ;;  %v5958_v9 = vld [vmem:[#allocation86_spill] sm:$0xff]  ;;  %v5959_v30 = vld [vmem:[#allocation87_spill] sm:$0xff]  ;;  %v5960_v24 = vld [vmem:[#allocation88_spill] sm:$0xff] }
 0x2ef   : > { %v1857_v22 = vmul.f32 %v5951_v44, %v1856_v61  ;;  %v1858_v38 = vmul.f32 %v5952_v17, %v1856_v61  ;;  %v1859_v4 = vmul.f32 %v5953_v15, %v1856_v61  ;;  %v1860_v42 = vmul.f32 %v5954_v54, %v1856_v61 }
 0x2f0   : > { %v1849_v28 = vadd.f32 %v1845_v5, %v1837_v52  ;;  %v1850_v40 = vadd.f32 %v1846_v23, %v1838_v45  ;;  %v1851_v16 = vadd.f32 %v1847_v63, %v1839_v0  ;;  %v1852_v39 = vadd.f32 %v1848_v34, %v1840_v3  ;;  %v5961_v52 = vld [vmem:[#allocation89_spill] sm:$0xff]  ;;  %v5962_v0 = vld [vmem:[#allocation90_spill] sm:$0xff] }
 0x2f1   : > { %v1869_v62 = vmul.f32 %v5955_v11, %v1868_v29  ;;  %v1870_v59 = vmul.f32 %v5956_v36, %v1868_v29  ;;  %v1871_v2 = vmul.f32 %v5957_v43, %v1868_v29  ;;  %v1872_v51 = vmul.f32 %v5958_v9, %v1868_v29  ;;  %v5967_v11 = vld [vmem:[#allocation95_spill] sm:$0xff]  ;;  %v5970_v43 = vld [vmem:[#allocation98_spill] sm:$0xff] }
 0x2f2   : > { %v1861_v6 = vadd.f32 %v1857_v22, %v1849_v28  ;;  %v1862_v8 = vadd.f32 %v1858_v38, %v1850_v40  ;;  %v1863_v7 = vadd.f32 %v1859_v4, %v1851_v16  ;;  %v1864_v21 = vadd.f32 %v1860_v42, %v1852_v39  ;;  %v5963_v4 = vld [vmem:[#allocation91_spill] sm:$0xff]  ;;  %v5964_v42 = vld [vmem:[#allocation92_spill] sm:$0xff]  ;;  %v5965_v40 = vld [vmem:[#allocation93_spill] sm:$0xff] }
 0x2f3   : > { %v1881_v37 = vmul.f32 %v5959_v30, %v1880_v20  ;;  %v1882_v61 = vmul.f32 %v5960_v24, %v1880_v20  ;;  %v1883_v45 = vmul.f32 %v5961_v52, %v1880_v20  ;;  %v1884_v3 = vmul.f32 %v5962_v0, %v1880_v20 }
 0x2f4   : > { %v1873_v5 = vadd.f32 %v1869_v62, %v1861_v6  ;;  %v1874_v23 = vadd.f32 %v1870_v59, %v1862_v8  ;;  %v1875_v63 = vadd.f32 %v1871_v2, %v1863_v7  ;;  %v1876_v35 = vadd.f32 %v1872_v51, %v1864_v21  ;;  %v5968_v62 = vld [vmem:[#allocation96_spill] sm:$0xff]  ;;  %v5971_v8 = vld [vmem:[#allocation99_spill] sm:$0xff] }
 0x2f5   : > { %v1892_v34 = vrot.slane %v4964_v32, %v2812_v46  ;;  %v1904_v29 = vrot.slane %v4964_v32, %v2816_v48  ;;  %v1916_v44 = vrot.slane %v4964_v32, %v2818_v49  ;;  %v1928_v22 = vrot.slane %v4964_v32, %v2820_v50  ;;  %v5966_v46 = vld [vmem:[#allocation94_spill] sm:$0xff]  ;;  %v5969_v49 = vld [vmem:[#allocation97_spill] sm:$0xff]  ;;  %v5972_v21 = vld [vmem:[#allocation100_spill] sm:$0xff] }
 0x2f6   : > { %v1885_v17 = vadd.f32 %v1881_v37, %v1873_v5  ;;  %v1886_v38 = vadd.f32 %v1882_v61, %v1874_v23  ;;  %v1887_v15 = vadd.f32 %v1883_v45, %v1875_v63  ;;  %v1888_v20 = vadd.f32 %v1884_v3, %v1876_v35  ;;  %v5973_v37 = vld [vmem:[#allocation101_spill] sm:$0xff]  ;;  %v5974_v61 = vld [vmem:[#allocation102_spill] sm:$0xff]  ;;  %v5975_v23 = vld [vmem:[#allocation103_spill] sm:$0xff] }
 0x2f7   : > { %v1893_v54 = vmul.f32 %v5963_v4, %v1892_v34  ;;  %v1894_v28 = vmul.f32 %v5964_v42, %v1892_v34  ;;  %v1895_v16 = vmul.f32 %v5965_v40, %v1892_v34  ;;  %v1896_v39 = vmul.f32 %v5966_v46, %v1892_v34  ;;  %v5976_v35 = vld [vmem:[#allocation104_spill] sm:$0xff] }
 0x2f8   : > { %v1905_v48 = vmul.f32 %v5967_v11, %v1904_v29  ;;  %v1906_v36 = vmul.f32 %v5968_v62, %v1904_v29  ;;  %v1907_v59 = vmul.f32 %v5969_v49, %v1904_v29  ;;  %v1908_v50 = vmul.f32 %v5970_v43, %v1904_v29  ;;  %v5977_v29 = vld [vmem:[#allocation105_spill] sm:$0xff] }
 0x2f9   : > { %v1897_v2 = vadd.f32 %v1893_v54, %v1885_v17  ;;  %v1898_v9 = vadd.f32 %v1894_v28, %v1886_v38  ;;  %v1899_v51 = vadd.f32 %v1895_v16, %v1887_v15  ;;  %v1900_v6 = vadd.f32 %v1896_v39, %v1888_v20  ;;  %v5978_v38 = vld [vmem:[#allocation106_spill] sm:$0xff] }
 0x2fa   : > { %v1917_v7 = vmul.f32 %v5971_v8, %v1916_v44  ;;  %v1918_v30 = vmul.f32 %v5972_v21, %v1916_v44  ;;  %v1919_v24 = vmul.f32 %v5973_v37, %v1916_v44  ;;  %v1920_v52 = vmul.f32 %v5974_v61, %v1916_v44  ;;  %v5986_v8 = vld [vmem:[#allocation114_spill] sm:$0xff] }
 0x2fb   : > { %v1909_v45 = vadd.f32 %v1905_v48, %v1897_v2  ;;  %v1910_v0 = vadd.f32 %v1906_v36, %v1898_v9  ;;  %v1911_v3 = vadd.f32 %v1907_v59, %v1899_v51  ;;  %v1912_v5 = vadd.f32 %v1908_v50, %v1900_v6  ;;  %v5979_v48 = vld [vmem:[#allocation107_spill] sm:$0xff]  ;;  %v5980_v36 = vld [vmem:[#allocation108_spill] sm:$0xff]  ;;  %v5981_v59 = vld [vmem:[#allocation109_spill] sm:$0xff] }
 0x2fc   : > { %v1929_v63 = vmul.f32 %v5975_v23, %v1928_v22  ;;  %v1930_v34 = vmul.f32 %v5976_v35, %v1928_v22  ;;  %v1931_v17 = vmul.f32 %v5977_v29, %v1928_v22  ;;  %v1932_v15 = vmul.f32 %v5978_v38, %v1928_v22  ;;  %v5983_v2 = vld [vmem:[#allocation111_spill] sm:$0xff]  ;;  %v5984_v9 = vld [vmem:[#allocation112_spill] sm:$0xff] }
 0x2fd   : > { %v1921_v20 = vadd.f32 %v1917_v7, %v1909_v45  ;;  %v1922_v4 = vadd.f32 %v1918_v30, %v1910_v0  ;;  %v1923_v54 = vadd.f32 %v1919_v24, %v1911_v3  ;;  %v1924_v42 = vadd.f32 %v1920_v52, %v1912_v5  ;;  %v5987_v24 = vld [vmem:[#allocation115_spill] sm:$0xff]  ;;  %v5988_v52 = vld [vmem:[#allocation116_spill] sm:$0xff]  ;;  %v5989_v0 = vld [vmem:[#allocation117_spill] sm:$0xff] }
 0x2fe   : > { %v1940_v28 = vrot.slane %v4964_v32, %v2822_v55  ;;  %v1952_v44 = vrot.slane %v4964_v32, %v2824_v56  ;;  %v1964_v40 = vrot.slane %v4964_v32, %v2826_v57  ;;  %v1976_v16 = vrot.slane %v4964_v32, %v2828_v58  ;;  %v5982_v55 = vld [vmem:[#allocation110_spill] sm:$0xff]  ;;  %v5985_v57 = vld [vmem:[#allocation113_spill] sm:$0xff] }
 0x2ff   : > { %v1933_v46 = vadd.f32 %v1929_v63, %v1921_v20  ;;  %v1934_v39 = vadd.f32 %v1930_v34, %v1922_v4  ;;  %v1935_v11 = vadd.f32 %v1931_v17, %v1923_v54  ;;  %v1936_v22 = vadd.f32 %v1932_v15, %v1924_v42  ;;  %v5990_v5 = vld [vmem:[#allocation118_spill] sm:$0xff]  ;;  %v5991_v17 = vld [vmem:[#allocation119_spill] sm:$0xff]  ;;  %v5992_v15 = vld [vmem:[#allocation120_spill] sm:$0xff] }
 0x300   : > { %v1941_v62 = vmul.f32 %v5979_v48, %v1940_v28  ;;  %v1942_v49 = vmul.f32 %v5980_v36, %v1940_v28  ;;  %v1943_v43 = vmul.f32 %v5981_v59, %v1940_v28  ;;  %v1944_v50 = vmul.f32 %v5982_v55, %v1940_v28  ;;  %v5993_v4 = vld [vmem:[#allocation7_spill] sm:$0xff] }
 0x301   : > { %v1953_v56 = vmul.f32 %v5983_v2, %v1952_v44  ;;  %v1954_v51 = vmul.f32 %v5984_v9, %v1952_v44  ;;  %v1955_v6 = vmul.f32 %v5985_v57, %v1952_v44  ;;  %v1956_v58 = vmul.f32 %v5986_v8, %v1952_v44 }
 0x302   : > { %v1945_v7 = vadd.f32 %v1941_v62, %v1933_v46  ;;  %v1946_v21 = vadd.f32 %v1942_v49, %v1934_v39  ;;  %v1947_v30 = vadd.f32 %v1943_v43, %v1935_v11  ;;  %v1948_v37 = vadd.f32 %v1944_v50, %v1936_v22 }
 0x303   : > { %v1965_v61 = vmul.f32 %v5987_v24, %v1964_v40  ;;  %v1966_v45 = vmul.f32 %v5988_v52, %v1964_v40  ;;  %v1967_v3 = vmul.f32 %v5989_v0, %v1964_v40  ;;  %v1968_v23 = vmul.f32 %v5990_v5, %v1964_v40 }
 0x304   : > { %v1957_v63 = vadd.f32 %v1953_v56, %v1945_v7  ;;  %v1958_v35 = vadd.f32 %v1954_v51, %v1946_v21  ;;  %v1959_v34 = vadd.f32 %v1955_v6, %v1947_v30  ;;  %v1960_v29 = vadd.f32 %v1956_v58, %v1948_v37 }
 0x305   : > { %v1977_v38 = vmul.f32 %v5991_v17, %v1976_v16  ;;  %v1978_v20 = vmul.f32 %v5992_v15, %v1976_v16  ;;  %v1979_v54 = vmul.f32 %v5993_v4, %v1976_v16  ;;  %v1980_v42 = vmul.f32 %v4881_v41, %v1976_v16 }
 0x306   : > { %v1969_v28 = vadd.f32 %v1965_v61, %v1957_v63  ;;  %v1970_v44 = vadd.f32 %v1966_v45, %v1958_v35  ;;  %v1971_v46 = vadd.f32 %v1967_v3, %v1959_v34  ;;  %v1972_v39 = vadd.f32 %v1968_v23, %v1960_v29 }
 0x308   : > { %v1981_v11 = vadd.f32 %v1977_v38, %v1969_v28  ;;  %v1982_v22 = vadd.f32 %v1978_v20, %v1970_v44  ;;  %v1983_v48 = vadd.f32 %v1979_v54, %v1971_v46  ;;  %v1984_v40 = vadd.f32 %v1980_v42, %v1972_v39 }
 0x309   : > { %v2686_v44 = vmov 0.0  }
 0x30a   : > { %v1985_v62 = vmul.f32 %v1981_v11, %v4955_v27  ;;  %v1986_v36 = vmul.f32 %v1982_v22, %v4958_v13  ;;  %v1987_v49 = vmul.f32 %v1983_v48, %v4961_v33  ;;  %v1988_v59 = vmul.f32 %v1984_v40, %v4964_v32 }
 0x30c   : > { %v1989_v43 = vsel %vm19_vm0, %v1985_v62, 0.0  ;;  %v1990_v41 = vsel %vm19_vm0, %v1986_v36, 0.0  ;;  %v1992_v16 = vsel %vm19_vm0, %v1987_v49, 0.0  ;;  %v1994_v50 = vsel %vm19_vm0, %v1988_v59, 0.0 }
 0x30d   : > { %v1991_v55 = vadd.f32 %v1990_v41, %v1989_v43 }
 0x30f   : > { %v1993_v2 = vadd.f32 %v1992_v16, %v1991_v55 }
 0x311   : > { %v1995_v56 = vadd.f32 %v1994_v50, %v1993_v2 }
 0x313   : > { %v1996_v9 = vrot.slane %v1995_v56, 4 }
 0x315   : > { %v1997_v51 = vadd.f32 %v1996_v9, %v1995_v56 }
 0x317   : > { %v1998_v57 = vrot.slane %v1997_v51, 2 }
 0x319   : > { %v1999_v6 = vadd.f32 %v1998_v57, %v1997_v51 }
 0x31b   : > { %v2000_v8 = vrot.slane %v1999_v6, 1 }
 0x31d   : > { %v2001_v58 = vadd.f32 %v2000_v8, %v1999_v6 }
 0x31f   : > { %vm2002_vm5 = vcmp.ne.f32.partialorder %v2001_v58, 0.0 }
 0x320   : > { %v2003_v7 = vsel %vm2002_vm5, %v2001_v58, 1.0 }
 0x321   : > { %2403 = vrcp.f32 %v2003_v7 }
 0x32e   : > { %v2404_v21 = vpop.eup %2403 }
 0x32f   : > { %v2005_v30 = vmul.f32 %v2404_v21, %v4937_v31 }
 0x331   : > { %v2006_v37 = vsel %vm4944_vm4, 0.0, %v2005_v30 }
 0x332   : > { %v2007_v24 = vmul.f32 %v2006_v37, %v4955_v27  ;;  %v2008_v61 = vmul.f32 %v2006_v37, %v4958_v13  ;;  %v2009_v52 = vmul.f32 %v2006_v37, %v4961_v33  ;;  %v2010_v45 = vmul.f32 %v2006_v37, %v4964_v32 }
 0x333   : > { %v2015_v0 = vmul.f32 %v2006_v37, %v1981_v11  ;;  %v2016_v3 = vmul.f32 %v2006_v37, %v1982_v22  ;;  %v2017_v5 = vmul.f32 %v2006_v37, %v1983_v48  ;;  %v2018_v23 = vmul.f32 %v2006_v37, %v1984_v40 }
 0x334   : > { %v2011_v63 = vadd.f32 %v2007_v24, %v4900_v60   ;;  %v2012_v29 = vadd.f32 %v2008_v61, %v4903_v47   ;;  %v2013_v17 = vadd.f32 %v2009_v52, %v4906_v1   ;;  %v2014_v14 = vadd.f32 %v2010_v45, %v4909_v12  }
 0x335   : > { %v2019_v0 = vsub.f32 %v4912_v53, %v2015_v0   ;;  %v2020_v1 = vsub.f32 %v4915_v25, %v2016_v3   ;;  %v2021_v2 = vsub.f32 %v4918_v10, %v2017_v5   ;;  %v2022_v3 = vsub.f32 %v4921_v18, %v2018_v23  }
 0x336   : > { %v5998_v36 = vmov %v2014_v14  ;;  %v5999_v37 = vmov %v2013_v17 }
 0x337   : > { %v2023_v35 = vmul.f32 %v2019_v0, %v2019_v0  ;;  %v2024_v34 = vmul.f32 %v2020_v1, %v2020_v1  ;;  %v2025_v38 = vmul.f32 %v2021_v2, %v2021_v2  ;;  %v2026_v15 = vmul.f32 %v2022_v3, %v2022_v3 }
 0x339   : > { %v2027_v60 = vsel %vm19_vm0, %v2023_v35, 0.0  ;;  %v2028_v47 = vsel %vm19_vm0, %v2024_v34, 0.0  ;;  %v2030_v20 = vsel %vm19_vm0, %v2025_v38, 0.0  ;;  %v2032_v12 = vsel %vm19_vm0, %v2026_v15, 0.0 }
 0x33a   : > { %v2029_v4 = vadd.f32 %v2028_v47, %v2027_v60  ;;  %v5996_v34 = vmov %v4958_v13  ;;  %v5997_v35 = vmov %v4955_v27  ;;  %v6000_v38 = vmov %v2012_v29 }
 0x33c   : > { %v2031_v53 = vadd.f32 %v2030_v20, %v2029_v4 }
 0x33e   : > { %v2033_v54 = vadd.f32 %v2032_v12, %v2031_v53 }
 0x340   : > { %v2034_v25 = vrot.slane %v2033_v54, 4 }
 0x342   : > { %v2035_v42 = vadd.f32 %v2034_v25, %v2033_v54 }
 0x344   : > { %v2036_v10 = vrot.slane %v2035_v42, 2 }
 0x346   : > { %v2037_v28 = vadd.f32 %v2036_v10, %v2035_v42 }
 0x348   : > { %v2038_v18 = vrot.slane %v2037_v28, 1 }
 0x34a   : > { %v2039_v30 = vadd.f32 %v2038_v18, %v2037_v28  }
 0x34c   : > { %vm51_vm6 = vcmp.lt.f32.partialorder %v2039_v30, %v5760_v26 }
 0x34d   : > { %vm52_vm7 = vmor %vm51_vm6, %vm34_vm1 }
 0x34e   : > { %v53_v46 = vsel %vm52_vm7, 1.0, %v2686_v44 }
 0x34f   : > { %v54_v39 = vsel %vm19_vm0, %v53_v46, inf }
 0x350   : > { %55 = vmin.xlane.f32.xlu0 %v54_v39  ;;  %v6001_v39 = vmov %v2011_v63 }
 0x3d9   : > { %v56_v11 = vpop.xlane.xlu0 %55 }
 0x3da   : > { %2233 = vpush %v56_v11 }
 0x40b   : > { %s2234_s27 = spop %2233 }
 0x40c   : > { %p58_p1 = scmp.gt.f32.partialorder %s2234_s27, 0.0 }
 0x40e   : > { %p5196_p3 = pneg %p58_p1 }
 0x410   : > { %p61_p4 = pnand %p5196_p3, %p5192_p2 }
 0x411   :  { %v6003_v26 = vmov (%p61_p4), %v2014_v14  ;;  %v6004_v27 = vmov (%p61_p4), %v2013_v17  ;;  %v6005_v28 = vmov (%p61_p4), %v2012_v29  ;;  %v6006_v29 = vmov (%p61_p4), %v2011_v63 }
 0x412   :  { %64 = sbr.rel (!%p61_p4) target bundleno = 227 (0xe3), region = 66 }
 0x417 PF:  { %2041 = vst.msk [vmem:[%s5276_s2] sm:$0xff] %vm19_vm0, %v2683_v29  ;;  %2042 = vst.msk [vmem:[%s5276_s2 + $0x8] sm:$0xff] %vm19_vm0, %v2679_v28  ;;  %v2683_v29 = vphi %v2735_v29, %v6006_v29   ;;  %v2679_v28 = vphi %v2733_v28, %v6005_v28   ;;  %v2675_v27 = vphi %v2731_v27, %v6004_v27   ;;  %v2671_v26 = vphi %v2729_v26, %v6003_v26  }
 0x418   :  { %2043 = vst.msk [vmem:[%s5276_s2 + $0x10] sm:$0xff] %vm19_vm0, %v2675_v27  ;;  %2044 = vst.msk [vmem:[%s5276_s2 + $0x18] sm:$0xff] %vm19_vm0, %v2671_v26 }

</bundles_post_ra>
